<compile_context>
chip_gen: v6e
topology: v6e:2x2x1
jax: 0.10.0
libtpu: 0.0.40
codegen_flags: <defaults>
</compile_context>

<pallas_src>
import functools

import jax
import jax.numpy as jnp
import numpy as np
from jax.experimental import pallas as pl
from jax.experimental.pallas import tpu as pltpu

# ----------------------------- model dims (small) -----------------------------
AFF_DIM = 8      # affordance_embedding_dim
MAT_DIM = 8      # material_embedding_dim
TASK_DIM = 8     # task_embedding_dim
OBJ_DIM = 8      # object_embedding_dim
STATE_DIM = 8    # state_embedding_dim
PART_DIM = 32    # part_encoder_dim
OBJ_ENC_DIM = 32 # object_encoder_dim
GRASP_DIM = 32   # grasp_encoder_dim (must equal object_encoder_dim)
LABEL_DIM = 8    # label_dim
N_PARTS = 3      # number of parts on the object

# vocab sizes (stand-ins for DataSpecification lists)
N_AFF, N_MAT, N_TASK, N_OBJ, N_STATE = 6, 5, 4, 5, 4

VOCAB_SLOT = 8                         # one-hot row stride per vocab field
assert GRASP_DIM == OBJ_ENC_DIM
assert max(N_AFF, N_MAT, N_TASK, N_OBJ, N_STATE) <= VOCAB_SLOT

# -------------------------- index-slab row layout (16, B) ---------------------
IDX_TASK, IDX_OBJ, IDX_STATE = 0, 1, 2
IDX_PART_AFF = 3          # rows 3,4,5 : per-part affordance index
IDX_PART_MAT = 6          # rows 6,7,8 : per-part material index
IDX_GRASP_AFF, IDX_GRASP_MAT = 9, 10
NUM_IDX = 11
NUM_IDX_ROWS = 16         # padded to a sublane multiple

# --------------------------- packed weight-slab layout -------------------------
# One (248, 32) f32 buffer; every section starts at an 8-sublane-aligned row.
# All weights are stored transposed (out, in) for feature-major y = W @ x.
# Gather tables hold embedding @ weight pre-products so in-kernel "embedding
# lookup + linear" is a single one-hot matmul.
SLAB_COLS = 32
R_PARTG = 0      # (32, 32) part gather:   cols [0:8)=aff_emb@Wp[:8] .T, [8:16)=mat_emb@Wp[8:] .T
R_TOSG  = 32     # (32, 32) tos  gather:   cols [0:8)=task, [8:16)=object, [16:24)=state projections .T
R_WOP   = 64     # (32, 32) object_propagation[parts_pool].T
R_WG    = 96     # (32, 32) grasp_propagation.T
R_WFCO  = 128    # ( 8, 32) fc[object_encodes].T
R_WFCG  = 136    # ( 8, 32) fc[grasp_encodes].T
R_BP    = 144    # (32, col0) part bias
R_BO    = 176    # (32, col0) object bias
R_BG    = 208    # (32, col0) grasp bias
R_BF    = 240    # ( 8, col0) fc bias
SLAB_ROWS = 248


# --------------------------------- kernel -------------------------------------
def cage_kernel(idx_ref, w_ref, out_ref):
    f32 = jnp.float32
    tb = out_ref.shape[1]                       # batch tile, on the lane axis

    # Resident weight slab (constant index_map -> fetched once).
    part_gather = w_ref[R_PARTG:R_PARTG + PART_DIM, :]        # (32, 32)
    tos_gather  = w_ref[R_TOSG:R_TOSG + OBJ_ENC_DIM, :]       # (32, 32)
    w_obj_parts = w_ref[R_WOP:R_WOP + OBJ_ENC_DIM, :]         # (32, 32)
    w_grasp     = w_ref[R_WG:R_WG + GRASP_DIM, :]             # (32, 32)
    w_fc_o      = w_ref[R_WFCO:R_WFCO + LABEL_DIM, :]         # (8, 32)
    w_fc_g      = w_ref[R_WFCG:R_WFCG + LABEL_DIM, :]         # (8, 32)
    b_part      = w_ref[R_BP:R_BP + PART_DIM, 0:1]            # (32, 1) lane-bcast
    b_obj       = w_ref[R_BO:R_BO + OBJ_ENC_DIM, 0:1]
    b_grasp     = w_ref[R_BG:R_BG + GRASP_DIM, 0:1]
    b_fc        = w_ref[R_BF:R_BF + LABEL_DIM, 0:1]           # (8, 1)

    idx = idx_ref[...]                                        # (16, tb) int32

    # Sublane-index iota, hoisted (built once per grid step).
    row32 = jax.lax.broadcasted_iota(jnp.int32, (SLAB_COLS, tb), 0)   # (32, tb)

    def field(r):                                             # (1, tb) int32
        return idx[r:r + 1, :]

    def part_encode(r_aff, r_mat):
        # One-hot over 32 gather slots (aff in rows [0:8), mat in rows [8:16)),
        # gathered + projected by a single MXU matmul against the folded table.
        oh = ((row32 == field(r_aff)) |
              (row32 == field(r_mat) + VOCAB_SLOT)).astype(f32)       # (32, tb)
        pre = jnp.dot(part_gather, oh, preferred_element_type=f32)    # (32, tb)
        return jnp.maximum(pre + b_part, 0.0)

    # ObjectEncoder max-pool over the object's parts (pooling_method == 'max'),
    # computed incrementally to cap live (32, tb) intermediates.
    pool = part_encode(IDX_PART_AFF + 0, IDX_PART_MAT + 0)
    pool = jnp.maximum(pool, part_encode(IDX_PART_AFF + 1, IDX_PART_MAT + 1))
    pool = jnp.maximum(pool, part_encode(IDX_PART_AFF + 2, IDX_PART_MAT + 2))
    grasp_part = part_encode(IDX_GRASP_AFF, IDX_GRASP_MAT)

    # ObjectEncoder: cat(task, object, state) handled by a 3-hot gather matmul,
    # parts_pool by a plain matmul (split-weight sum == concat + single linear).
    oh_tos = ((row32 == field(IDX_TASK)) |
              (row32 == field(IDX_OBJ) + VOCAB_SLOT) |
              (row32 == field(IDX_STATE) + 2 * VOCAB_SLOT)).astype(f32)
    obj_enc = jnp.maximum(
        jnp.dot(tos_gather, oh_tos, preferred_element_type=f32)
        + jnp.dot(w_obj_parts, pool, preferred_element_type=f32)
        + b_obj, 0.0)                                          # (32, tb)

    # GraspEncoder linear.
    grasp_enc = jnp.maximum(
        jnp.dot(w_grasp, grasp_part, preferred_element_type=f32) + b_grasp,
        0.0)                                                   # (32, tb)

    # Final fc over cat(object_encodes, grasp_encodes) (split weights).
    preds = (jnp.dot(w_fc_o, obj_enc, preferred_element_type=f32)
             + jnp.dot(w_fc_g, grasp_enc, preferred_element_type=f32)
             + b_fc)                                           # (8, tb)

    # LogSoftmax over the LABEL_DIM logits of each sample (stabilized); the
    # label axis is the sublane axis, the reduction goes to the XLU.
    m = jnp.max(preds, axis=0, keepdims=True)                  # (1, tb)
    lse = m + jnp.log(jnp.sum(jnp.exp(preds - m), axis=0, keepdims=True))
    out_ref[...] = preds - lse                                 # lane-dense store


# --------------------------------- wrapper ------------------------------------
def pack_params(params):
    """Fold embeddings into projection tables and pack everything into one
    (SLAB_ROWS, 32) f32 slab (built once, outside the kernel)."""
    hp = jax.lax.Precision.HIGHEST
    dot = lambda a, b: jnp.dot(a, b, precision=hp)

    aff_proj   = dot(params["aff_emb"],   params["w_part"][:AFF_DIM])       # (N_AFF, 32)
    mat_proj   = dot(params["mat_emb"],   params["w_part"][AFF_DIM:])       # (N_MAT, 32)
    task_proj  = dot(params["task_emb"],  params["w_obj_tos"][:TASK_DIM])   # (N_TASK, 32)
    objc_proj  = dot(params["obj_emb"],
                     params["w_obj_tos"][TASK_DIM:TASK_DIM + OBJ_DIM])      # (N_OBJ, 32)
    state_proj = dot(params["state_emb"],
                     params["w_obj_tos"][TASK_DIM + OBJ_DIM:])              # (N_STATE, 32)

    slab = jnp.zeros((SLAB_ROWS, SLAB_COLS), jnp.float32)
    # part gather table (transposed): aff vocab in cols [0:8), mat in [8:16)
    slab = slab.at[R_PARTG:R_PARTG + PART_DIM, 0:N_AFF].set(aff_proj.T)
    slab = slab.at[R_PARTG:R_PARTG + PART_DIM,
                   VOCAB_SLOT:VOCAB_SLOT + N_MAT].set(mat_proj.T)
    # tos gather table: task [0:8), object [8:16), state [16:24)
    slab = slab.at[R_TOSG:R_TOSG + OBJ_ENC_DIM, 0:N_TASK].set(task_proj.T)
    slab = slab.at[R_TOSG:R_TOSG + OBJ_ENC_DIM,
                   VOCAB_SLOT:VOCAB_SLOT + N_OBJ].set(objc_proj.T)
    slab = slab.at[R_TOSG:R_TOSG + OBJ_ENC_DIM,
                   2 * VOCAB_SLOT:2 * VOCAB_SLOT + N_STATE].set(state_proj.T)
    # plain transposed weights
    slab = slab.at[R_WOP:R_WOP + OBJ_ENC_DIM, :PART_DIM].set(params["w_obj_parts"].T)
    slab = slab.at[R_WG:R_WG + GRASP_DIM, :PART_DIM].set(params["w_grasp"].T)
    slab = slab.at[R_WFCO:R_WFCO + LABEL_DIM, :OBJ_ENC_DIM].set(params["w_fc_obj"].T)
    slab = slab.at[R_WFCG:R_WFCG + LABEL_DIM, :GRASP_DIM].set(params["w_fc_grasp"].T)
    # bias columns (lane 0 of dedicated row blocks; features vary along sublanes)
    slab = slab.at[R_BP:R_BP + PART_DIM, 0].set(params["b_part"][0])
    slab = slab.at[R_BO:R_BO + OBJ_ENC_DIM, 0].set(params["b_obj"][0])
    slab = slab.at[R_BG:R_BG + GRASP_DIM, 0].set(params["b_grasp"][0])
    slab = slab.at[R_BF:R_BF + LABEL_DIM, 0].set(params["b_fc"][0])
    return slab


@functools.partial(jax.jit, static_argnames=("block_b",))
def cage_forward(slab, task_idx, obj_idx, state_idx,
                 part_aff_idx, part_mat_idx, grasp_aff_idx, grasp_mat_idx,
                 block_b=1024):
    """Batched forward.  *_idx are int32 arrays with leading batch dim B.
    Returns (B, LABEL_DIM) log-probs.  Keep B_pad/block_b >= 2 on v7x so the
    parallel batch grid can use both TensorCores."""
    assert block_b % 128 == 0
    B = task_idx.shape[0]
    B_pad = pl.cdiv(B, block_b) * block_b

    # Only glue left: pack the 11 per-sample indices batch-in-lanes (16, B_pad).
    rows = jnp.stack(
        [task_idx, obj_idx, state_idx,
         part_aff_idx[:, 0], part_aff_idx[:, 1], part_aff_idx[:, 2],
         part_mat_idx[:, 0], part_mat_idx[:, 1], part_mat_idx[:, 2],
         grasp_aff_idx, grasp_mat_idx], axis=0).astype(jnp.int32)      # (11, B)
    idx = jnp.pad(rows, ((0, NUM_IDX_ROWS - NUM_IDX), (0, B_pad - B)))  # (16, B_pad)
    # Padded samples get index 0 everywhere -> valid (discarded) outputs.

    grid = (B_pad // block_b,)
    out = pl.pallas_call(
        cage_kernel,
        out_shape=jax.ShapeDtypeStruct((LABEL_DIM, B_pad), jnp.float32),
        grid_spec=pltpu.PrefetchScalarGridSpec(
            num_scalar_prefetch=0,
            grid=grid,
            in_specs=[
                pl.BlockSpec((NUM_IDX_ROWS, block_b), lambda b: (0, b)),
                # constant index_map -> weight slab stays VMEM-resident
                pl.BlockSpec((SLAB_ROWS, SLAB_COLS), lambda b: (0, 0)),
            ],
            out_specs=pl.BlockSpec((LABEL_DIM, block_b), lambda b: (0, b)),
        ),
        compiler_params=pltpu.CompilerParams(
            dimension_semantics=("parallel",),
            vmem_limit_bytes=32 * 1024 * 1024),
    )(idx, slab)

    # Layout plumbing back to (B, LABEL_DIM); tiny (32 B/sample).
    return out[:, :B].T


# ------------------------- deterministic parameter init -----------------------
def init_params(key):
    ks = jax.random.split(key, 16)
    f = jnp.float32
    TOS_DIM = TASK_DIM + OBJ_DIM + STATE_DIM
    PART_IN_DIM = AFF_DIM + MAT_DIM
    p = {
        # embedding tables
        "aff_emb":   jax.random.normal(ks[0], (N_AFF, AFF_DIM), f),
        "mat_emb":   jax.random.normal(ks[1], (N_MAT, MAT_DIM), f),
        "task_emb":  jax.random.normal(ks[2], (N_TASK, TASK_DIM), f),
        "obj_emb":   jax.random.normal(ks[3], (N_OBJ, OBJ_DIM), f),
        "state_emb": jax.random.normal(ks[4], (N_STATE, STATE_DIM), f),
        # PartEncoder linear: (AFF+MAT) -> PART_DIM
        "w_part": jax.random.normal(ks[5], (PART_IN_DIM, PART_DIM), f) * 0.1,
        "b_part": jax.random.normal(ks[6], (1, PART_DIM), f) * 0.1,
        # ObjectEncoder linear: (TASK+OBJ+STATE+PART) -> OBJ_ENC_DIM, split
        "w_obj_tos":   jax.random.normal(ks[7], (TOS_DIM, OBJ_ENC_DIM), f) * 0.1,
        "w_obj_parts": jax.random.normal(ks[8], (PART_DIM, OBJ_ENC_DIM), f) * 0.1,
        "b_obj":       jax.random.normal(ks[9], (1, OBJ_ENC_DIM), f) * 0.1,
        # GraspEncoder linear: PART_DIM -> GRASP_DIM
        "w_grasp": jax.random.normal(ks[10], (PART_DIM, GRASP_DIM), f) * 0.1,
        "b_grasp": jax.random.normal(ks[11], (1, GRASP_DIM), f) * 0.1,
        # final fc: (OBJ_ENC_DIM + GRASP_DIM) -> LABEL_DIM, split
        "w_fc_obj":   jax.random.normal(ks[12], (OBJ_ENC_DIM, LABEL_DIM), f) * 0.1,
        "w_fc_grasp": jax.random.normal(ks[13], (GRASP_DIM, LABEL_DIM), f) * 0.1,
        "b_fc":       jax.random.normal(ks[14], (1, LABEL_DIM), f) * 0.1,
    }
    return p


# ------------------------------ pure-JAX reference -----------------------------
def _cage_reference_single(params, task_idx, obj_idx, state_idx,
                           part_aff_idx, part_mat_idx, grasp_aff_idx, grasp_mat_idx):
    def part_encode(a, m):
        x = jnp.concatenate([params["aff_emb"][a], params["mat_emb"][m]])
        return jax.nn.relu(x @ params["w_part"] + params["b_part"][0])

    parts = jnp.stack([part_encode(part_aff_idx[i], part_mat_idx[i])
                       for i in range(N_PARTS)])
    parts_pool = jnp.max(parts, axis=0)
    tos = jnp.concatenate([params["task_emb"][task_idx],
                           params["obj_emb"][obj_idx],
                           params["state_emb"][state_idx]])
    obj_enc = jax.nn.relu(tos @ params["w_obj_tos"] + parts_pool @ params["w_obj_parts"]
                          + params["b_obj"][0])
    gpart = part_encode(grasp_aff_idx, grasp_mat_idx)
    grasp_enc = jax.nn.relu(gpart @ params["w_grasp"] + params["b_grasp"][0])
    preds = (obj_enc @ params["w_fc_obj"] + grasp_enc @ params["w_fc_grasp"]
             + params["b_fc"][0])
    return jax.nn.log_softmax(preds, axis=0)


cage_reference = jax.vmap(_cage_reference_single,
                          in_axes=(None, 0, 0, 0, 0, 0, 0, 0))


# ----------------------------------- main --------------------------------------
if __name__ == "__main__":
    key = jax.random.PRNGKey(0)
    pkey, ikey = jax.random.split(key)
    params = init_params(pkey)
    slab = pack_params(params)

    # deterministic batched "string -> index" inputs
    B = 2500          # not a multiple of the tile -> exercises the padding path
    BLOCK_B = 1024    # rows per grid step (lane-dense); grid = 3 steps
    ks = jax.random.split(ikey, 7)
    task_idx = jax.random.randint(ks[0], (B,), 0, N_TASK, dtype=jnp.int32)
    obj_idx = jax.random.randint(ks[1], (B,), 0, N_OBJ, dtype=jnp.int32)
    state_idx = jax.random.randint(ks[2], (B,), 0, N_STATE, dtype=jnp.int32)
    part_aff_idx = jax.random.randint(ks[3], (B, N_PARTS), 0, N_AFF, dtype=jnp.int32)
    part_mat_idx = jax.random.randint(ks[4], (B, N_PARTS), 0, N_MAT, dtype=jnp.int32)
    grasp_aff_idx = jax.random.randint(ks[5], (B,), 0, N_AFF, dtype=jnp.int32)
    grasp_mat_idx = jax.random.randint(ks[6], (B,), 0, N_MAT, dtype=jnp.int32)

    log_probs = cage_forward(slab,
                             task_idx, obj_idx, state_idx,
                             part_aff_idx, part_mat_idx,
                             grasp_aff_idx, grasp_mat_idx,
                             block_b=BLOCK_B)
    log_probs = jax.block_until_ready(log_probs)

    ref = cage_reference(params, task_idx, obj_idx, state_idx,
                         part_aff_idx, part_mat_idx, grasp_aff_idx, grasp_mat_idx)
    np.testing.assert_allclose(np.asarray(log_probs), np.asarray(ref),
                               rtol=1e-4, atol=1e-5)

    print("KERNEL_OK")
</pallas_src>

<mosaic_0001>
module attributes {stable_mosaic.version = 11 : i64} {
  func.func @cage_kernel(%arg0: i32, %arg1: memref<16x1024xi32, #tpu.memory_space<vmem>>, %arg2: memref<248x32xf32, #tpu.memory_space<vmem>>, %arg3: memref<8x1024xf32, #tpu.memory_space<vmem>>) attributes {dimension_semantics = [#tpu.dimension_semantics<parallel>], iteration_bounds = array<i64: 3>, scalar_prefetch = 0 : i64, scratch_operands = 0 : i64, tpu.core_type = #tpu.core_type<tc>, window_params = [{transform_indices = @transform_0, window_bounds = array<i64: 16, 1024>}, {pipeline_mode = #tpu.pipeline_mode<synchronous>, transform_indices = @transform_1, window_bounds = array<i64: 248, 32>}, {transform_indices = @transform_2, window_bounds = array<i64: 8, 1024>}]} {
    %c0 = arith.constant 0 : index
    %c0_0 = arith.constant 0 : index
    %0 = vector.load %arg2[%c0, %c0_0] : memref<248x32xf32, #tpu.memory_space<vmem>>, vector<32x32xf32>
    %c32 = arith.constant 32 : index
    %c0_1 = arith.constant 0 : index
    %1 = vector.load %arg2[%c32, %c0_1] : memref<248x32xf32, #tpu.memory_space<vmem>>, vector<32x32xf32>
    %c64 = arith.constant 64 : index
    %c0_2 = arith.constant 0 : index
    %2 = vector.load %arg2[%c64, %c0_2] : memref<248x32xf32, #tpu.memory_space<vmem>>, vector<32x32xf32>
    %c96 = arith.constant 96 : index
    %c0_3 = arith.constant 0 : index
    %3 = vector.load %arg2[%c96, %c0_3] : memref<248x32xf32, #tpu.memory_space<vmem>>, vector<32x32xf32>
    %c128 = arith.constant 128 : index
    %c0_4 = arith.constant 0 : index
    %4 = vector.load %arg2[%c128, %c0_4] : memref<248x32xf32, #tpu.memory_space<vmem>>, vector<8x32xf32>
    %c136 = arith.constant 136 : index
    %c0_5 = arith.constant 0 : index
    %5 = vector.load %arg2[%c136, %c0_5] : memref<248x32xf32, #tpu.memory_space<vmem>>, vector<8x32xf32>
    %c144 = arith.constant 144 : index
    %c0_6 = arith.constant 0 : index
    %6 = vector.load %arg2[%c144, %c0_6] : memref<248x32xf32, #tpu.memory_space<vmem>>, vector<32x1xf32>
    %c176 = arith.constant 176 : index
    %c0_7 = arith.constant 0 : index
    %7 = vector.load %arg2[%c176, %c0_7] : memref<248x32xf32, #tpu.memory_space<vmem>>, vector<32x1xf32>
    %c208 = arith.constant 208 : index
    %c0_8 = arith.constant 0 : index
    %8 = vector.load %arg2[%c208, %c0_8] : memref<248x32xf32, #tpu.memory_space<vmem>>, vector<32x1xf32>
    %c240 = arith.constant 240 : index
    %c0_9 = arith.constant 0 : index
    %9 = vector.load %arg2[%c240, %c0_9] : memref<248x32xf32, #tpu.memory_space<vmem>>, vector<8x1xf32>
    %c0_10 = arith.constant 0 : index
    %c0_11 = arith.constant 0 : index
    %10 = vector.load %arg1[%c0_10, %c0_11] : memref<16x1024xi32, #tpu.memory_space<vmem>>, vector<16x1024xi32>
    %11 = tpu.iota {dimensions = array<i32: 0>} : vector<32x1024xi32>
    %12 = vector.extract_strided_slice %10 {offsets = [3, 0], sizes = [1, 1024], strides = [1, 1]} : vector<16x1024xi32> to vector<1x1024xi32>
    %13 = vector.broadcast %12 : vector<1x1024xi32> to vector<32x1024xi32>
    %14 = arith.cmpi eq, %11, %13 : vector<32x1024xi32>
    %15 = vector.extract_strided_slice %10 {offsets = [6, 0], sizes = [1, 1024], strides = [1, 1]} : vector<16x1024xi32> to vector<1x1024xi32>
    %c8_i32 = arith.constant 8 : i32
    %16 = vector.broadcast %c8_i32 : i32 to vector<1x1024xi32>
    %17 = arith.addi %15, %16 : vector<1x1024xi32>
    %18 = vector.broadcast %17 : vector<1x1024xi32> to vector<32x1024xi32>
    %19 = arith.cmpi eq, %11, %18 : vector<32x1024xi32>
    %20 = arith.ori %14, %19 : vector<32x1024xi1>
    %21 = arith.extui %20 : vector<32x1024xi1> to vector<32x1024xi32>
    %22 = arith.sitofp %21 : vector<32x1024xi32> to vector<32x1024xf32>
    %cst = arith.constant dense<0.000000e+00> : vector<32x1024xf32>
    %23 = tpu.matmul %0, %22, %cst {dimension_numbers = #tpu.dot_dimension_numbers<[1], [0], [0], [1], [0, 0, 1, 1], [], []>} : vector<32x32xf32>, vector<32x1024xf32>, vector<32x1024xf32> -> vector<32x1024xf32>
    %24 = vector.broadcast %6 : vector<32x1xf32> to vector<32x1024xf32>
    %25 = arith.addf %23, %24 : vector<32x1024xf32>
    %cst_12 = arith.constant 0.000000e+00 : f32
    %26 = vector.broadcast %cst_12 : f32 to vector<32x1024xf32>
    %27 = arith.maximumf %25, %26 : vector<32x1024xf32>
    %28 = vector.extract_strided_slice %10 {offsets = [4, 0], sizes = [1, 1024], strides = [1, 1]} : vector<16x1024xi32> to vector<1x1024xi32>
    %29 = vector.broadcast %28 : vector<1x1024xi32> to vector<32x1024xi32>
    %30 = arith.cmpi eq, %11, %29 : vector<32x1024xi32>
    %31 = vector.extract_strided_slice %10 {offsets = [7, 0], sizes = [1, 1024], strides = [1, 1]} : vector<16x1024xi32> to vector<1x1024xi32>
    %c8_i32_13 = arith.constant 8 : i32
    %32 = vector.broadcast %c8_i32_13 : i32 to vector<1x1024xi32>
    %33 = arith.addi %31, %32 : vector<1x1024xi32>
    %34 = vector.broadcast %33 : vector<1x1024xi32> to vector<32x1024xi32>
    %35 = arith.cmpi eq, %11, %34 : vector<32x1024xi32>
    %36 = arith.ori %30, %35 : vector<32x1024xi1>
    %37 = arith.extui %36 : vector<32x1024xi1> to vector<32x1024xi32>
    %38 = arith.sitofp %37 : vector<32x1024xi32> to vector<32x1024xf32>
    %cst_14 = arith.constant dense<0.000000e+00> : vector<32x1024xf32>
    %39 = tpu.matmul %0, %38, %cst_14 {dimension_numbers = #tpu.dot_dimension_numbers<[1], [0], [0], [1], [0, 0, 1, 1], [], []>} : vector<32x32xf32>, vector<32x1024xf32>, vector<32x1024xf32> -> vector<32x1024xf32>
    %40 = vector.broadcast %6 : vector<32x1xf32> to vector<32x1024xf32>
    %41 = arith.addf %39, %40 : vector<32x1024xf32>
    %cst_15 = arith.constant 0.000000e+00 : f32
    %42 = vector.broadcast %cst_15 : f32 to vector<32x1024xf32>
    %43 = arith.maximumf %41, %42 : vector<32x1024xf32>
    %44 = arith.maximumf %27, %43 : vector<32x1024xf32>
    %45 = vector.extract_strided_slice %10 {offsets = [5, 0], sizes = [1, 1024], strides = [1, 1]} : vector<16x1024xi32> to vector<1x1024xi32>
    %46 = vector.broadcast %45 : vector<1x1024xi32> to vector<32x1024xi32>
    %47 = arith.cmpi eq, %11, %46 : vector<32x1024xi32>
    %48 = vector.extract_strided_slice %10 {offsets = [8, 0], sizes = [1, 1024], strides = [1, 1]} : vector<16x1024xi32> to vector<1x1024xi32>
    %c8_i32_16 = arith.constant 8 : i32
    %49 = vector.broadcast %c8_i32_16 : i32 to vector<1x1024xi32>
    %50 = arith.addi %48, %49 : vector<1x1024xi32>
    %51 = vector.broadcast %50 : vector<1x1024xi32> to vector<32x1024xi32>
    %52 = arith.cmpi eq, %11, %51 : vector<32x1024xi32>
    %53 = arith.ori %47, %52 : vector<32x1024xi1>
    %54 = arith.extui %53 : vector<32x1024xi1> to vector<32x1024xi32>
    %55 = arith.sitofp %54 : vector<32x1024xi32> to vector<32x1024xf32>
    %cst_17 = arith.constant dense<0.000000e+00> : vector<32x1024xf32>
    %56 = tpu.matmul %0, %55, %cst_17 {dimension_numbers = #tpu.dot_dimension_numbers<[1], [0], [0], [1], [0, 0, 1, 1], [], []>} : vector<32x32xf32>, vector<32x1024xf32>, vector<32x1024xf32> -> vector<32x1024xf32>
    %57 = vector.broadcast %6 : vector<32x1xf32> to vector<32x1024xf32>
    %58 = arith.addf %56, %57 : vector<32x1024xf32>
    %cst_18 = arith.constant 0.000000e+00 : f32
    %59 = vector.broadcast %cst_18 : f32 to vector<32x1024xf32>
    %60 = arith.maximumf %58, %59 : vector<32x1024xf32>
    %61 = arith.maximumf %44, %60 : vector<32x1024xf32>
    %62 = vector.extract_strided_slice %10 {offsets = [9, 0], sizes = [1, 1024], strides = [1, 1]} : vector<16x1024xi32> to vector<1x1024xi32>
    %63 = vector.broadcast %62 : vector<1x1024xi32> to vector<32x1024xi32>
    %64 = arith.cmpi eq, %11, %63 : vector<32x1024xi32>
    %65 = vector.extract_strided_slice %10 {offsets = [10, 0], sizes = [1, 1024], strides = [1, 1]} : vector<16x1024xi32> to vector<1x1024xi32>
    %c8_i32_19 = arith.constant 8 : i32
    %66 = vector.broadcast %c8_i32_19 : i32 to vector<1x1024xi32>
    %67 = arith.addi %65, %66 : vector<1x1024xi32>
    %68 = vector.broadcast %67 : vector<1x1024xi32> to vector<32x1024xi32>
    %69 = arith.cmpi eq, %11, %68 : vector<32x1024xi32>
    %70 = arith.ori %64, %69 : vector<32x1024xi1>
    %71 = arith.extui %70 : vector<32x1024xi1> to vector<32x1024xi32>
    %72 = arith.sitofp %71 : vector<32x1024xi32> to vector<32x1024xf32>
    %cst_20 = arith.constant dense<0.000000e+00> : vector<32x1024xf32>
    %73 = tpu.matmul %0, %72, %cst_20 {dimension_numbers = #tpu.dot_dimension_numbers<[1], [0], [0], [1], [0, 0, 1, 1], [], []>} : vector<32x32xf32>, vector<32x1024xf32>, vector<32x1024xf32> -> vector<32x1024xf32>
    %74 = vector.broadcast %6 : vector<32x1xf32> to vector<32x1024xf32>
    %75 = arith.addf %73, %74 : vector<32x1024xf32>
    %cst_21 = arith.constant 0.000000e+00 : f32
    %76 = vector.broadcast %cst_21 : f32 to vector<32x1024xf32>
    %77 = arith.maximumf %75, %76 : vector<32x1024xf32>
    %78 = vector.extract_strided_slice %10 {offsets = [0, 0], sizes = [1, 1024], strides = [1, 1]} : vector<16x1024xi32> to vector<1x1024xi32>
    %79 = vector.broadcast %78 : vector<1x1024xi32> to vector<32x1024xi32>
    %80 = arith.cmpi eq, %11, %79 : vector<32x1024xi32>
    %81 = vector.extract_strided_slice %10 {offsets = [1, 0], sizes = [1, 1024], strides = [1, 1]} : vector<16x1024xi32> to vector<1x1024xi32>
    %c8_i32_22 = arith.constant 8 : i32
    %82 = vector.broadcast %c8_i32_22 : i32 to vector<1x1024xi32>
    %83 = arith.addi %81, %82 : vector<1x1024xi32>
    %84 = vector.broadcast %83 : vector<1x1024xi32> to vector<32x1024xi32>
    %85 = arith.cmpi eq, %11, %84 : vector<32x1024xi32>
    %86 = arith.ori %80, %85 : vector<32x1024xi1>
    %87 = vector.extract_strided_slice %10 {offsets = [2, 0], sizes = [1, 1024], strides = [1, 1]} : vector<16x1024xi32> to vector<1x1024xi32>
    %c16_i32 = arith.constant 16 : i32
    %88 = vector.broadcast %c16_i32 : i32 to vector<1x1024xi32>
    %89 = arith.addi %87, %88 : vector<1x1024xi32>
    %90 = vector.broadcast %89 : vector<1x1024xi32> to vector<32x1024xi32>
    %91 = arith.cmpi eq, %11, %90 : vector<32x1024xi32>
    %92 = arith.ori %86, %91 : vector<32x1024xi1>
    %93 = arith.extui %92 : vector<32x1024xi1> to vector<32x1024xi32>
    %94 = arith.sitofp %93 : vector<32x1024xi32> to vector<32x1024xf32>
    %cst_23 = arith.constant dense<0.000000e+00> : vector<32x1024xf32>
    %95 = tpu.matmul %1, %94, %cst_23 {dimension_numbers = #tpu.dot_dimension_numbers<[1], [0], [0], [1], [0, 0, 1, 1], [], []>} : vector<32x32xf32>, vector<32x1024xf32>, vector<32x1024xf32> -> vector<32x1024xf32>
    %cst_24 = arith.constant dense<0.000000e+00> : vector<32x1024xf32>
    %96 = tpu.matmul %2, %61, %cst_24 {dimension_numbers = #tpu.dot_dimension_numbers<[1], [0], [0], [1], [0, 0, 1, 1], [], []>} : vector<32x32xf32>, vector<32x1024xf32>, vector<32x1024xf32> -> vector<32x1024xf32>
    %97 = arith.addf %95, %96 : vector<32x1024xf32>
    %98 = vector.broadcast %7 : vector<32x1xf32> to vector<32x1024xf32>
    %99 = arith.addf %97, %98 : vector<32x1024xf32>
    %cst_25 = arith.constant 0.000000e+00 : f32
    %100 = vector.broadcast %cst_25 : f32 to vector<32x1024xf32>
    %101 = arith.maximumf %99, %100 : vector<32x1024xf32>
    %cst_26 = arith.constant dense<0.000000e+00> : vector<32x1024xf32>
    %102 = tpu.matmul %3, %77, %cst_26 {dimension_numbers = #tpu.dot_dimension_numbers<[1], [0], [0], [1], [0, 0, 1, 1], [], []>} : vector<32x32xf32>, vector<32x1024xf32>, vector<32x1024xf32> -> vector<32x1024xf32>
    %103 = vector.broadcast %8 : vector<32x1xf32> to vector<32x1024xf32>
    %104 = arith.addf %102, %103 : vector<32x1024xf32>
    %cst_27 = arith.constant 0.000000e+00 : f32
    %105 = vector.broadcast %cst_27 : f32 to vector<32x1024xf32>
    %106 = arith.maximumf %104, %105 : vector<32x1024xf32>
    %cst_28 = arith.constant dense<0.000000e+00> : vector<8x1024xf32>
    %107 = tpu.matmul %4, %101, %cst_28 {dimension_numbers = #tpu.dot_dimension_numbers<[1], [0], [0], [1], [0, 0, 1, 1], [], []>} : vector<8x32xf32>, vector<32x1024xf32>, vector<8x1024xf32> -> vector<8x1024xf32>
    %cst_29 = arith.constant dense<0.000000e+00> : vector<8x1024xf32>
    %108 = tpu.matmul %5, %106, %cst_29 {dimension_numbers = #tpu.dot_dimension_numbers<[1], [0], [0], [1], [0, 0, 1, 1], [], []>} : vector<8x32xf32>, vector<32x1024xf32>, vector<8x1024xf32> -> vector<8x1024xf32>
    %109 = arith.addf %107, %108 : vector<8x1024xf32>
    %110 = vector.broadcast %9 : vector<8x1xf32> to vector<8x1024xf32>
    %111 = arith.addf %109, %110 : vector<8x1024xf32>
    %cst_30 = arith.constant dense<0xFF800000> : vector<1024xf32>
    %112 = vector.multi_reduction <maximumf>, %111, %cst_30 [0] : vector<8x1024xf32> to vector<1024xf32>
    %113 = vector.shape_cast %112 : vector<1024xf32> to vector<1x1024xf32>
    %114 = vector.broadcast %113 : vector<1x1024xf32> to vector<8x1024xf32>
    %115 = arith.subf %111, %114 : vector<8x1024xf32>
    %116 = math.exp %115 : vector<8x1024xf32>
    %cst_31 = arith.constant dense<0.000000e+00> : vector<1024xf32>
    %117 = vector.multi_reduction <add>, %116, %cst_31 [0] : vector<8x1024xf32> to vector<1024xf32>
    %118 = vector.shape_cast %117 : vector<1024xf32> to vector<1x1024xf32>
    %119 = math.log %118 : vector<1x1024xf32>
    %120 = arith.addf %113, %119 : vector<1x1024xf32>
    %121 = vector.broadcast %120 : vector<1x1024xf32> to vector<8x1024xf32>
    %122 = arith.subf %111, %121 : vector<8x1024xf32>
    %c0_32 = arith.constant 0 : index
    %c0_33 = arith.constant 0 : index
    %123 = vector.load %arg3[%c0_32, %c0_33] : memref<8x1024xf32, #tpu.memory_space<vmem>>, vector<8x1024xf32>
    tpu.vector_store %arg3[%c0_32, %c0_33], %122 {strides = array<i32>} : memref<8x1024xf32, #tpu.memory_space<vmem>>, vector<8x1024xf32>,
    return
  }
  func.func @transform_0(%arg0: i32) -> (i32, i32) {
    %c0_i32 = arith.constant 0 : i32
    %c0_i32_0 = arith.constant 0 : i32
    return %c0_i32, %arg0 : i32, i32
  }
  func.func @transform_1(%arg0: i32) -> (i32, i32) {
    %c0_i32 = arith.constant 0 : i32
    %c0_i32_0 = arith.constant 0 : i32
    %c0_i32_1 = arith.constant 0 : i32
    return %c0_i32, %c0_i32_0 : i32, i32
  }
  func.func @transform_2(%arg0: i32) -> (i32, i32) {
    %c0_i32 = arith.constant 0 : i32
    %c0_i32_0 = arith.constant 0 : i32
    return %c0_i32, %arg0 : i32, i32
  }
}

</mosaic_0001>

<bundles_post_ra>
// kernel: cage_forward.1
= control target key start
LH: loop header
LB: loop body
LE: loop exit
PB: predicated region body
PF: predicated region fallthrough
CT: control target
= control target key end

     0   :  { %s5755_s9 = smov 0   ;;  %s5757_s10 = smov 0   ;;  %s9827_s0 = inlined_call_operand.vmem [shape: s32[16,3072], index: 0, kind: input, shape index: {}]   ;;  %s9828_s1 = inlined_call_operand.vmem [shape: f32[248,32], index: 1, kind: input, shape index: {}]   ;;  %s9829_s2 = inlined_call_operand.vmem [shape: f32[8,3072], index: 2, kind: output, shape index: {}]  }
   0x1   :  { %s5759_s11 = smov 0  }
   0x2 LB: > { %s5186_s12 = sadd.s32 4294967295, %s5735_s11   ;;  %s5772_s13 = sadd.s32 1, %s5735_s11   ;;  %s5735_s11 = sphi %s5759_s11, %s10355_s11   ;;  %s5731_s10 = sphi %s5757_s10, %s10354_s10   ;;  %s5727_s9 = sphi %s5755_s9, %s10353_s9  }
   0x3   : > { %s16_s14 = ssub.s32 %s5735_s11, %s5772_s13  ;;  %s19_s15 = sadd.s32 1, %s5731_s10 }
   0x4   : > { %p17_p0 = scmp.eq.s32.totalorder %s16_s14, 0  ;;  %p26_p1 = scmp.ne.s32.totalorder %s5731_s10, %s5727_s9 }
   0x5   : > { %p27_p2 = scmp.eq.s32.totalorder %s5735_s11, 0  ;;  %p5189_p4 = scmp.ge.s32.totalorder %s5735_s11, 3 }
   0x6   : > { %s5781_s16 = scalar_select %p17_p0, %s5731_s10, %s19_s15  }
   0x7   : > { %p28_p3 = por %p27_p2, %p26_p1  ;;  %102 = sbr.rel (%p5189_p4) target bundleno = 24 (0x18), region = 20 }
   0xc   : > { %105 = sbr.rel (!%p28_p3) target bundleno = 24 (0x18), region = 24  ;;  %s107_s17 = sand.u32 (%p28_p3), 1, %s5731_s10  }
   0xd   : > { %s5639_s18 = sshll.u32 (%p28_p3), %s5735_s11, 6  ;;  %s5190_s19 = sshll.u32 (%p28_p3), %s107_s17, 7 }
   0xe   : > { %s5789_s22 = scalar_lea.vmem (%p28_p3), %s9827_s0, %s5639_s18  ;;  %s109_s23 = scalar_lea.vmem (%p28_p3), [#allocation2], %s5190_s19 }
   0xf   : > { %v125_v0 = vld [vmem:[%s5789_s22] sm:$0xff] (%p28_p3)  ;;  %v127_v1 = vld [vmem:[%s5789_s22 + $0x8] sm:$0xff] (%p28_p3)  ;;  %v129_v2 = vld [vmem:[%s5789_s22 + $0x10] sm:$0xff] (%p28_p3) }
  0x10   : > { %126 = vst [vmem:[%s109_s23] sm:$0xff] (%p28_p3), %v125_v0  ;;  %128 = vst [vmem:[%s109_s23 + $0x8] sm:$0xff] (%p28_p3), %v127_v1  ;;  %v131_v3 = vld [vmem:[%s5789_s22 + $0x18] sm:$0xff] (%p28_p3)  ;;  %v133_v4 = vld [vmem:[%s5789_s22 + $0x20] sm:$0xff] (%p28_p3) }
  0x11   : > { %130 = vst [vmem:[%s109_s23 + $0x10] sm:$0xff] %v129_v2  ;;  %v135_v5 = vld [vmem:[%s5789_s22 + $0x28] sm:$0xff]  ;;  %132 = vst [vmem:[%s109_s23 + $0x18] sm:$0xff] %v131_v3  ;;  %v137_v6 = vld [vmem:[%s5789_s22 + $0x30] sm:$0xff] }
  0x12   : > { %134 = vst [vmem:[%s109_s23 + $0x20] sm:$0xff] %v133_v4  ;;  %136 = vst [vmem:[%s109_s23 + $0x28] sm:$0xff] %v135_v5  ;;  %v139_v7 = vld [vmem:[%s5789_s22 + $0x38] sm:$0xff]  ;;  %v141_v8 = vld [vmem:[%s5789_s22 + $0xc0] sm:$0xff] }
  0x13   : > { %138 = vst [vmem:[%s109_s23 + $0x30] sm:$0xff] %v137_v6  ;;  %140 = vst [vmem:[%s109_s23 + $0x38] sm:$0xff] %v139_v7  ;;  %v143_v9 = vld [vmem:[%s5789_s22 + $0xc8] sm:$0xff]  ;;  %v145_v10 = vld [vmem:[%s5789_s22 + $0xd0] sm:$0xff] }
  0x14   : > { %142 = vst [vmem:[%s109_s23 + $0x40] sm:$0xff] %v141_v8  ;;  %v147_v11 = vld [vmem:[%s5789_s22 + $0xd8] sm:$0xff]  ;;  %144 = vst [vmem:[%s109_s23 + $0x48] sm:$0xff] %v143_v9  ;;  %v149_v12 = vld [vmem:[%s5789_s22 + $0xe0] sm:$0xff] }
  0x15   : > { %146 = vst [vmem:[%s109_s23 + $0x50] sm:$0xff] %v145_v10  ;;  %148 = vst [vmem:[%s109_s23 + $0x58] sm:$0xff] %v147_v11  ;;  %v151_v13 = vld [vmem:[%s5789_s22 + $0xe8] sm:$0xff]  ;;  %v153_v14 = vld [vmem:[%s5789_s22 + $0xf0] sm:$0xff] }
  0x16   : > { %150 = vst [vmem:[%s109_s23 + $0x60] sm:$0xff] %v149_v12  ;;  %152 = vst [vmem:[%s109_s23 + $0x68] sm:$0xff] %v151_v13  ;;  %v155_v15 = vld [vmem:[%s5789_s22 + $0xf8] sm:$0xff] }
  0x17   : > { %154 = vst [vmem:[%s109_s23 + $0x70] sm:$0xff] %v153_v14  ;;  %156 = vst [vmem:[%s109_s23 + $0x78] sm:$0xff] %v155_v15 }
  0x18 PF: > { %p5193_p5 = scmp.ge.s32.totalorder %s5735_s11, 1  ;;  %p161_p6 = scmp.lt.s32.totalorder %s5735_s11, 4 }
  0x1a   : > { %p162_p7 = pnand %p5193_p5, %p161_p6 }
  0x1c   : > { %165 = sbr.rel (%p162_p7) target bundleno = 978 (0x3d2), region = 47 }
  0x21   : > { %s168_s24 = sand.u32 1, %s5727_s9   ;;  %v243_v16 = vlaneseq  ;;  %v9832_v17 = vmov 0.0   ;;  %v215_v18 = vld [vmem:[%s9828_s1 + $0x98] sm:$0xff]  ;;  %v5738_v20 = vmov 0   ;;  %v217_v21 = vld [vmem:[%s9828_s1 + $0xa8] sm:$0xff]  ;;  %v214_v30 = vld [vmem:[%s9828_s1 + $0x90] sm:$0xff] }
  0x22   : > { %s5194_s25 = sshll.u32 %s168_s24, 7  ;;  %577 = vmatprep.mubr.f32.mxu0 %v9832_v17  ;;  %666 = vmatprep.mubr.f32.mxu1 %v9832_v17  ;;  %v216_v35 = vld [vmem:[%s9828_s1 + $0xa0] sm:$0xff]  ;;  %v9830_v44 = vmov 1.0   ;;  %v6115_v63 = vld [vmem:[%s9828_s1 + $0x8] sm:$0xff]  ;;  %v6154_v0 = vld [vmem:[%s9828_s1 + $0x10] sm:$0xff]  ;;  %s5195_s28 = sshll.u32 %s5186_s12, 3 }
  0x23   : > { %v5815_v19 = vshrl.u32 %v243_v16, 7  ;;  %5668 = vset.pattern.permute.xlu1 %v5738_v20  ;;  %5667 = vset.pattern.permute.xlu0 %v5738_v20  ;;  %s5820_s30 = scalar_lea.vmem [#allocation2], %s5194_s25  ;;  %v6077_v62 = vld [vmem:[%s9828_s1] sm:$0xff]  ;;  %v6221_v3 = vld [vmem:[%s9828_s1 + $0x18] sm:$0xff]  ;;  %p191_p8 = scmp.lt.s32.totalorder %s5195_s28, 23 }
  0x24   : > { %v5823_v22 = vld [vmem:[%s5820_s30 + $0x8] sm:$0xff]  ;;  %v5826_v23 = vld [vmem:[%s5820_s30 + $0x18] sm:$0xff]  ;;  %v5829_v24 = vld [vmem:[%s5820_s30] sm:$0xff]  ;;  %487 = vperm.xlu1 %5668, %v215_v18   ;;  %497 = vperm.xlu0 %5667, %v217_v21  }
  0x25   : > { %9889 = vst [vmem:[#allocation3_spill] sm:$0xff] %v5815_v19  ;;  %v5832_v25 = vadd.s32 24, %v5815_v19  ;;  %v5835_v26 = vsub.s32 3, %v5815_v19  ;;  %v5838_v27 = vadd.s32 8, %v5823_v22  ;;  %v5841_v28 = vsub.s32 6, %v5815_v19  ;;  %v5844_v29 = vld [vmem:[%s5820_s30 + $0x10] sm:$0xff] }
  0x26   : > { %v5850_v31 = vadd.s32 8, %v5826_v23  ;;  %v5853_v32 = vadd.s32 8, %v5829_v24  ;;  %v5856_v33 = vadd.s32 8, %v5844_v29  ;;  %v5859_v34 = vadd.s32 16, %v5815_v19  ;;  %v5936_v46 = vld [vmem:[%s5820_s30 + $0x28] sm:$0xff]  ;;  %v5944_v47 = vld [vmem:[%s5820_s30 + $0x38] sm:$0xff] }
  0x27   : > { %9890 = vst [vmem:[#allocation4_spill] sm:$0xff] %v5832_v25  ;;  %v5866_v36 = vrot.slane %v5823_v22, %v5835_v26  ;;  %v5870_v37 = vrot.slane %v5838_v27, %v5841_v28  ;;  %v5874_v38 = vrot.slane %v5826_v23, %v5835_v26  ;;  %v5878_v39 = vrot.slane %v5829_v24, %v5835_v26  ;;  %v5947_v48 = vld [vmem:[%s5820_s30 + $0x20] sm:$0xff]  ;;  %v5958_v49 = vld [vmem:[%s5820_s30 + $0x30] sm:$0xff]  ;;  %s10357_s28 = smov (!%p191_p8, %s5195_s28), 23 }
  0x28   : > { %9891 = vst [vmem:[#allocation5_spill] sm:$0xff] %v5859_v34  ;;  %v5882_v40 = vrot.slane %v5850_v31, %v5841_v28  ;;  %v5886_v41 = vrot.slane %v5853_v32, %v5841_v28  ;;  %v5890_v42 = vrot.slane %v5844_v29, %v5835_v26  ;;  %v5894_v43 = vrot.slane %v5856_v33, %v5841_v28  ;;  %s5196_s11 = sshll.u32 %s10357_s28, 3 }
  0x29   : > { %482 = vperm.xlu1 %5668, %v214_v30   ;;  %vm305_vm0 = vcmp.eq.s32.totalorder %v5832_v25, %v5866_v36  ;;  %vm377_vm1 = vcmp.eq.s32.totalorder %v5832_v25, %v5870_v37  ;;  %vm307_vm2 = vcmp.eq.s32.totalorder %v5832_v25, %v5874_v38  ;;  %vm304_vm3 = vcmp.eq.s32.totalorder %v5832_v25, %v5878_v39  ;;  %s9792_s3 = scalar_lea.vmem %s9829_s2, %s5196_s11 }
  0x2a   : > { %492 = vperm.xlu0 %5667, %v216_v35   ;;  %vm409_vm4 = vmor %vm305_vm0, %vm377_vm1  ;;  %vm379_vm5 = vcmp.eq.s32.totalorder %v5832_v25, %v5882_v40  ;;  %vm376_vm6 = vcmp.eq.s32.totalorder %v5832_v25, %v5886_v41  ;;  %vm306_vm7 = vcmp.eq.s32.totalorder %v5832_v25, %v5890_v42  ;;  %vm378_vm8 = vcmp.eq.s32.totalorder %v5832_v25, %v5894_v43 }
  0x2b   : > { %5229 = vmatprep.subr.msk.mxu0 %vm409_vm4, %v9830_v44  ;;  %vm411_vm9 = vmor %vm307_vm2, %vm379_vm5  ;;  %vm297_vm10 = vcmp.eq.s32.totalorder %v5859_v34, %v5866_v36  ;;  %vm369_vm11 = vcmp.eq.s32.totalorder %v5859_v34, %v5870_v37  ;;  %vm299_vm13 = vcmp.eq.s32.totalorder %v5859_v34, %v5874_v38  ;;  %vm371_vm14 = vcmp.eq.s32.totalorder %v5859_v34, %v5882_v40 }
  0x2c   : > { %5241 = vmatprep.subr.msk.mxu1 %vm411_vm9, %v9830_v44  ;;  %vm408_vm12 = vmor %vm304_vm3, %vm376_vm6  ;;  %vm296_vm0 = vcmp.eq.s32.totalorder %v5859_v34, %v5878_v39  ;;  %vm368_vm1 = vcmp.eq.s32.totalorder %v5859_v34, %v5886_v41  ;;  %v5928_v45 = vadd.s32 8, %v5815_v19  ;;  %vm298_vm3 = vcmp.eq.s32.totalorder %v5859_v34, %v5890_v42 }
  0x2d   : > { %5230 = vmatpush1.msk.msra.mxu0 %vm408_vm12, %v9830_v44  ;;  %vm410_vm15 = vmor %vm306_vm7, %vm378_vm8  ;;  %vm370_vm4 = vcmp.eq.s32.totalorder %v5859_v34, %v5894_v43  ;;  %v5971_v50 = vadd.s32 8, %v5936_v46  ;;  %v5985_v51 = vadd.s32 8, %v5944_v47  ;;  %v5988_v52 = vadd.s32 8, %v5947_v48 }
  0x2e   : > { %9892 = vst [vmem:[#allocation6_spill] sm:$0xff] %v5928_v45  ;;  %5242 = vmatpush1.msk.msra.mxu1 %vm410_vm15, %v9830_v44  ;;  %vm401_vm2 = vmor %vm297_vm10, %vm369_vm11  ;;  %vm289_vm6 = vcmp.eq.s32.totalorder %v5928_v45, %v5866_v36  ;;  %vm361_vm7 = vcmp.eq.s32.totalorder %v5928_v45, %v5870_v37  ;;  %vm291_vm9 = vcmp.eq.s32.totalorder %v5928_v45, %v5874_v38  ;;  %v6008_v55 = vadd.s32 8, %v5958_v49 }
  0x2f   : > { %5231 = vmatprep.subr.msk.mxu0 %vm401_vm2, %v9830_v44  ;;  %vm403_vm5 = vmor %vm299_vm13, %vm371_vm14  ;;  %vm363_vm10 = vcmp.eq.s32.totalorder %v5928_v45, %v5882_v40  ;;  %vm288_vm12 = vcmp.eq.s32.totalorder %v5928_v45, %v5878_v39  ;;  %vm360_vm13 = vcmp.eq.s32.totalorder %v5928_v45, %v5886_v41  ;;  %vm281_vm14 = vcmp.eq.s32.totalorder %v5815_v19, %v5866_v36  ;;  %v6576_v36 = vld [vmem:[%s5820_s30 + $0x40] sm:$0xff] }
  0x30   : > { %5243 = vmatprep.subr.msk.mxu1 %vm403_vm5, %v9830_v44  ;;  %vm400_vm8 = vmor %vm296_vm0, %vm368_vm1  ;;  %vm290_vm0 = vcmp.eq.s32.totalorder %v5928_v45, %v5890_v42  ;;  %vm362_vm1 = vcmp.eq.s32.totalorder %v5928_v45, %v5894_v43  ;;  %v6001_v53 = vrot.slane %v5936_v46, %v5835_v26  ;;  %v6005_v54 = vrot.slane %v5971_v50, %v5841_v28 }
  0x31   : > { %5232 = vmatpush1.msk.msra.mxu0 %vm400_vm8, %v9830_v44  ;;  %vm402_vm11 = vmor %vm298_vm3, %vm370_vm4  ;;  %vm353_vm3 = vcmp.eq.s32.totalorder %v5815_v19, %v5870_v37  ;;  %vm283_vm5 = vcmp.eq.s32.totalorder %v5815_v19, %v5874_v38  ;;  %v6023_v56 = vrot.slane %v5944_v47, %v5835_v26  ;;  %v6027_v57 = vrot.slane %v5985_v51, %v5841_v28  ;;  %v6597_v38 = vld [vmem:[%s5820_s30 + $0x50] sm:$0xff] }
  0x32   : > { %5244 = vmatpush1.msk.msra.mxu1 %vm402_vm11, %v9830_v44  ;;  %vm393_vm15 = vmor %vm289_vm6, %vm361_vm7  ;;  %vm355_vm6 = vcmp.eq.s32.totalorder %v5815_v19, %v5882_v40  ;;  %vm280_vm8 = vcmp.eq.s32.totalorder %v5815_v19, %v5878_v39  ;;  %v6042_v58 = vrot.slane %v5947_v48, %v5835_v26  ;;  %v6046_v59 = vrot.slane %v5988_v52, %v5841_v28 }
  0x33   : > { %5233 = vmatprep.subr.msk.mxu0 %vm393_vm15, %v9830_v44  ;;  %vm395_vm2 = vmor %vm291_vm9, %vm363_vm10  ;;  %vm352_vm9 = vcmp.eq.s32.totalorder %v5815_v19, %v5886_v41  ;;  %vm282_vm11 = vcmp.eq.s32.totalorder %v5815_v19, %v5890_v42  ;;  %v6061_v60 = vrot.slane %v5958_v49, %v5835_v26  ;;  %v6065_v61 = vrot.slane %v6008_v55, %v5841_v28  ;;  %v6533_v26 = vld [vmem:[%s5820_s30 + $0x48] sm:$0xff]  ;;  %v6554_v28 = vld [vmem:[%s5820_s30 + $0x58] sm:$0xff] }
  0x34   : > { %5245 = vmatprep.subr.msk.mxu1 %vm395_vm2, %v9830_v44  ;;  %vm392_vm4 = vmor %vm288_vm12, %vm360_vm13  ;;  %vm354_vm12 = vcmp.eq.s32.totalorder %v5815_v19, %v5894_v43  ;;  %vm309_vm15 = vcmp.eq.s32.totalorder %v5832_v25, %v6001_v53  ;;  %vm311_vm2 = vcmp.eq.s32.totalorder %v5832_v25, %v6023_v56  ;;  %v6167_v1 = vsub.s32 4, %v5815_v19 }
  0x35   : > { %5234 = vmatpush1.msk.msra.mxu0 %vm392_vm4, %v9830_v44  ;;  %vm394_vm7 = vmor %vm290_vm0, %vm362_vm1  ;;  %vm381_vm0 = vcmp.eq.s32.totalorder %v5832_v25, %v6005_v54  ;;  %v6170_v2 = vsub.s32 7, %v5815_v19  ;;  %v6570_v30 = vsub.s32 5, %v5815_v19  ;;  %v6573_v35 = vadd.s32 8, %v6533_v26 }
  0x36   : > { %5246 = vmatpush1.msk.msra.mxu1 %vm394_vm7, %v9830_v44  ;;  %vm385_vm10 = vmor %vm281_vm14, %vm353_vm3  ;;  %vm9888_vm14 = vcmask 261120   ;;  %vm383_vm3 = vcmp.eq.s32.totalorder %v5832_v25, %v6027_v57  ;;  %v6233_v4 = vrot.slane %v5823_v22, %v6167_v1  ;;  %v6251_v6 = vrot.slane %v5826_v23, %v6167_v1 }
  0x37   : > { %5235 = vmatprep.subr.msk.mxu0 %vm385_vm10, %v9830_v44  ;;  %vm387_vm13 = vmor %vm283_vm5, %vm355_vm6  ;;  %vm308_vm5 = vcmp.eq.s32.totalorder %v5832_v25, %v6042_v58  ;;  %vm380_vm6 = vcmp.eq.s32.totalorder %v5832_v25, %v6046_v59  ;;  %v6237_v5 = vrot.slane %v5838_v27, %v6170_v2  ;;  %v6255_v7 = vrot.slane %v5850_v31, %v6170_v2 }
  0x38   : > { %5247 = vmatprep.subr.msk.mxu1 %vm387_vm13, %v9830_v44  ;;  %vm384_vm1 = vmor %vm280_vm8, %vm352_vm9  ;;  %vm310_vm8 = vcmp.eq.s32.totalorder %v5832_v25, %v6061_v60  ;;  %vm382_vm9 = vcmp.eq.s32.totalorder %v5832_v25, %v6065_v61  ;;  %v6269_v8 = vrot.slane %v5829_v24, %v6167_v1  ;;  %v6273_v9 = vrot.slane %v5853_v32, %v6170_v2 }
  0x39   : > { %5236 = vmatpush1.msk.msra.mxu0 %vm384_vm1, %v9830_v44  ;;  %vm386_vm4 = vmor %vm282_vm11, %vm354_vm12  ;;  %vm301_vm11 = vcmp.eq.s32.totalorder %v5859_v34, %v6001_v53  ;;  %vm373_vm12 = vcmp.eq.s32.totalorder %v5859_v34, %v6005_v54  ;;  %v6288_v10 = vrot.slane %v5844_v29, %v6167_v1  ;;  %v6292_v11 = vrot.slane %v5856_v33, %v6170_v2 }
  0x3a   : > { %5248 = vmatpush1.msk.msra.mxu1 %vm386_vm4, %v9830_v44  ;;  %5237 = vmatmul.mubr.msk.f32.vlgmr.msra.gmra.mxu0 %vm9888_vm14, %v6077_v62  ;;  %vm413_vm7 = vmor %vm309_vm15, %vm381_vm0  ;;  %vm303_vm15 = vcmp.eq.s32.totalorder %v5859_v34, %v6023_v56  ;;  %vm375_vm0 = vcmp.eq.s32.totalorder %v5859_v34, %v6027_v57  ;;  %v6423_v12 = vrot.slane %v5936_v46, %v6167_v1  ;;  %v6594_v37 = vsub.s32 0, %v5815_v19 }
  0x3b   : > { %5249 = vmatmul.mubr.msk.f32.vlgmr.msra.gmra.mxu1 %vm9888_vm14, %v6077_v62  ;;  %583 = vmatprep.mubr.f32.mxu0 %v9832_v17  ;;  %vm415_vm10 = vmor %vm311_vm2, %vm383_vm3  ;;  %vm300_vm2 = vcmp.eq.s32.totalorder %v5859_v34, %v6042_v58  ;;  %vm372_vm3 = vcmp.eq.s32.totalorder %v5859_v34, %v6046_v59  ;;  %v6427_v13 = vrot.slane %v5971_v50, %v6170_v2  ;;  %v6614_v39 = vadd.s32 8, %v6554_v28 }
  0x3c   : > { %672 = vmatprep.mubr.f32.mxu1 %v9832_v17  ;;  %5253 = vmatprep.subr.msk.mxu0 %vm413_vm7, %v9830_v44  ;;  %vm412_vm13 = vmor %vm308_vm5, %vm380_vm6  ;;  %vm302_vm5 = vcmp.eq.s32.totalorder %v5859_v34, %v6061_v60  ;;  %vm374_vm6 = vcmp.eq.s32.totalorder %v5859_v34, %v6065_v61  ;;  %vm293_vm7 = vcmp.eq.s32.totalorder %v5928_v45, %v6001_v53  ;;  %v6631_v40 = vadd.s32 8, %v6576_v36 }
  0x3d   : > { %5265 = vmatprep.subr.msk.mxu1 %vm415_vm10, %v9830_v44  ;;  %5254 = vmatpush1.msk.msra.mxu0 %vm412_vm13, %v9830_v44  ;;  %vm414_vm1 = vmor %vm310_vm8, %vm382_vm9  ;;  %vm365_vm9 = vcmp.eq.s32.totalorder %v5928_v45, %v6005_v54  ;;  %vm295_vm10 = vcmp.eq.s32.totalorder %v5928_v45, %v6023_v56  ;;  %vm292_vm13 = vcmp.eq.s32.totalorder %v5928_v45, %v6042_v58  ;;  %v6649_v41 = vadd.s32 8, %v6597_v38 }
  0x3e   : > { %5238 = vmatmul.mubr.msk.f32.gmra.mxu0 %vm9888_vm14, %v6115_v63  ;;  %5266 = vmatpush1.msk.msra.mxu1 %vm414_vm1, %v9830_v44  ;;  %vm405_vm4 = vmor %vm301_vm11, %vm373_vm12  ;;  %vm367_vm12 = vcmp.eq.s32.totalorder %v5928_v45, %v6027_v57  ;;  %vm294_vm1 = vcmp.eq.s32.totalorder %v5928_v45, %v6061_v60  ;;  %v6441_v14 = vrot.slane %v5944_v47, %v6167_v1 }
  0x3f   : > { %5250 = vmatmul.mubr.msk.f32.gmra.mxu1 %vm9888_vm14, %v6115_v63  ;;  %589 = vmatprep.mubr.f32.mxu0 %v9832_v17  ;;  %vm407_vm8 = vmor %vm303_vm15, %vm375_vm0  ;;  %vm364_vm15 = vcmp.eq.s32.totalorder %v5928_v45, %v6046_v59  ;;  %v6445_v15 = vrot.slane %v5985_v51, %v6170_v2  ;;  %v6459_v16 = vrot.slane %v5947_v48, %v6167_v1 }
  0x40   : > { %678 = vmatprep.mubr.f32.mxu1 %v9832_v17  ;;  %5255 = vmatprep.subr.msk.mxu0 %vm405_vm4, %v9830_v44  ;;  %vm404_vm11 = vmor %vm300_vm2, %vm372_vm3  ;;  %vm366_vm2 = vcmp.eq.s32.totalorder %v5928_v45, %v6065_v61  ;;  %vm285_vm3 = vcmp.eq.s32.totalorder %v5815_v19, %v6001_v53  ;;  %v6463_v18 = vrot.slane %v5988_v52, %v6170_v2 }
  0x41   : > { %5267 = vmatprep.subr.msk.mxu1 %vm407_vm8, %v9830_v44  ;;  %5256 = vmatpush1.msk.msra.mxu0 %vm404_vm11, %v9830_v44  ;;  %vm406_vm0 = vmor %vm302_vm5, %vm374_vm6  ;;  %vm357_vm5 = vcmp.eq.s32.totalorder %v5815_v19, %v6005_v54  ;;  %vm287_vm6 = vcmp.eq.s32.totalorder %v5815_v19, %v6023_v56  ;;  %vm359_vm8 = vcmp.eq.s32.totalorder %v5815_v19, %v6027_v57  ;;  %v6792_v57 = vld [vmem:[%s5820_s30 + $0x78] sm:$0xff] }
  0x42   : > { %5239 = vmatmul.mubr.msk.f32.gmra.mxu0 %vm9888_vm14, %v6154_v0  ;;  %5268 = vmatpush1.msk.msra.mxu1 %vm406_vm0, %v9830_v44  ;;  %vm397_vm4 = vmor %vm293_vm7, %vm365_vm9  ;;  %vm284_vm9 = vcmp.eq.s32.totalorder %v5815_v19, %v6042_v58  ;;  %vm356_vm11 = vcmp.eq.s32.totalorder %v5815_v19, %v6046_v59  ;;  %vm358_vm0 = vcmp.eq.s32.totalorder %v5815_v19, %v6065_v61  ;;  %v6808_v58 = vld [vmem:[%s5820_s30 + $0x60] sm:$0xff]  ;;  %v6846_v61 = vadd.s32 8, %v6792_v57 }
  0x43   : > { %5251 = vmatmul.mubr.msk.f32.gmra.mxu1 %vm9888_vm14, %v6154_v0  ;;  %595 = vmatprep.mubr.f32.mxu0 %v9832_v17  ;;  %vm399_vm7 = vmor %vm295_vm10, %vm367_vm12  ;;  %v6478_v20 = vrot.slane %v5958_v49, %v6167_v1  ;;  %v6482_v21 = vrot.slane %v6008_v55, %v6170_v2  ;;  %v6664_v42 = vrot.slane %v5823_v22, %v6570_v30  ;;  %v6863_v1 = vadd.s32 8, %v6808_v58 }
  0x44   : > { %684 = vmatprep.mubr.f32.mxu1 %v9832_v17  ;;  %5257 = vmatprep.subr.msk.mxu0 %vm397_vm4, %v9830_v44  ;;  %vm396_vm10 = vmor %vm292_vm13, %vm364_vm15  ;;  %vm286_vm13 = vcmp.eq.s32.totalorder %v5815_v19, %v6061_v60  ;;  %v6668_v43 = vrot.slane %v6573_v35, %v6594_v37  ;;  %v6682_v22 = vrot.slane %v5826_v23, %v6570_v30  ;;  %v6829_v60 = vld [vmem:[%s5820_s30 + $0x70] sm:$0xff] }
  0x45   : > { %5269 = vmatprep.subr.msk.mxu1 %vm399_vm7, %v9830_v44  ;;  %5258 = vmatpush1.msk.msra.mxu0 %vm396_vm10, %v9830_v44  ;;  %vm398_vm12 = vmor %vm294_vm1, %vm366_vm2  ;;  %vm958_vm2 = vcmp.eq.s32.totalorder %v5832_v25, %v6233_v4  ;;  %vm957_vm7 = vcmp.eq.s32.totalorder %v5832_v25, %v6269_v8  ;;  %v6686_v53 = vrot.slane %v6614_v39, %v6594_v37  ;;  %v6881_v2 = vadd.s32 8, %v6829_v60 }
  0x46   : > { %5240 = vmatmul.mubr.msk.f32.gmra.mxu0 %vm9888_vm14, %v6221_v3  ;;  %5270 = vmatpush1.msk.msra.mxu1 %vm398_vm12, %v9830_v44  ;;  %vm389_vm15 = vmor %vm285_vm3, %vm357_vm5  ;;  %vm1022_vm3 = vcmp.eq.s32.totalorder %v5832_v25, %v6237_v5  ;;  %vm960_vm5 = vcmp.eq.s32.totalorder %v5832_v25, %v6251_v6  ;;  %vm1023_vm12 = vcmp.eq.s32.totalorder %v5832_v25, %v6292_v11 }
  0x47   : > { %5252 = vmatmul.mubr.msk.f32.gmra.mxu1 %vm9888_vm14, %v6221_v3  ;;  %5259 = vmatprep.subr.msk.mxu0 %vm389_vm15, %v9830_v44  ;;  %vm391_vm1 = vmor %vm287_vm6, %vm359_vm8  ;;  %vm1024_vm6 = vcmp.eq.s32.totalorder %v5832_v25, %v6255_v7  ;;  %vm950_vm15 = vcmp.eq.s32.totalorder %v5859_v34, %v6233_v4  ;;  %v6700_v23 = vrot.slane %v5829_v24, %v6570_v30 }
  0x48   : > { %5271 = vmatprep.subr.msk.mxu1 %vm391_vm1, %v9830_v44  ;;  %vm388_vm4 = vmor %vm284_vm9, %vm356_vm11  ;;  %755 = vmatprep.mubr.f32.mxu0 %v9832_v17  ;;  %vm1021_vm9 = vcmp.eq.s32.totalorder %v5832_v25, %v6273_v9  ;;  %vm959_vm11 = vcmp.eq.s32.totalorder %v5832_v25, %v6288_v10  ;;  %v6704_v54 = vrot.slane %v6631_v40, %v6594_v37 }
  0x49   : > { %5260 = vmatpush1.msk.msra.mxu0 %vm388_vm4, %v9830_v44  ;;  %vm390_vm8 = vmor %vm286_vm13, %vm358_vm0  ;;  %844 = vmatprep.mubr.f32.mxu1 %v9832_v17  ;;  %vm1014_vm0 = vcmp.eq.s32.totalorder %v5859_v34, %v6237_v5  ;;  %v6719_v24 = vrot.slane %v5844_v29, %v6570_v30  ;;  %v6723_v56 = vrot.slane %v6649_v41, %v6594_v37  ;;  %v6780_v29 = vld [vmem:[%s5820_s30 + $0x68] sm:$0xff] }
  0x4a   : > { %5272 = vmatpush1.msk.msra.mxu1 %vm390_vm8, %v9830_v44  ;;  %5261 = vmatmul.mubr.msk.f32.vlgmr.msra.gmra.mxu0 %vm9888_vm14, %v6077_v62  ;;  %vm1054_vm10 = vmor %vm958_vm2, %vm1022_vm3  ;;  %vm952_vm2 = vcmp.eq.s32.totalorder %v5859_v34, %v6251_v6  ;;  %vm1016_vm3 = vcmp.eq.s32.totalorder %v5859_v34, %v6255_v7  ;;  %v6826_v59 = vadd.s32 8, %v6780_v29 }
  0x4b   : > { %5273 = vmatmul.mubr.msk.f32.vlgmr.msra.gmra.mxu1 %vm9888_vm14, %v6077_v62  ;;  %761 = vmatprep.mubr.f32.mxu0 %v9832_v17  ;;  %vm1056_vm13 = vmor %vm960_vm5, %vm1024_vm6  ;;  %vm949_vm5 = vcmp.eq.s32.totalorder %v5859_v34, %v6269_v8  ;;  %vm1013_vm6 = vcmp.eq.s32.totalorder %v5859_v34, %v6273_v9 }
  0x4c   : > { %850 = vmatprep.mubr.f32.mxu1 %v9832_v17  ;;  %5309 = vmatprep.subr.msk.mxu0 %vm1054_vm10, %v9830_v44  ;;  %vm1053_vm1 = vmor %vm957_vm7, %vm1021_vm9  ;;  %vm951_vm7 = vcmp.eq.s32.totalorder %v5859_v34, %v6288_v10  ;;  %vm1015_vm9 = vcmp.eq.s32.totalorder %v5859_v34, %v6292_v11 }
  0x4d   : > { %5321 = vmatprep.subr.msk.mxu1 %vm1056_vm13, %v9830_v44  ;;  %5310 = vmatpush1.msk.msra.mxu0 %vm1053_vm1, %v9830_v44  ;;  %vm1055_vm4 = vmor %vm959_vm11, %vm1023_vm12  ;;  %vm942_vm11 = vcmp.eq.s32.totalorder %v5928_v45, %v6233_v4  ;;  %vm1006_vm12 = vcmp.eq.s32.totalorder %v5928_v45, %v6237_v5  ;;  %vm944_vm13 = vcmp.eq.s32.totalorder %v5928_v45, %v6251_v6 }
  0x4e   : > { %5262 = vmatmul.mubr.msk.f32.gmra.mxu0 %vm9888_vm14, %v6115_v63  ;;  %5322 = vmatpush1.msk.msra.mxu1 %vm1055_vm4, %v9830_v44  ;;  %vm1046_vm8 = vmor %vm950_vm15, %vm1014_vm0  ;;  %vm1008_vm0 = vcmp.eq.s32.totalorder %v5928_v45, %v6255_v7  ;;  %vm941_vm1 = vcmp.eq.s32.totalorder %v5928_v45, %v6269_v8  ;;  %vm943_vm4 = vcmp.eq.s32.totalorder %v5928_v45, %v6288_v10 }
  0x4f   : > { %5274 = vmatmul.mubr.msk.f32.gmra.mxu1 %vm9888_vm14, %v6115_v63  ;;  %767 = vmatprep.mubr.f32.mxu0 %v9832_v17  ;;  %vm1048_vm10 = vmor %vm952_vm2, %vm1016_vm3  ;;  %vm1005_vm2 = vcmp.eq.s32.totalorder %v5928_v45, %v6273_v9 }
  0x50   : > { %856 = vmatprep.mubr.f32.mxu1 %v9832_v17  ;;  %5311 = vmatprep.subr.msk.mxu0 %vm1046_vm8, %v9830_v44  ;;  %vm1045_vm15 = vmor %vm949_vm5, %vm1013_vm6  ;;  %vm1007_vm5 = vcmp.eq.s32.totalorder %v5928_v45, %v6292_v11  ;;  %vm934_vm6 = vcmp.eq.s32.totalorder %v5815_v19, %v6233_v4  ;;  %v6896_v4 = vrot.slane %v5936_v46, %v6570_v30 }
  0x51   : > { %5323 = vmatprep.subr.msk.mxu1 %vm1048_vm10, %v9830_v44  ;;  %5312 = vmatpush1.msk.msra.mxu0 %vm1045_vm15, %v9830_v44  ;;  %vm1047_vm3 = vmor %vm951_vm7, %vm1015_vm9  ;;  %vm998_vm7 = vcmp.eq.s32.totalorder %v5815_v19, %v6237_v5  ;;  %vm936_vm9 = vcmp.eq.s32.totalorder %v5815_v19, %v6251_v6  ;;  %vm1000_vm10 = vcmp.eq.s32.totalorder %v5815_v19, %v6255_v7 }
  0x52   : > { %5263 = vmatmul.mubr.msk.f32.gmra.mxu0 %vm9888_vm14, %v6154_v0  ;;  %5324 = vmatpush1.msk.msra.mxu1 %vm1047_vm3, %v9830_v44  ;;  %vm1038_vm8 = vmor %vm942_vm11, %vm1006_vm12  ;;  %vm933_vm12 = vcmp.eq.s32.totalorder %v5815_v19, %v6269_v8  ;;  %vm997_vm15 = vcmp.eq.s32.totalorder %v5815_v19, %v6273_v9  ;;  %vm999_vm3 = vcmp.eq.s32.totalorder %v5815_v19, %v6292_v11  ;;  %v7040_v9 = vsub.s32 2, %v5815_v19 }
  0x53   : > { %5275 = vmatmul.mubr.msk.f32.gmra.mxu1 %vm9888_vm14, %v6154_v0  ;;  %773 = vmatprep.mubr.f32.mxu0 %v9832_v17  ;;  %vm1040_vm11 = vmor %vm944_vm13, %vm1008_vm0  ;;  %v6900_v5 = vrot.slane %v6826_v59, %v6594_v37  ;;  %v6914_v46 = vrot.slane %v5944_v47, %v6570_v30  ;;  %v6918_v6 = vrot.slane %v6846_v61, %v6594_v37 }
  0x54   : > { %862 = vmatprep.mubr.f32.mxu1 %v9832_v17  ;;  %5313 = vmatprep.subr.msk.mxu0 %vm1038_vm8, %v9830_v44  ;;  %vm1037_vm13 = vmor %vm941_vm1, %vm1005_vm2  ;;  %vm935_vm1 = vcmp.eq.s32.totalorder %v5815_v19, %v6288_v10  ;;  %v6932_v47 = vrot.slane %v5947_v48, %v6570_v30  ;;  %v6936_v7 = vrot.slane %v6863_v1, %v6594_v37 }
  0x55   : > { %5325 = vmatprep.subr.msk.mxu1 %vm1040_vm11, %v9830_v44  ;;  %5314 = vmatpush1.msk.msra.mxu0 %vm1037_vm13, %v9830_v44  ;;  %vm1039_vm0 = vmor %vm943_vm4, %vm1007_vm5  ;;  %vm962_vm5 = vcmp.eq.s32.totalorder %v5832_v25, %v6423_v12  ;;  %vm961_vm11 = vcmp.eq.s32.totalorder %v5832_v25, %v6459_v16  ;;  %v6951_v48 = vrot.slane %v5958_v49, %v6570_v30  ;;  %v7025_v49 = vsub.s32 1, %v5815_v19 }
  0x56   : > { %5264 = vmatmul.mubr.msk.f32.gmra.mxu0 %vm9888_vm14, %v6221_v3  ;;  %5326 = vmatpush1.msk.msra.mxu1 %vm1039_vm0, %v9830_v44  ;;  %vm1030_vm2 = vmor %vm934_vm6, %vm998_vm7  ;;  %vm1026_vm6 = vcmp.eq.s32.totalorder %v5832_v25, %v6427_v13  ;;  %vm964_vm7 = vcmp.eq.s32.totalorder %v5832_v25, %v6441_v14  ;;  %vm1027_vm0 = vcmp.eq.s32.totalorder %v5832_v25, %v6482_v21 }
  0x57   : > { %5276 = vmatmul.mubr.msk.f32.gmra.mxu1 %vm9888_vm14, %v6221_v3  ;;  %5315 = vmatprep.subr.msk.mxu0 %vm1030_vm2, %v9830_v44  ;;  %vm1032_vm4 = vmor %vm936_vm9, %vm1000_vm10  ;;  %vm1028_vm9 = vcmp.eq.s32.totalorder %v5832_v25, %v6445_v15  ;;  %vm954_vm2 = vcmp.eq.s32.totalorder %v5859_v34, %v6423_v12  ;;  %v6955_v8 = vrot.slane %v6881_v2, %v6594_v37 }
  0x58   : > { %5327 = vmatprep.subr.msk.mxu1 %vm1032_vm4, %v9830_v44  ;;  %vm1029_vm8 = vmor %vm933_vm12, %vm997_vm15  ;;  %1189 = vmatprep.mubr.f32.mxu0 %v9832_v17  ;;  %vm1025_vm12 = vcmp.eq.s32.totalorder %v5832_v25, %v6463_v18  ;;  %vm963_vm15 = vcmp.eq.s32.totalorder %v5832_v25, %v6478_v20  ;;  %9893 = vst [vmem:[#allocation7_spill] sm:$0xff] %v7040_v9 }
  0x59   : > { %5316 = vmatpush1.msk.msra.mxu0 %vm1029_vm8, %v9830_v44  ;;  %vm1031_vm10 = vmor %vm935_vm1, %vm999_vm3  ;;  %1278 = vmatprep.mubr.f32.mxu1 %v9832_v17  ;;  %vm1018_vm3 = vcmp.eq.s32.totalorder %v5859_v34, %v6427_v13  ;;  %v7098_v10 = vrot.slane %v6533_v26, %v7025_v49  ;;  %v7102_v11 = vrot.slane %v6573_v35, %v7040_v9  ;;  %v7426_v35 = vld [vmem:[%s9828_s1 + $0x8] sm:$0xff] }
  0x5a   : > { %5328 = vmatpush1.msk.msra.mxu1 %vm1031_vm10, %v9830_v44  ;;  %5317 = vmatmul.mubr.msk.f32.vlgmr.msra.gmra.mxu0 %vm9888_vm14, %v6077_v62  ;;  %vm1058_vm13 = vmor %vm962_vm5, %vm1026_vm6  ;;  %vm956_vm5 = vcmp.eq.s32.totalorder %v5859_v34, %v6441_v14  ;;  %vm1020_vm6 = vcmp.eq.s32.totalorder %v5859_v34, %v6445_v15  ;;  %v7328_v26 = vrot.slane %v6863_v1, %v7040_v9 }
  0x5b   : > { %5329 = vmatmul.mubr.msk.f32.vlgmr.msra.gmra.mxu1 %vm9888_vm14, %v6077_v62  ;;  %1195 = vmatprep.mubr.f32.mxu0 %v9832_v17  ;;  %vm1060_vm1 = vmor %vm964_vm7, %vm1028_vm9  ;;  %vm953_vm7 = vcmp.eq.s32.totalorder %v5859_v34, %v6459_v16  ;;  %vm1017_vm9 = vcmp.eq.s32.totalorder %v5859_v34, %v6463_v18  ;;  %v7347_v30 = vrot.slane %v6881_v2, %v7040_v9 }
  0x5c   : > { %1284 = vmatprep.mubr.f32.mxu1 %v9832_v17  ;;  %5333 = vmatprep.subr.msk.mxu0 %vm1058_vm13, %v9830_v44  ;;  %vm1057_vm4 = vmor %vm961_vm11, %vm1025_vm12  ;;  %vm955_vm11 = vcmp.eq.s32.totalorder %v5859_v34, %v6478_v20  ;;  %vm1019_vm12 = vcmp.eq.s32.totalorder %v5859_v34, %v6482_v21 }
  0x5d   : > { %5345 = vmatprep.subr.msk.mxu1 %vm1060_vm1, %v9830_v44  ;;  %5334 = vmatpush1.msk.msra.mxu0 %vm1057_vm4, %v9830_v44  ;;  %vm1059_vm8 = vmor %vm963_vm15, %vm1027_vm0  ;;  %vm946_vm15 = vcmp.eq.s32.totalorder %v5928_v45, %v6423_v12  ;;  %vm1010_vm0 = vcmp.eq.s32.totalorder %v5928_v45, %v6427_v13  ;;  %vm948_vm1 = vcmp.eq.s32.totalorder %v5928_v45, %v6441_v14 }
  0x5e   : > { %5318 = vmatmul.mubr.msk.f32.gmra.mxu0 %vm9888_vm14, %v6115_v63  ;;  %5346 = vmatpush1.msk.msra.mxu1 %vm1059_vm8, %v9830_v44  ;;  %vm1050_vm10 = vmor %vm954_vm2, %vm1018_vm3  ;;  %vm1012_vm3 = vcmp.eq.s32.totalorder %v5928_v45, %v6445_v15  ;;  %vm945_vm4 = vcmp.eq.s32.totalorder %v5928_v45, %v6459_v16  ;;  %vm947_vm8 = vcmp.eq.s32.totalorder %v5928_v45, %v6478_v20 }
  0x5f   : > { %5330 = vmatmul.mubr.msk.f32.gmra.mxu1 %vm9888_vm14, %v6115_v63  ;;  %1201 = vmatprep.mubr.f32.mxu0 %v9832_v17  ;;  %vm1052_vm13 = vmor %vm956_vm5, %vm1020_vm6  ;;  %vm1009_vm5 = vcmp.eq.s32.totalorder %v5928_v45, %v6463_v18 }
  0x60   : > { %1290 = vmatprep.mubr.f32.mxu1 %v9832_v17  ;;  %5335 = vmatprep.subr.msk.mxu0 %vm1050_vm10, %v9830_v44  ;;  %vm1049_vm2 = vmor %vm953_vm7, %vm1017_vm9  ;;  %vm1011_vm7 = vcmp.eq.s32.totalorder %v5928_v45, %v6482_v21  ;;  %vm938_vm9 = vcmp.eq.s32.totalorder %v5815_v19, %v6423_v12  ;;  %v7116_v12 = vrot.slane %v6554_v28, %v7025_v49 }
  0x61   : > { %5347 = vmatprep.subr.msk.mxu1 %vm1052_vm13, %v9830_v44  ;;  %5336 = vmatpush1.msk.msra.mxu0 %vm1049_vm2, %v9830_v44  ;;  %vm1051_vm6 = vmor %vm955_vm11, %vm1019_vm12  ;;  %vm1002_vm11 = vcmp.eq.s32.totalorder %v5815_v19, %v6427_v13  ;;  %vm940_vm12 = vcmp.eq.s32.totalorder %v5815_v19, %v6441_v14  ;;  %vm1004_vm13 = vcmp.eq.s32.totalorder %v5815_v19, %v6445_v15 }
  0x62   : > { %5319 = vmatmul.mubr.msk.f32.gmra.mxu0 %vm9888_vm14, %v6154_v0  ;;  %5348 = vmatpush1.msk.msra.mxu1 %vm1051_vm6, %v9830_v44  ;;  %vm1042_vm10 = vmor %vm946_vm15, %vm1010_vm0  ;;  %vm937_vm0 = vcmp.eq.s32.totalorder %v5815_v19, %v6459_v16  ;;  %vm1001_vm2 = vcmp.eq.s32.totalorder %v5815_v19, %v6463_v18  ;;  %vm1003_vm6 = vcmp.eq.s32.totalorder %v5815_v19, %v6482_v21 }
  0x63   : > { %5331 = vmatmul.mubr.msk.f32.gmra.mxu1 %vm9888_vm14, %v6154_v0  ;;  %1207 = vmatprep.mubr.f32.mxu0 %v9832_v17  ;;  %vm1044_vm15 = vmor %vm948_vm1, %vm1012_vm3  ;;  %v7120_v13 = vrot.slane %v6614_v39, %v7040_v9  ;;  %v7134_v14 = vrot.slane %v6576_v36, %v7025_v49  ;;  %v7138_v15 = vrot.slane %v6631_v40, %v7040_v9  ;;  %v5703_v36 = vld [vmem:[%s9828_s1 + $0x10] sm:$0xff]  ;;  %v225_v39 = vld [vmem:[%s9828_s1 + $0xe8] sm:$0xff] }
  0x64   : > { %1296 = vmatprep.mubr.f32.mxu1 %v9832_v17  ;;  %5337 = vmatprep.subr.msk.mxu0 %vm1042_vm10, %v9830_v44  ;;  %vm1041_vm1 = vmor %vm945_vm4, %vm1009_vm5  ;;  %vm939_vm4 = vcmp.eq.s32.totalorder %v5815_v19, %v6478_v20  ;;  %v7153_v16 = vrot.slane %v6597_v38, %v7025_v49  ;;  %v7157_v18 = vrot.slane %v6649_v41, %v7040_v9  ;;  %v5704_v38 = vld [vmem:[%s9828_s1 + $0x18] sm:$0xff]  ;;  %v224_v40 = vld [vmem:[%s9828_s1 + $0xe0] sm:$0xff] }
  0x65   : > { %5349 = vmatprep.subr.msk.mxu1 %vm1044_vm15, %v9830_v44  ;;  %5338 = vmatpush1.msk.msra.mxu0 %vm1041_vm1, %v9830_v44  ;;  %vm1043_vm3 = vmor %vm947_vm8, %vm1011_vm7  ;;  %vm1602_vm7 = vcmp.eq.s32.totalorder %v5832_v25, %v6664_v42  ;;  %vm1601_vm15 = vcmp.eq.s32.totalorder %v5832_v25, %v6700_v23  ;;  %v7310_v20 = vrot.slane %v6846_v61, %v7040_v9  ;;  %v223_v41 = vld [vmem:[%s9828_s1 + $0xd8] sm:$0xff] }
  0x66   : > { %5320 = vmatmul.mubr.msk.f32.gmra.mxu0 %vm9888_vm14, %v6221_v3  ;;  %5350 = vmatpush1.msk.msra.mxu1 %vm1043_vm3, %v9830_v44  ;;  %vm1034_vm5 = vmor %vm938_vm9, %vm1002_vm11  ;;  %vm1674_vm9 = vcmp.eq.s32.totalorder %v5832_v25, %v6668_v43  ;;  %vm1604_vm11 = vcmp.eq.s32.totalorder %v5832_v25, %v6682_v22  ;;  %vm1675_vm3 = vcmp.eq.s32.totalorder %v5832_v25, %v6723_v56 }
  0x67   : > { %5332 = vmatmul.mubr.msk.f32.gmra.mxu1 %vm9888_vm14, %v6221_v3  ;;  %5339 = vmatprep.subr.msk.mxu0 %vm1034_vm5, %v9830_v44  ;;  %vm1036_vm8 = vmor %vm940_vm12, %vm1004_vm13  ;;  %vm1676_vm12 = vcmp.eq.s32.totalorder %v5832_v25, %v6686_v53  ;;  %vm1594_vm5 = vcmp.eq.s32.totalorder %v5859_v34, %v6664_v42  ;;  %v7324_v21 = vrot.slane %v6808_v58, %v7025_v49 }
  0x68   : > { %5351 = vmatprep.subr.msk.mxu1 %vm1036_vm8, %v9830_v44  ;;  %vm1033_vm10 = vmor %vm937_vm0, %vm1001_vm2  ;;  %1367 = vmatprep.mubr.f32.mxu0 %v9832_v17  ;;  %vm1673_vm0 = vcmp.eq.s32.totalorder %v5832_v25, %v6704_v54  ;;  %vm1603_vm2 = vcmp.eq.s32.totalorder %v5832_v25, %v6719_v24  ;;  %v7343_v28 = vrot.slane %v6829_v60, %v7025_v49 }
  0x69   : > { %5340 = vmatpush1.msk.msra.mxu0 %vm1033_vm10, %v9830_v44  ;;  %vm1035_vm13 = vmor %vm939_vm4, %vm1003_vm6  ;;  %1456 = vmatprep.mubr.f32.mxu1 %v9832_v17  ;;  %vm1666_vm6 = vcmp.eq.s32.totalorder %v5859_v34, %v6668_v43 }
  0x6a   : > { %5352 = vmatpush1.msk.msra.mxu1 %vm1035_vm13, %v9830_v44  ;;  %5341 = vmatmul.mubr.msk.f32.vlgmr.msra.gmra.mxu0 %vm9888_vm14, %v6077_v62  ;;  %vm1706_vm1 = vmor %vm1602_vm7, %vm1674_vm9  ;;  %vm1596_vm7 = vcmp.eq.s32.totalorder %v5859_v34, %v6682_v22  ;;  %vm1668_vm9 = vcmp.eq.s32.totalorder %v5859_v34, %v6686_v53 }
  0x6b   : > { %5353 = vmatmul.mubr.msk.f32.vlgmr.msra.gmra.mxu1 %vm9888_vm14, %v6077_v62  ;;  %1373 = vmatprep.mubr.f32.mxu0 %v9832_v17  ;;  %vm1708_vm4 = vmor %vm1604_vm11, %vm1676_vm12  ;;  %vm1593_vm11 = vcmp.eq.s32.totalorder %v5859_v34, %v6700_v23  ;;  %vm1665_vm12 = vcmp.eq.s32.totalorder %v5859_v34, %v6704_v54 }
  0x6c   : > { %1462 = vmatprep.mubr.f32.mxu1 %v9832_v17  ;;  %5389 = vmatprep.subr.msk.mxu0 %vm1706_vm1, %v9830_v44  ;;  %vm1705_vm8 = vmor %vm1601_vm15, %vm1673_vm0  ;;  %vm1595_vm15 = vcmp.eq.s32.totalorder %v5859_v34, %v6719_v24  ;;  %vm1667_vm0 = vcmp.eq.s32.totalorder %v5859_v34, %v6723_v56 }
  0x6d   : > { %5401 = vmatprep.subr.msk.mxu1 %vm1708_vm4, %v9830_v44  ;;  %5390 = vmatpush1.msk.msra.mxu0 %vm1705_vm8, %v9830_v44  ;;  %vm1707_vm10 = vmor %vm1603_vm2, %vm1675_vm3  ;;  %vm1586_vm2 = vcmp.eq.s32.totalorder %v5928_v45, %v6664_v42  ;;  %vm1658_vm3 = vcmp.eq.s32.totalorder %v5928_v45, %v6668_v43  ;;  %vm1588_vm4 = vcmp.eq.s32.totalorder %v5928_v45, %v6682_v22 }
  0x6e   : > { %5342 = vmatmul.mubr.msk.f32.gmra.mxu0 %vm9888_vm14, %v6115_v63  ;;  %5402 = vmatpush1.msk.msra.mxu1 %vm1707_vm10, %v9830_v44  ;;  %vm1698_vm13 = vmor %vm1594_vm5, %vm1666_vm6  ;;  %vm1660_vm6 = vcmp.eq.s32.totalorder %v5928_v45, %v6686_v53  ;;  %vm1585_vm8 = vcmp.eq.s32.totalorder %v5928_v45, %v6700_v23  ;;  %vm1587_vm10 = vcmp.eq.s32.totalorder %v5928_v45, %v6719_v24 }
  0x6f   : > { %5354 = vmatmul.mubr.msk.f32.gmra.mxu1 %vm9888_vm14, %v6115_v63  ;;  %1379 = vmatprep.mubr.f32.mxu0 %v9832_v17  ;;  %vm1700_vm1 = vmor %vm1596_vm7, %vm1668_vm9  ;;  %vm1657_vm7 = vcmp.eq.s32.totalorder %v5928_v45, %v6704_v54 }
  0x70   : > { %1468 = vmatprep.mubr.f32.mxu1 %v9832_v17  ;;  %5391 = vmatprep.subr.msk.mxu0 %vm1698_vm13, %v9830_v44  ;;  %vm1697_vm5 = vmor %vm1593_vm11, %vm1665_vm12  ;;  %vm1659_vm11 = vcmp.eq.s32.totalorder %v5928_v45, %v6723_v56  ;;  %vm1578_vm12 = vcmp.eq.s32.totalorder %v5815_v19, %v6664_v42  ;;  %v222_v42 = vld [vmem:[%s9828_s1 + $0xd0] sm:$0xff] }
  0x71   : > { %5403 = vmatprep.subr.msk.mxu1 %vm1700_vm1, %v9830_v44  ;;  %5392 = vmatpush1.msk.msra.mxu0 %vm1697_vm5, %v9830_v44  ;;  %vm1699_vm9 = vmor %vm1595_vm15, %vm1667_vm0  ;;  %vm1650_vm15 = vcmp.eq.s32.totalorder %v5815_v19, %v6668_v43  ;;  %vm1580_vm0 = vcmp.eq.s32.totalorder %v5815_v19, %v6682_v22  ;;  %vm1652_vm1 = vcmp.eq.s32.totalorder %v5815_v19, %v6686_v53  ;;  %v221_v43 = vld [vmem:[%s9828_s1 + $0xc8] sm:$0xff]  ;;  %v220_v22 = vld [vmem:[%s9828_s1 + $0xc0] sm:$0xff] }
  0x72   : > { %5343 = vmatmul.mubr.msk.f32.gmra.mxu0 %vm9888_vm14, %v6154_v0  ;;  %5404 = vmatpush1.msk.msra.mxu1 %vm1699_vm9, %v9830_v44  ;;  %vm1690_vm13 = vmor %vm1586_vm2, %vm1658_vm3  ;;  %vm1577_vm3 = vcmp.eq.s32.totalorder %v5815_v19, %v6700_v23  ;;  %vm1649_vm5 = vcmp.eq.s32.totalorder %v5815_v19, %v6704_v54  ;;  %vm1651_vm9 = vcmp.eq.s32.totalorder %v5815_v19, %v6723_v56  ;;  %v219_v53 = vld [vmem:[%s9828_s1 + $0xb8] sm:$0xff]  ;;  %v218_v23 = vld [vmem:[%s9828_s1 + $0xb0] sm:$0xff] }
  0x73   : > { %5355 = vmatmul.mubr.msk.f32.gmra.mxu1 %vm9888_vm14, %v6154_v0  ;;  %1385 = vmatprep.mubr.f32.mxu0 %v9832_v17  ;;  %vm1692_vm2 = vmor %vm1588_vm4, %vm1660_vm6  ;;  %v226_v54 = vld [vmem:[%s9828_s1 + $0xf0] sm:$0xff] }
  0x74   : > { %1474 = vmatprep.mubr.f32.mxu1 %v9832_v17  ;;  %5393 = vmatprep.subr.msk.mxu0 %vm1690_vm13, %v9830_v44  ;;  %vm1689_vm4 = vmor %vm1585_vm8, %vm1657_vm7  ;;  %vm1579_vm8 = vcmp.eq.s32.totalorder %v5815_v19, %v6719_v24 }
  0x75   : > { %5405 = vmatprep.subr.msk.mxu1 %vm1692_vm2, %v9830_v44  ;;  %5394 = vmatpush1.msk.msra.mxu0 %vm1689_vm4, %v9830_v44  ;;  %vm1691_vm6 = vmor %vm1587_vm10, %vm1659_vm11  ;;  %vm1606_vm11 = vcmp.eq.s32.totalorder %v5832_v25, %v6896_v4  ;;  %vm1605_vm2 = vcmp.eq.s32.totalorder %v5832_v25, %v6932_v47 }
  0x76   : > { %5344 = vmatmul.mubr.msk.f32.gmra.mxu0 %vm9888_vm14, %v6221_v3  ;;  %5406 = vmatpush1.msk.msra.mxu1 %vm1691_vm6, %v9830_v44  ;;  %vm1682_vm7 = vmor %vm1578_vm12, %vm1650_vm15  ;;  %vm1678_vm12 = vcmp.eq.s32.totalorder %v5832_v25, %v6900_v5  ;;  %vm1608_vm15 = vcmp.eq.s32.totalorder %v5832_v25, %v6914_v46  ;;  %vm1679_vm6 = vcmp.eq.s32.totalorder %v5832_v25, %v6955_v8 }
  0x77   : > { %5356 = vmatmul.mubr.msk.f32.gmra.mxu1 %vm9888_vm14, %v6221_v3  ;;  %5395 = vmatprep.subr.msk.mxu0 %vm1682_vm7, %v9830_v44  ;;  %vm1684_vm10 = vmor %vm1580_vm0, %vm1652_vm1  ;;  %vm1680_vm0 = vcmp.eq.s32.totalorder %v5832_v25, %v6918_v6  ;;  %vm1598_vm7 = vcmp.eq.s32.totalorder %v5859_v34, %v6896_v4 }
  0x78   : > { %5407 = vmatprep.subr.msk.mxu1 %vm1684_vm10, %v9830_v44  ;;  %vm1681_vm13 = vmor %vm1577_vm3, %vm1649_vm5  ;;  %1841 = vmatprep.mubr.f32.mxu0 %v9832_v17  ;;  %vm1677_vm3 = vcmp.eq.s32.totalorder %v5832_v25, %v6936_v7  ;;  %vm1607_vm5 = vcmp.eq.s32.totalorder %v5832_v25, %v6951_v48 }
  0x79   : > { %5396 = vmatpush1.msk.msra.mxu0 %vm1681_vm13, %v9830_v44  ;;  %vm1683_vm1 = vmor %vm1579_vm8, %vm1651_vm9  ;;  %1930 = vmatprep.mubr.f32.mxu1 %v9832_v17  ;;  %vm1670_vm9 = vcmp.eq.s32.totalorder %v5859_v34, %v6900_v5 }
  0x7a   : > { %5408 = vmatpush1.msk.msra.mxu1 %vm1683_vm1, %v9830_v44  ;;  %5397 = vmatmul.mubr.msk.f32.vlgmr.msra.gmra.mxu0 %vm9888_vm14, %v6077_v62  ;;  %vm1710_vm4 = vmor %vm1606_vm11, %vm1678_vm12  ;;  %vm1600_vm11 = vcmp.eq.s32.totalorder %v5859_v34, %v6914_v46  ;;  %vm1672_vm12 = vcmp.eq.s32.totalorder %v5859_v34, %v6918_v6 }
  0x7b   : > { %5409 = vmatmul.mubr.msk.f32.vlgmr.msra.gmra.mxu1 %vm9888_vm14, %v6077_v62  ;;  %1847 = vmatprep.mubr.f32.mxu0 %v9832_v17  ;;  %vm1712_vm8 = vmor %vm1608_vm15, %vm1680_vm0  ;;  %vm1597_vm15 = vcmp.eq.s32.totalorder %v5859_v34, %v6932_v47  ;;  %vm1669_vm0 = vcmp.eq.s32.totalorder %v5859_v34, %v6936_v7 }
  0x7c   : > { %1936 = vmatprep.mubr.f32.mxu1 %v9832_v17  ;;  %5413 = vmatprep.subr.msk.mxu0 %vm1710_vm4, %v9830_v44  ;;  %vm1709_vm10 = vmor %vm1605_vm2, %vm1677_vm3  ;;  %vm1599_vm2 = vcmp.eq.s32.totalorder %v5859_v34, %v6951_v48  ;;  %vm1671_vm3 = vcmp.eq.s32.totalorder %v5859_v34, %v6955_v8 }
  0x7d   : > { %5425 = vmatprep.subr.msk.mxu1 %vm1712_vm8, %v9830_v44  ;;  %5414 = vmatpush1.msk.msra.mxu0 %vm1709_vm10, %v9830_v44  ;;  %vm1711_vm13 = vmor %vm1607_vm5, %vm1679_vm6  ;;  %vm1590_vm5 = vcmp.eq.s32.totalorder %v5928_v45, %v6896_v4  ;;  %vm1662_vm6 = vcmp.eq.s32.totalorder %v5928_v45, %v6900_v5  ;;  %vm1592_vm8 = vcmp.eq.s32.totalorder %v5928_v45, %v6914_v46 }
  0x7e   : > { %5398 = vmatmul.mubr.msk.f32.gmra.mxu0 %vm9888_vm14, %v6115_v63  ;;  %5426 = vmatpush1.msk.msra.mxu1 %vm1711_vm13, %v9830_v44  ;;  %vm1702_vm1 = vmor %vm1598_vm7, %vm1670_vm9  ;;  %vm1664_vm9 = vcmp.eq.s32.totalorder %v5928_v45, %v6918_v6  ;;  %vm1589_vm10 = vcmp.eq.s32.totalorder %v5928_v45, %v6932_v47  ;;  %vm1591_vm13 = vcmp.eq.s32.totalorder %v5928_v45, %v6951_v48 }
  0x7f   : > { %5410 = vmatmul.mubr.msk.f32.gmra.mxu1 %vm9888_vm14, %v6115_v63  ;;  %1853 = vmatprep.mubr.f32.mxu0 %v9832_v17  ;;  %vm1704_vm4 = vmor %vm1600_vm11, %vm1672_vm12  ;;  %vm1661_vm11 = vcmp.eq.s32.totalorder %v5928_v45, %v6936_v7 }
  0x80   : > { %1942 = vmatprep.mubr.f32.mxu1 %v9832_v17  ;;  %5415 = vmatprep.subr.msk.mxu0 %vm1702_vm1, %v9830_v44  ;;  %vm1701_vm7 = vmor %vm1597_vm15, %vm1669_vm0  ;;  %vm1663_vm15 = vcmp.eq.s32.totalorder %v5928_v45, %v6955_v8  ;;  %vm1582_vm0 = vcmp.eq.s32.totalorder %v5815_v19, %v6896_v4 }
  0x81   : > { %5427 = vmatprep.subr.msk.mxu1 %vm1704_vm4, %v9830_v44  ;;  %5416 = vmatpush1.msk.msra.mxu0 %vm1701_vm7, %v9830_v44  ;;  %vm1703_vm12 = vmor %vm1599_vm2, %vm1671_vm3  ;;  %vm1654_vm2 = vcmp.eq.s32.totalorder %v5815_v19, %v6900_v5  ;;  %vm1584_vm3 = vcmp.eq.s32.totalorder %v5815_v19, %v6914_v46  ;;  %vm1656_vm4 = vcmp.eq.s32.totalorder %v5815_v19, %v6918_v6 }
  0x82   : > { %5399 = vmatmul.mubr.msk.f32.gmra.mxu0 %vm9888_vm14, %v6154_v0  ;;  %5428 = vmatpush1.msk.msra.mxu1 %vm1703_vm12, %v9830_v44  ;;  %vm1694_vm1 = vmor %vm1590_vm5, %vm1662_vm6  ;;  %vm1581_vm6 = vcmp.eq.s32.totalorder %v5815_v19, %v6932_v47  ;;  %vm1653_vm7 = vcmp.eq.s32.totalorder %v5815_v19, %v6936_v7  ;;  %vm1655_vm12 = vcmp.eq.s32.totalorder %v5815_v19, %v6955_v8 }
  0x83   : > { %5411 = vmatmul.mubr.msk.f32.gmra.mxu1 %vm9888_vm14, %v6154_v0  ;;  %1859 = vmatprep.mubr.f32.mxu0 %v9832_v17  ;;  %vm1696_vm5 = vmor %vm1592_vm8, %vm1664_vm9 }
  0x84   : > { %1948 = vmatprep.mubr.f32.mxu1 %v9832_v17  ;;  %5417 = vmatprep.subr.msk.mxu0 %vm1694_vm1, %v9830_v44  ;;  %vm1693_vm8 = vmor %vm1589_vm10, %vm1661_vm11  ;;  %vm1583_vm10 = vcmp.eq.s32.totalorder %v5815_v19, %v6951_v48 }
  0x85   : > { %5429 = vmatprep.subr.msk.mxu1 %vm1696_vm5, %v9830_v44  ;;  %5418 = vmatpush1.msk.msra.mxu0 %vm1693_vm8, %v9830_v44  ;;  %vm1695_vm9 = vmor %vm1591_vm13, %vm1663_vm15  ;;  %vm2254_vm15 = vcmp.eq.s32.totalorder %v5832_v25, %v7098_v10  ;;  %vm2253_vm5 = vcmp.eq.s32.totalorder %v5832_v25, %v7134_v14 }
  0x86   : > { %5400 = vmatmul.mubr.msk.f32.gmra.mxu0 %vm9888_vm14, %v6221_v3  ;;  %5430 = vmatpush1.msk.msra.mxu1 %vm1695_vm9, %v9830_v44  ;;  %vm1686_vm11 = vmor %vm1582_vm0, %vm1654_vm2  ;;  %vm2318_vm0 = vcmp.eq.s32.totalorder %v5832_v25, %v7102_v11  ;;  %vm2256_vm2 = vcmp.eq.s32.totalorder %v5832_v25, %v7116_v12  ;;  %vm2319_vm9 = vcmp.eq.s32.totalorder %v5832_v25, %v7157_v18 }
  0x87   : > { %5412 = vmatmul.mubr.msk.f32.gmra.mxu1 %vm9888_vm14, %v6221_v3  ;;  %5419 = vmatprep.subr.msk.mxu0 %vm1686_vm11, %v9830_v44  ;;  %vm1688_vm13 = vmor %vm1584_vm3, %vm1656_vm4  ;;  %vm2320_vm3 = vcmp.eq.s32.totalorder %v5832_v25, %v7120_v13  ;;  %vm2246_vm11 = vcmp.eq.s32.totalorder %v5859_v34, %v7098_v10 }
  0x88   : > { %5431 = vmatprep.subr.msk.mxu1 %vm1688_vm13, %v9830_v44  ;;  %vm1685_vm1 = vmor %vm1581_vm6, %vm1653_vm7  ;;  %2019 = vmatprep.mubr.f32.mxu0 %v9832_v17  ;;  %vm2317_vm6 = vcmp.eq.s32.totalorder %v5832_v25, %v7138_v15  ;;  %vm2255_vm7 = vcmp.eq.s32.totalorder %v5832_v25, %v7153_v16 }
  0x89   : > { %5420 = vmatpush1.msk.msra.mxu0 %vm1685_vm1, %v9830_v44  ;;  %vm1687_vm4 = vmor %vm1583_vm10, %vm1655_vm12  ;;  %2108 = vmatprep.mubr.f32.mxu1 %v9832_v17  ;;  %vm2310_vm12 = vcmp.eq.s32.totalorder %v5859_v34, %v7102_v11 }
  0x8a   : > { %5432 = vmatpush1.msk.msra.mxu1 %vm1687_vm4, %v9830_v44  ;;  %5421 = vmatmul.mubr.msk.f32.vlgmr.msra.gmra.mxu0 %vm9888_vm14, %v6077_v62  ;;  %vm2350_vm8 = vmor %vm2254_vm15, %vm2318_vm0  ;;  %vm2248_vm15 = vcmp.eq.s32.totalorder %v5859_v34, %v7116_v12  ;;  %vm2312_vm0 = vcmp.eq.s32.totalorder %v5859_v34, %v7120_v13 }
  0x8b   : > { %5433 = vmatmul.mubr.msk.f32.vlgmr.msra.gmra.mxu1 %vm9888_vm14, %v6077_v62  ;;  %2025 = vmatprep.mubr.f32.mxu0 %v9832_v17  ;;  %vm2352_vm10 = vmor %vm2256_vm2, %vm2320_vm3  ;;  %vm2245_vm2 = vcmp.eq.s32.totalorder %v5859_v34, %v7134_v14  ;;  %vm2309_vm3 = vcmp.eq.s32.totalorder %v5859_v34, %v7138_v15  ;;  %v7288_v62 = vrot.slane %v6780_v29, %v7025_v49 }
  0x8c   : > { %2114 = vmatprep.mubr.f32.mxu1 %v9832_v17  ;;  %5469 = vmatprep.subr.msk.mxu0 %vm2350_vm8, %v9830_v44  ;;  %vm2349_vm13 = vmor %vm2253_vm5, %vm2317_vm6  ;;  %vm2247_vm5 = vcmp.eq.s32.totalorder %v5859_v34, %v7153_v16  ;;  %vm2311_vm6 = vcmp.eq.s32.totalorder %v5859_v34, %v7157_v18 }
  0x8d   : > { %5481 = vmatprep.subr.msk.mxu1 %vm2352_vm10, %v9830_v44  ;;  %5470 = vmatpush1.msk.msra.mxu0 %vm2349_vm13, %v9830_v44  ;;  %vm2351_vm1 = vmor %vm2255_vm7, %vm2319_vm9  ;;  %vm2238_vm7 = vcmp.eq.s32.totalorder %v5928_v45, %v7098_v10  ;;  %vm2302_vm9 = vcmp.eq.s32.totalorder %v5928_v45, %v7102_v11  ;;  %vm2240_vm10 = vcmp.eq.s32.totalorder %v5928_v45, %v7116_v12 }
  0x8e   : > { %5422 = vmatmul.mubr.msk.f32.gmra.mxu0 %vm9888_vm14, %v6115_v63  ;;  %5482 = vmatpush1.msk.msra.mxu1 %vm2351_vm1, %v9830_v44  ;;  %vm2342_vm4 = vmor %vm2246_vm11, %vm2310_vm12  ;;  %vm2304_vm12 = vcmp.eq.s32.totalorder %v5928_v45, %v7120_v13  ;;  %vm2237_vm13 = vcmp.eq.s32.totalorder %v5928_v45, %v7134_v14  ;;  %vm2239_vm1 = vcmp.eq.s32.totalorder %v5928_v45, %v7153_v16 }
  0x8f   : > { %5434 = vmatmul.mubr.msk.f32.gmra.mxu1 %vm9888_vm14, %v6115_v63  ;;  %2031 = vmatprep.mubr.f32.mxu0 %v9832_v17  ;;  %vm2344_vm8 = vmor %vm2248_vm15, %vm2312_vm0  ;;  %vm2301_vm15 = vcmp.eq.s32.totalorder %v5928_v45, %v7138_v15  ;;  %v7292_v63 = vrot.slane %v6826_v59, %v7040_v9 }
  0x90   : > { %2120 = vmatprep.mubr.f32.mxu1 %v9832_v17  ;;  %5471 = vmatprep.subr.msk.mxu0 %vm2342_vm4, %v9830_v44  ;;  %vm2341_vm11 = vmor %vm2245_vm2, %vm2309_vm3  ;;  %vm2303_vm2 = vcmp.eq.s32.totalorder %v5928_v45, %v7157_v18  ;;  %vm2230_vm3 = vcmp.eq.s32.totalorder %v5815_v19, %v7098_v10 }
  0x91   : > { %5483 = vmatprep.subr.msk.mxu1 %vm2344_vm8, %v9830_v44  ;;  %5472 = vmatpush1.msk.msra.mxu0 %vm2341_vm11, %v9830_v44  ;;  %vm2343_vm0 = vmor %vm2247_vm5, %vm2311_vm6  ;;  %vm2294_vm5 = vcmp.eq.s32.totalorder %v5815_v19, %v7102_v11  ;;  %vm2232_vm6 = vcmp.eq.s32.totalorder %v5815_v19, %v7116_v12  ;;  %vm2296_vm8 = vcmp.eq.s32.totalorder %v5815_v19, %v7120_v13 }
  0x92   : > { %5423 = vmatmul.mubr.msk.f32.gmra.mxu0 %vm9888_vm14, %v6154_v0  ;;  %5484 = vmatpush1.msk.msra.mxu1 %vm2343_vm0, %v9830_v44  ;;  %vm2334_vm4 = vmor %vm2238_vm7, %vm2302_vm9  ;;  %vm2229_vm9 = vcmp.eq.s32.totalorder %v5815_v19, %v7134_v14  ;;  %vm2293_vm11 = vcmp.eq.s32.totalorder %v5815_v19, %v7138_v15  ;;  %vm2295_vm0 = vcmp.eq.s32.totalorder %v5815_v19, %v7157_v18 }
  0x93   : > { %5435 = vmatmul.mubr.msk.f32.gmra.mxu1 %vm9888_vm14, %v6154_v0  ;;  %2037 = vmatprep.mubr.f32.mxu0 %v9832_v17  ;;  %vm2336_vm7 = vmor %vm2240_vm10, %vm2304_vm12  ;;  %v7306_v0 = vrot.slane %v6792_v57, %v7025_v49 }
  0x94   : > { %2126 = vmatprep.mubr.f32.mxu1 %v9832_v17  ;;  %5473 = vmatprep.subr.msk.mxu0 %vm2334_vm4, %v9830_v44  ;;  %vm2333_vm10 = vmor %vm2237_vm13, %vm2301_vm15  ;;  %vm2231_vm13 = vcmp.eq.s32.totalorder %v5815_v19, %v7153_v16 }
  0x95   : > { %5485 = vmatprep.subr.msk.mxu1 %vm2336_vm7, %v9830_v44  ;;  %5474 = vmatpush1.msk.msra.mxu0 %vm2333_vm10, %v9830_v44  ;;  %vm2335_vm12 = vmor %vm2239_vm1, %vm2303_vm2  ;;  %vm2258_vm2 = vcmp.eq.s32.totalorder %v5832_v25, %v7288_v62  ;;  %vm2257_vm7 = vcmp.eq.s32.totalorder %v5832_v25, %v7324_v21 }
  0x96   : > { %5424 = vmatmul.mubr.msk.f32.gmra.mxu0 %vm9888_vm14, %v6221_v3  ;;  %5486 = vmatpush1.msk.msra.mxu1 %vm2335_vm12, %v9830_v44  ;;  %vm2326_vm15 = vmor %vm2230_vm3, %vm2294_vm5  ;;  %vm2322_vm3 = vcmp.eq.s32.totalorder %v5832_v25, %v7292_v63  ;;  %vm2260_vm5 = vcmp.eq.s32.totalorder %v5832_v25, %v7306_v0  ;;  %vm2323_vm12 = vcmp.eq.s32.totalorder %v5832_v25, %v7347_v30 }
  0x97   : > { %5436 = vmatmul.mubr.msk.f32.gmra.mxu1 %vm9888_vm14, %v6221_v3  ;;  %5475 = vmatprep.subr.msk.mxu0 %vm2326_vm15, %v9830_v44  ;;  %vm2328_vm1 = vmor %vm2232_vm6, %vm2296_vm8  ;;  %vm2324_vm6 = vcmp.eq.s32.totalorder %v5832_v25, %v7310_v20  ;;  %v7387_v3 = vld [vmem:[%s9828_s1] sm:$0xff]  ;;  %vm2250_vm15 = vcmp.eq.s32.totalorder %v5859_v34, %v7288_v62 }
  0x98   : > { %5487 = vmatprep.subr.msk.mxu1 %vm2328_vm1, %v9830_v44  ;;  %vm2325_vm4 = vmor %vm2229_vm9, %vm2293_vm11  ;;  %2485 = vmatprep.mubr.f32.mxu0 %v9832_v17  ;;  %vm2321_vm9 = vcmp.eq.s32.totalorder %v5832_v25, %v7328_v26  ;;  %vm2259_vm11 = vcmp.eq.s32.totalorder %v5832_v25, %v7343_v28  ;;  %v5708_v25 = vld [vmem:[%s5820_s30 + $0x10] sm:$0xff] }
  0x99   : > { %5476 = vmatpush1.msk.msra.mxu0 %vm2325_vm4, %v9830_v44  ;;  %vm2327_vm8 = vmor %vm2231_vm13, %vm2295_vm0  ;;  %2574 = vmatprep.mubr.f32.mxu1 %v9832_v17  ;;  %vm2314_vm0 = vcmp.eq.s32.totalorder %v5859_v34, %v7292_v63 }
  0x9a   : > { %5488 = vmatpush1.msk.msra.mxu1 %vm2327_vm8, %v9830_v44  ;;  %5477 = vmatmul.mubr.msk.f32.vlgmr.msra.gmra.mxu0 %vm9888_vm14, %v7387_v3  ;;  %vm2354_vm10 = vmor %vm2258_vm2, %vm2322_vm3  ;;  %vm2252_vm2 = vcmp.eq.s32.totalorder %v5859_v34, %v7306_v0  ;;  %vm2316_vm3 = vcmp.eq.s32.totalorder %v5859_v34, %v7310_v20 }
  0x9b   : > { %5489 = vmatmul.mubr.msk.f32.vlgmr.msra.gmra.mxu1 %vm9888_vm14, %v7387_v3  ;;  %2491 = vmatprep.mubr.f32.mxu0 %v9832_v17  ;;  %vm2356_vm13 = vmor %vm2260_vm5, %vm2324_vm6  ;;  %vm2249_vm5 = vcmp.eq.s32.totalorder %v5859_v34, %v7324_v21  ;;  %vm2313_vm6 = vcmp.eq.s32.totalorder %v5859_v34, %v7328_v26 }
  0x9c   : > { %2580 = vmatprep.mubr.f32.mxu1 %v9832_v17  ;;  %5493 = vmatprep.subr.msk.mxu0 %vm2354_vm10, %v9830_v44  ;;  %vm2353_vm1 = vmor %vm2257_vm7, %vm2321_vm9  ;;  %vm2251_vm7 = vcmp.eq.s32.totalorder %v5859_v34, %v7343_v28  ;;  %vm2315_vm9 = vcmp.eq.s32.totalorder %v5859_v34, %v7347_v30 }
  0x9d   : > { %5505 = vmatprep.subr.msk.mxu1 %vm2356_vm13, %v9830_v44  ;;  %5494 = vmatpush1.msk.msra.mxu0 %vm2353_vm1, %v9830_v44  ;;  %vm2355_vm4 = vmor %vm2259_vm11, %vm2323_vm12  ;;  %vm2242_vm11 = vcmp.eq.s32.totalorder %v5928_v45, %v7288_v62  ;;  %vm2306_vm12 = vcmp.eq.s32.totalorder %v5928_v45, %v7292_v63 }
  0x9e   : > { %5478 = vmatmul.mubr.msk.f32.gmra.mxu0 %vm9888_vm14, %v7426_v35  ;;  %5506 = vmatpush1.msk.msra.mxu1 %vm2355_vm4, %v9830_v44  ;;  %vm2346_vm8 = vmor %vm2250_vm15, %vm2314_vm0  ;;  %vm2244_vm15 = vcmp.eq.s32.totalorder %v5928_v45, %v7306_v0  ;;  %vm2308_vm0 = vcmp.eq.s32.totalorder %v5928_v45, %v7310_v20 }
  0x9f   : > { %5490 = vmatmul.mubr.msk.f32.gmra.mxu1 %vm9888_vm14, %v7426_v35  ;;  %2497 = vmatprep.mubr.f32.mxu0 %v9832_v17  ;;  %vm2348_vm10 = vmor %vm2252_vm2, %vm2316_vm3  ;;  %vm2241_vm2 = vcmp.eq.s32.totalorder %v5928_v45, %v7324_v21  ;;  %vm2305_vm3 = vcmp.eq.s32.totalorder %v5928_v45, %v7328_v26 }
  0xa0   : > { %2586 = vmatprep.mubr.f32.mxu1 %v9832_v17  ;;  %5495 = vmatprep.subr.msk.mxu0 %vm2346_vm8, %v9830_v44  ;;  %vm2345_vm13 = vmor %vm2249_vm5, %vm2313_vm6  ;;  %vm2243_vm5 = vcmp.eq.s32.totalorder %v5928_v45, %v7343_v28  ;;  %vm2307_vm6 = vcmp.eq.s32.totalorder %v5928_v45, %v7347_v30  ;;  %v5707_v45 = vld [vmem:[%s5820_s30] sm:$0xff] }
  0xa1   : > { %5507 = vmatprep.subr.msk.mxu1 %vm2348_vm10, %v9830_v44  ;;  %5496 = vmatpush1.msk.msra.mxu0 %vm2345_vm13, %v9830_v44  ;;  %vm2347_vm1 = vmor %vm2251_vm7, %vm2315_vm9  ;;  %vm2234_vm7 = vcmp.eq.s32.totalorder %v5815_v19, %v7288_v62  ;;  %vm2298_vm9 = vcmp.eq.s32.totalorder %v5815_v19, %v7292_v63  ;;  %v2969_v34 = vadd.s32 16, %v5707_v45 }
  0xa2   : > { %5479 = vmatmul.mubr.msk.f32.gmra.mxu0 %vm9888_vm14, %v5703_v36  ;;  %5508 = vmatpush1.msk.msra.mxu1 %vm2347_vm1, %v9830_v44  ;;  %vm2338_vm4 = vmor %vm2242_vm11, %vm2306_vm12  ;;  %vm2236_vm11 = vcmp.eq.s32.totalorder %v5815_v19, %v7306_v0  ;;  %vm2300_vm12 = vcmp.eq.s32.totalorder %v5815_v19, %v7310_v20 }
  0xa3   : > { %5491 = vmatmul.mubr.msk.f32.gmra.mxu1 %vm9888_vm14, %v5703_v36  ;;  %2503 = vmatprep.mubr.f32.mxu0 %v9832_v17  ;;  %vm2340_vm8 = vmor %vm2244_vm15, %vm2308_vm0  ;;  %vm2233_vm15 = vcmp.eq.s32.totalorder %v5815_v19, %v7324_v21  ;;  %vm2297_vm0 = vcmp.eq.s32.totalorder %v5815_v19, %v7328_v26  ;;  %v7620_v26 = vpop.permute.xlu1 %487 }
  0xa4   : > { %2592 = vmatprep.mubr.f32.mxu1 %v9832_v17  ;;  %5497 = vmatprep.subr.msk.mxu0 %vm2338_vm4, %v9830_v44  ;;  %vm2337_vm10 = vmor %vm2241_vm2, %vm2305_vm3  ;;  %vm2235_vm2 = vcmp.eq.s32.totalorder %v5815_v19, %v7343_v28  ;;  %vm2299_vm3 = vcmp.eq.s32.totalorder %v5815_v19, %v7347_v30 }
  0xa5   : > { %5509 = vmatprep.subr.msk.mxu1 %vm2340_vm8, %v9830_v44  ;;  %5498 = vmatpush1.msk.msra.mxu0 %vm2337_vm10, %v9830_v44  ;;  %vm2339_vm13 = vmor %vm2243_vm5, %vm2307_vm6 }
  0xa6   : > { %5480 = vmatmul.mubr.msk.f32.gmra.mxu0 %vm9888_vm14, %v5704_v38  ;;  %5510 = vmatpush1.msk.msra.mxu1 %vm2339_vm13, %v9830_v44  ;;  %vm2330_vm1 = vmor %vm2234_vm7, %vm2298_vm9 }
  0xa7   : > { %5492 = vmatmul.mubr.msk.f32.gmra.mxu1 %vm9888_vm14, %v5704_v38  ;;  %5499 = vmatprep.subr.msk.mxu0 %vm2330_vm1, %v9830_v44  ;;  %vm2332_vm4 = vmor %vm2236_vm11, %vm2300_vm12 }
  0xa8   : > { %5511 = vmatprep.subr.msk.mxu1 %vm2332_vm4, %v9830_v44  ;;  %vm2329_vm5 = vmor %vm2233_vm15, %vm2297_vm0  ;;  %2663 = vmatprep.mubr.f32.mxu0 %v9832_v17 }
  0xa9   : > { %5500 = vmatpush1.msk.msra.mxu0 %vm2329_vm5, %v9830_v44  ;;  %vm2331_vm6 = vmor %vm2235_vm2, %vm2299_vm3  ;;  %2752 = vmatprep.mubr.f32.mxu1 %v9832_v17 }
  0xaa   : > { %5512 = vmatpush1.msk.msra.mxu1 %vm2331_vm6, %v9830_v44  ;;  %5501 = vmatmul.mubr.msk.f32.vlgmr.msra.gmra.mxu0 %vm9888_vm14, %v7387_v3 }
  0xab   : > { %5513 = vmatmul.mubr.msk.f32.vlgmr.msra.gmra.mxu1 %vm9888_vm14, %v7387_v3  ;;  %2669 = vmatprep.mubr.f32.mxu0 %v9832_v17 }
  0xac   : > { %2758 = vmatprep.mubr.f32.mxu1 %v9832_v17  ;;  %3974 = vperm.xlu0 %5667, %v225_v39   ;;  %v5705_v39 = vld [vmem:[%s5820_s30 + $0x8] sm:$0xff] }
  0xad   : > { %3969 = vperm.xlu1 %5668, %v224_v40   ;;  %v2970_v40 = vadd.s32 16, %v5705_v39 }
  0xae   : > { %5502 = vmatmul.mubr.msk.f32.gmra.mxu0 %vm9888_vm14, %v7426_v35 }
  0xaf   : > { %5514 = vmatmul.mubr.msk.f32.gmra.mxu1 %vm9888_vm14, %v7426_v35  ;;  %2675 = vmatprep.mubr.f32.mxu0 %v9832_v17 }
  0xb0   : > { %2764 = vmatprep.mubr.f32.mxu1 %v9832_v17  ;;  %3964 = vperm.xlu0 %5667, %v223_v41   ;;  %v5706_v41 = vld [vmem:[%s5820_s30 + $0x18] sm:$0xff] }
  0xb1   : > { %3959 = vperm.xlu1 %5668, %v222_v42   ;;  %v2972_v42 = vadd.s32 16, %v5706_v41  ;;  %v7654_v19 = vrot.slane %v5706_v41, %v6594_v37 }
  0xb2   : > { %5503 = vmatmul.mubr.msk.f32.gmra.mxu0 %vm9888_vm14, %v5703_v36 }
  0xb3   : > { %5515 = vmatmul.mubr.msk.f32.gmra.mxu1 %vm9888_vm14, %v5703_v36  ;;  %2681 = vmatprep.mubr.f32.mxu0 %v9832_v17  ;;  %9900 = vst [vmem:[#allocation14_spill] sm:$0xff] %v7654_v19  ;;  %v7671_v41 = vrot.slane %v2972_v42, %v7040_v9  ;;  %v5709_v42 = vld [vmem:[%s5820_s30 + $0x28] sm:$0xff] }
  0xb4   : > { %2770 = vmatprep.mubr.f32.mxu1 %v9832_v17  ;;  %3890 = vperm.xlu0 %5667, %v221_v43   ;;  %v7636_v43 = vpop.permute.xlu1 %482 }
  0xb5   : > { %3885 = vperm.xlu1 %5668, %v220_v22   ;;  %9895 = vst [vmem:[#allocation9_spill] sm:$0xff] %v7636_v43  ;;  %9903 = vst [vmem:[#allocation17_spill] sm:$0xff] %v7671_v41 }
  0xb6   : > { %5504 = vmatmul.mubr.msk.f32.gmra.mxu0 %vm9888_vm14, %v5704_v38 }
  0xb7   : > { %5516 = vmatmul.mubr.msk.f32.gmra.mxu1 %vm9888_vm14, %v5704_v38  ;;  %3213 = vmatprep.mubr.f32.mxu0 %v9832_v17 }
  0xb8   : > { %3880 = vperm.xlu0 %5667, %v219_v53   ;;  %3302 = vmatprep.mubr.f32.mxu1 %v9832_v17  ;;  %v7640_v53 = vpop.permute.xlu0 %497  ;;  %v7651_v17 = vrot.slane %v5838_v27, %v7025_v49  ;;  %v7668_v27 = vrot.slane %v5850_v31, %v7025_v49 }
  0xb9   : > { %3875 = vperm.xlu1 %5668, %v218_v23  }
  0xba   : > { %9899 = vst [vmem:[#allocation13_spill] sm:$0xff] %v7651_v17  ;;  %9902 = vst [vmem:[#allocation16_spill] sm:$0xff] %v7668_v27 }
  0xbc   : > { %4953 = vperm.xlu0 %5667, %v226_v54   ;;  %v7645_v54 = vrot.slane %v5705_v39, %v6594_v37  ;;  %v7664_v39 = vrot.slane %v2970_v40, %v7040_v9  ;;  %v7685_v40 = vrot.slane %v5707_v45, %v6594_v37 }
  0xbe   : > { %9898 = vst [vmem:[#allocation12_spill] sm:$0xff] %v7645_v54  ;;  %9901 = vst [vmem:[#allocation15_spill] sm:$0xff] %v7664_v39 }
  0xbf   : > { %9904 = vst [vmem:[#allocation18_spill] sm:$0xff] %v7685_v40  ;;  %v7711_v40 = vrot.slane %v5856_v33, %v7025_v49  ;;  %v7730_v33 = vrot.slane %v5971_v50, %v7025_v49 }
  0xc1   : > { %9908 = vst [vmem:[#allocation22_spill] sm:$0xff] %v7711_v40  ;;  %9911 = vst [vmem:[#allocation25_spill] sm:$0xff] %v7730_v33 }
  0xfa   : > { %v579_v24 = vpop.f32.mrf.mxu0 }
  0xfb   : > { %v668_v56 = vpop.f32.mrf.mxu1 }
  0xfc   : > { %v581_v29 = vpop.f32.mrf.mxu0  ;;  %v7674_v19 = vadd.f32 %v668_v56, %v7636_v43  ;;  %v7694_v56 = vrot.slane %v5853_v32, %v7025_v49 }
  0xfd   : > { %v670_v57 = vpop.f32.mrf.mxu1  ;;  %v7677_v17 = vadd.f32 %v581_v29, %v7636_v43  ;;  %v7697_v29 = vrot.slane %v5708_v25, %v6594_v37 }
  0xfe   : > { %v585_v58 = vpop.f32.mrf.mxu0  ;;  %9905 = vst [vmem:[#allocation19_spill] sm:$0xff] %v7694_v56 }
  0xff   : > { %v7568_v59 = vpop.f32.mrf.mxu1  ;;  %v7688_v31 = vadd.f32 %v585_v58, %v7620_v26  ;;  %9906 = vst [vmem:[#allocation20_spill] sm:$0xff] %v7697_v29  ;;  %v7707_v58 = vrot.slane %v2969_v34, %v7040_v9  ;;  %v7726_v34 = vrot.slane %v5709_v42, %v6594_v37 }
 0x100   : > { %v7570_v60 = vpop.f32.mrf.mxu0  ;;  %v7702_v41 = vadd.f32 %v7568_v59, %v7620_v26  ;;  %v7721_v59 = vpop.permute.xlu0 %492 }
 0x101   : > { %v7572_v61 = vpop.f32.mrf.mxu1  ;;  %9907 = vst [vmem:[#allocation21_spill] sm:$0xff] %v7707_v58  ;;  %v7719_v29 = vadd.f32 %v7570_v60, %v7620_v26  ;;  %9910 = vst [vmem:[#allocation24_spill] sm:$0xff] %v7726_v34  ;;  %v5710_v60 = vld [vmem:[%s5820_s30 + $0x38] sm:$0xff] }
 0x102   : > { %v7574_v1 = vpop.f32.mrf.mxu0  ;;  %v7739_v40 = vrot.slane %v5710_v60, %v6594_v37  ;;  %v7744_v34 = vadd.f32 %v7572_v61, %v7620_v26  ;;  %v7766_v33 = vadd.s32 16, %v5710_v60 }
 0x103   : > { %v7576_v2 = vpop.f32.mrf.mxu1 }
 0x104   : > { %v7578_v4 = vpop.f32.mrf.mxu0  ;;  %9912 = vst [vmem:[#allocation26_spill] sm:$0xff] %v7739_v40  ;;  %v7758_v40 = vadd.f32 %v7574_v1, %v7721_v59  ;;  %9915 = vst [vmem:[#allocation29_spill] sm:$0xff] %v7766_v33 }
 0x105   : > { %v7580_v5 = vpop.f32.mrf.mxu1 }
 0x106   : > { %v7582_v46 = vpop.f32.mrf.mxu0 }
 0x107   : > { %v7584_v6 = vpop.f32.mrf.mxu1  ;;  %v7788_v60 = vadd.f32 %v7582_v46, %v7640_v53 }
 0x108   : > { %v7586_v47 = vpop.f32.mrf.mxu0 }
 0x109   : > { %v7588_v7 = vpop.f32.mrf.mxu1 }
 0x10a   : > { %v7590_v48 = vpop.f32.mrf.mxu0 }
 0x10b   : > { %v7592_v8 = vpop.f32.mrf.mxu1  ;;  %v7807_v46 = vadd.f32 %v7590_v48, %v7636_v43  ;;  %v7825_v48 = vrot.slane %v5988_v52, %v7025_v49  ;;  %v7844_v52 = vrot.slane %v6008_v55, %v7025_v49 }
 0x10c   : > { %v7594_v10 = vpop.f32.mrf.mxu0 }
 0x10d   : > { %v7596_v11 = vpop.f32.mrf.mxu1  ;;  %9918 = vst [vmem:[#allocation32_spill] sm:$0xff] %v7807_v46  ;;  %9922 = vst [vmem:[#allocation36_spill] sm:$0xff] %v7825_v48 }
 0x10e   : > { %v7598_v12 = vpop.f32.mrf.mxu0  ;;  %9926 = vst [vmem:[#allocation40_spill] sm:$0xff] %v7844_v52 }
 0x10f   : > { %v7600_v13 = vpop.f32.mrf.mxu1  ;;  %v7857_v55 = vadd.f32 %v7598_v12, %v7620_v26 }
 0x110   : > { %v7602_v14 = vpop.f32.mrf.mxu0 }
 0x111   : > { %v7604_v15 = vpop.f32.mrf.mxu1  ;;  %9927 = vst [vmem:[#allocation41_spill] sm:$0xff] %v7857_v55 }
 0x112   : > { %v7606_v16 = vpop.f32.mrf.mxu0  ;;  %v7871_v27 = vadd.f32 %v7604_v15, %v7620_v26 }
 0x113   : > { %v7608_v18 = vpop.f32.mrf.mxu1 }
 0x114   : > { %v7610_v62 = vpop.f32.mrf.mxu0  ;;  %9930 = vst [vmem:[#allocation44_spill] sm:$0xff] %v7871_v27 }
 0x115   : > { %v7612_v63 = vpop.f32.mrf.mxu1 }
 0x116   : > { %v7614_v0 = vpop.f32.mrf.mxu0  ;;  %v7890_v15 = vadd.f32 %v7612_v63, %v7721_v59 }
 0x117   : > { %v7616_v20 = vpop.f32.mrf.mxu1 }
 0x118   : > { %v7618_v21 = vpop.f32.mrf.mxu0  ;;  %9934 = vst [vmem:[#allocation48_spill] sm:$0xff] %v7890_v15 }
 0x119   : > { %v7622_v28 = vpop.f32.mrf.mxu1 }
 0x11a   : > { %v7624_v30 = vpop.f32.mrf.mxu0  ;;  %v7913_v52 = vadd.f32 %v7622_v28, %v7640_v53 }
 0x11b   : > { %v7626_v3 = vpop.f32.mrf.mxu1 }
 0x11c   : > { %v7628_v35 = vpop.f32.mrf.mxu0  ;;  %9938 = vst [vmem:[#allocation52_spill] sm:$0xff] %v7913_v52 }
 0x11d   : > { %v7630_v36 = vpop.f32.mrf.mxu1 }
 0x11e   : > { %v7632_v38 = vpop.f32.mrf.mxu0 }
 0x11f   : > { %9894 = vst [vmem:[#allocation8_spill] sm:$0xff] %v7632_v38  ;;  %v7638_v22 = vpop.f32.mrf.mxu1  ;;  %v7659_v38 = vadd.f32 %v579_v24, %v7636_v43  ;;  %v7680_v24 = vadd.f32 %v670_v57, %v7636_v43  ;;  %v2974_v57 = vadd.s32 16, %v5709_v42  ;;  %v7762_v42 = vadd.f32 %v7576_v2, %v7721_v59 }
 0x120   : > { %9896 = vst [vmem:[#allocation10_spill] sm:$0xff] %v7638_v22  ;;  %v7642_v23 = vpop.f32.mrf.mxu0  ;;  %v2971_v22 = vadd.s32 16, %v5708_v25  ;;  %v7753_v25 = vrot.slane %v5985_v51, %v7025_v49  ;;  %v7771_v51 = vadd.f32 %v7578_v4, %v7721_v59  ;;  %v7792_v4 = vadd.f32 %v7584_v6, %v7640_v53 }
 0x121   : > { %9897 = vst [vmem:[#allocation11_spill] sm:$0xff] %v7642_v23  ;;  %v7647_v44 = vpop.f32.mrf.mxu1  ;;  %v7811_v6 = vadd.f32 %v7592_v8, %v7636_v43 }
 0x122   : > { %v7661_v23 = vpop.f32.mrf.mxu0  ;;  %v7714_v32 = vrot.slane %v2971_v22, %v7040_v9  ;;  %v7749_v22 = vrot.slane %v2974_v57, %v7040_v9  ;;  %9914 = vst [vmem:[#allocation28_spill] sm:$0xff] %v7753_v25  ;;  %v7800_v57 = vadd.f32 %v7588_v7, %v7640_v53  ;;  %v7838_v7 = vadd.f32 %v7596_v11, %v7636_v43 }
 0x123   : > { %v7682_v54 = vpop.f32.mrf.mxu1  ;;  %9919 = vst [vmem:[#allocation33_spill] sm:$0xff] %v7811_v6  ;;  %v7875_v11 = vadd.f32 %v7606_v16, %v7721_v59  ;;  %v7896_v16 = vadd.f32 %v7614_v0, %v7640_v53  ;;  %v1281_v0 = vadd.f32 %v7626_v3, %v7636_v43  ;;  %v1204_v46 = vadd.f32 %v7661_v23, %v7721_v59 }
 0x124   : > { %v7690_v39 = vpop.f32.mrf.mxu0  ;;  %9909 = vst [vmem:[#allocation23_spill] sm:$0xff] %v7714_v32  ;;  %9913 = vst [vmem:[#allocation27_spill] sm:$0xff] %v7749_v22  ;;  %v7775_v32 = vadd.f32 %v7580_v5, %v7721_v59  ;;  %v7780_v22 = vld [vmem:[%s5820_s30 + $0x20] sm:$0xff]  ;;  %v7796_v5 = vadd.f32 %v7586_v47, %v7640_v53  ;;  %v7815_v47 = vadd.f32 %v7594_v10, %v7636_v43 }
 0x125   : > { %v7704_v45 = vpop.f32.mrf.mxu1  ;;  %9916 = vst [vmem:[#allocation30_spill] sm:$0xff] %v7780_v22  ;;  %v7784_v2 = vrot.slane %v7780_v22, %v6594_v37  ;;  %9925 = vst [vmem:[#allocation39_spill] sm:$0xff] %v7838_v7  ;;  %v7867_v10 = vadd.f32 %v7602_v14, %v7620_v26  ;;  %v7886_v14 = vadd.f32 %v7610_v62, %v7721_v59  ;;  %v1483_v27 = vmax.f32 %v1281_v0, 0.0 }
 0x126   : > { %v7723_v56 = vpop.f32.mrf.mxu0  ;;  %9920 = vst [vmem:[#allocation34_spill] sm:$0xff] %v7815_v47  ;;  %9931 = vst [vmem:[#allocation45_spill] sm:$0xff] %v7875_v11  ;;  %v1192_v62 = vadd.f32 %v7624_v30, %v7636_v43  ;;  %v9939_v3 = vld [vmem:[#allocation8_spill] sm:$0xff]  ;;  %v1497_v11 = vmax.f32 %v1204_v46, 0.0  ;;  %v9949_v46 = vmax.f32 %v7688_v31, 0.0  ;;  %v9954_v31 = vmax.f32 %v7744_v34, 0.0 }
 0x127   : > { %v7735_v58 = vpop.f32.mrf.mxu1  ;;  %9917 = vst [vmem:[#allocation31_spill] sm:$0xff] %v7784_v2  ;;  %v7828_v2 = vld [vmem:[%s5820_s30 + $0x30] sm:$0xff]  ;;  %9929 = vst [vmem:[#allocation43_spill] sm:$0xff] %v7867_v10  ;;  %v1198_v10 = vadd.f32 %v9939_v3, %v7620_v26  ;;  %v1206_v3 = vadd.f32 %v7690_v39, %v7721_v59  ;;  %v1210_v23 = vadd.f32 %v7723_v56, %v7640_v53  ;;  %v9944_v39 = vmax.f32 %v7674_v19, 0.0 }
 0x128   : > { %v7746_v50 = vpop.f32.mrf.mxu0  ;;  %9923 = vst [vmem:[#allocation37_spill] sm:$0xff] %v7828_v2  ;;  %v7832_v8 = vrot.slane %v7828_v2, %v6594_v37  ;;  %9933 = vst [vmem:[#allocation47_spill] sm:$0xff] %v7886_v14  ;;  %v7900_v2 = vadd.f32 %v7616_v20, %v7640_v53  ;;  %v1194_v20 = vadd.f32 %v7628_v35, %v7636_v43  ;;  %v1481_v63 = vmax.f32 %v1192_v62, 0.0 }
 0x129   : > { %v7764_v61 = vpop.f32.mrf.mxu1  ;;  %9935 = vst [vmem:[#allocation49_spill] sm:$0xff] %v7896_v16  ;;  %v1283_v35 = vadd.f32 %v7630_v36, %v7636_v43  ;;  %v9940_v36 = vld [vmem:[#allocation10_spill] sm:$0xff]  ;;  %v1289_v62 = vadd.f32 %v7647_v44, %v7620_v26 }
 0x12a   : > { %v7777_v1 = vpop.f32.mrf.mxu0  ;;  %9924 = vst [vmem:[#allocation38_spill] sm:$0xff] %v7832_v8  ;;  %9936 = vst [vmem:[#allocation50_spill] sm:$0xff] %v7900_v2  ;;  %v1482_v55 = vmax.f32 %v1194_v20, 0.0  ;;  %v1287_v14 = vadd.f32 %v9940_v36, %v7620_v26  ;;  %v1293_v20 = vadd.f32 %v7682_v54, %v7721_v59  ;;  %v1295_v36 = vadd.f32 %v7704_v45, %v7721_v59 }
 0x12b   : > { %v7802_v33 = vpop.f32.mrf.mxu1  ;;  %v1484_v0 = vmax.f32 %v1283_v35, 0.0  ;;  %v1299_v35 = vadd.f32 %v7735_v58, %v7640_v53  ;;  %v1212_v54 = vadd.f32 %v7746_v50, %v7640_v53  ;;  %v7976_v45 = vmax.f32 %v9944_v39, %v1483_v27 }
 0x12c   : > { %v7817_v9 = vpop.f32.mrf.mxu0  ;;  %v9946_v2 = vmax.f32 %v7677_v17, 0.0  ;;  %v1301_v56 = vadd.f32 %v7764_v61, %v7640_v53  ;;  %v1491_v16 = vmax.f32 %v1287_v14, 0.0  ;;  %v1499_v27 = vmax.f32 %v1293_v20, 0.0 }
 0x12d   : > { %v7821_v22 = vpop.f32.mrf.mxu1  ;;  %9945 = vst [vmem:[#allocation10_spill] sm:$0xff] %v7976_v45  ;;  %v1498_v39 = vmax.f32 %v1206_v3, 0.0  ;;  %v1500_v17 = vmax.f32 %v1295_v36, 0.0  ;;  %v1506_v45 = vmax.f32 %v1212_v54, 0.0  ;;  %v7992_v61 = vadd.f32 %v7777_v1, %v7636_v43 }
 0x12e   : > { %9921 = vst [vmem:[#allocation35_spill] sm:$0xff] %v7821_v22  ;;  %v7840_v25 = vpop.f32.mrf.mxu0  ;;  %v7863_v22 = vadd.f32 %v7600_v13, %v7620_v26  ;;  %v7882_v13 = vadd.f32 %v7608_v18, %v7721_v59  ;;  %v7904_v18 = vadd.f32 %v7618_v21, %v7640_v53  ;;  %v9941_v21 = vld [vmem:[#allocation11_spill] sm:$0xff]  ;;  %v9952_v3 = vmax.f32 %v7702_v41, 0.0 }
 0x12f   : > { %v7850_v8 = vpop.f32.mrf.mxu1  ;;  %v1200_v30 = vadd.f32 %v9941_v21, %v7620_v26  ;;  %v9942_v21 = vmax.f32 %v7659_v38, 0.0  ;;  %v7980_v38 = vmax.f32 %v9946_v2, %v1482_v55  ;;  %v1505_v55 = vmax.f32 %v1210_v23, 0.0  ;;  %9948 = vst [vmem:[#allocation11_spill] sm:$0xff] %v7992_v61 }
 0x130   : > { %v7859_v49 = vpop.f32.mrf.mxu0  ;;  %9928 = vst [vmem:[#allocation42_spill] sm:$0xff] %v7863_v22  ;;  %9932 = vst [vmem:[#allocation46_spill] sm:$0xff] %v7882_v13  ;;  %v1492_v13 = vmax.f32 %v1289_v62, 0.0  ;;  %v1508_v62 = vmax.f32 %v1301_v56, 0.0  ;;  %v8008_v36 = vmax.f32 %v9952_v3, %v1491_v16  ;;  %v9953_v1 = vmax.f32 %v7719_v29, 0.0 }
 0x131   : > { %v7877_v12 = vpop.f32.mrf.mxu1  ;;  %9937 = vst [vmem:[#allocation51_spill] sm:$0xff] %v7904_v18  ;;  %v7964_v44 = vmax.f32 %v9942_v21, %v1481_v63  ;;  %v1489_v63 = vmax.f32 %v1198_v10, 0.0  ;;  %v1490_v58 = vmax.f32 %v1200_v30, 0.0  ;;  %v1507_v10 = vmax.f32 %v1299_v35, 0.0 }
 0x132   : > { %v7892_v37 = vpop.f32.mrf.mxu0  ;;  %v8016_v23 = vmax.f32 %v9954_v31, %v1492_v13  ;;  %v9957_v41 = vmax.f32 %v7771_v51, 0.0  ;;  %v9958_v29 = vmax.f32 %v7775_v32, 0.0  ;;  %v9962_v32 = vmax.f32 %v7800_v57, 0.0 }
 0x133   : > { %v7908_v48 = vpop.f32.mrf.mxu1  ;;  %9943 = vst [vmem:[#allocation8_spill] sm:$0xff] %v7964_v44  ;;  %v9947_v44 = vmax.f32 %v7680_v24, 0.0  ;;  %v7996_v30 = vmax.f32 %v9949_v46, %v1489_v63  ;;  %v8000_v24 = vadd.f32 %v7802_v33, %v7636_v43  ;;  %v9955_v33 = vmax.f32 %v7758_v40, 0.0 }
 0x134   : > { %v7919_v6 = vpop.f32.mrf.mxu0  ;;  %v8028_v16 = vmax.f32 %v9957_v41, %v1498_v39  ;;  %v8032_v56 = vmax.f32 %v9958_v29, %v1500_v17  ;;  %v8036_v34 = vadd.f32 %v7892_v37, %v7721_v59  ;;  %v1540_v17 = vmax.f32 %v9962_v32, %v1508_v62 }
 0x135   : > { %v7925_v7 = vpop.f32.mrf.mxu1  ;;  %v7988_v19 = vmax.f32 %v9947_v44, %v1484_v0  ;;  %9950 = vst [vmem:[#allocation53_spill] sm:$0xff] %v8000_v24  ;;  %v8004_v0 = vadd.f32 %v7817_v9, %v7636_v43  ;;  %v8012_v44 = vmax.f32 %v9953_v1, %v1490_v58  ;;  %v8020_v35 = vmax.f32 %v9955_v33, %v1497_v11  ;;  %v9963_v1 = vld [vmem:[#allocation35_spill] sm:$0xff] }
 0x136   : > { %v7932_v47 = vpop.f32.mrf.mxu0  ;;  %v9956_v9 = vmax.f32 %v7762_v42, 0.0  ;;  %v9959_v11 = vmax.f32 %v7788_v60, 0.0  ;;  %v9960_v42 = vmax.f32 %v7792_v4, 0.0  ;;  %v8051_v60 = vadd.f32 %v9963_v1, %v7636_v43 }
 0x137   : > { %v7937_v22 = vpop.f32.mrf.mxu1  ;;  %9951 = vst [vmem:[#allocation54_spill] sm:$0xff] %v8004_v0  ;;  %v8055_v4 = vadd.f32 %v7840_v25, %v7620_v26  ;;  %v8063_v57 = vadd.f32 %v7859_v49, %v7620_v26  ;;  %v8072_v31 = vadd.f32 %v7919_v6, %v7721_v59  ;;  %v8076_v25 = vadd.f32 %v7925_v7, %v7721_v59 }
 0x138   : > { %v7942_v15 = vpop.f32.mrf.mxu0  ;;  %v8024_v63 = vmax.f32 %v9956_v9, %v1499_v27  ;;  %v1537_v13 = vmax.f32 %v9959_v11, %v1505_v55  ;;  %v1539_v58 = vmax.f32 %v9960_v42, %v1507_v10  ;;  %v9961_v27 = vmax.f32 %v7796_v5, 0.0 }
 0x139   : > { %v7952_v28 = vpop.f32.mrf.mxu1  ;;  %v8059_v5 = vadd.f32 %v7850_v8, %v7620_v26  ;;  %v8080_v8 = vadd.f32 %v7932_v47, %v7640_v53  ;;  %v8088_v33 = vadd.f32 %v7942_v15, %v7640_v53 }
 0x13a   : > { %v7960_v52 = vpop.f32.mrf.mxu0  ;;  %v1538_v51 = vmax.f32 %v9961_v27, %v1506_v45  ;;  %v8067_v45 = vadd.f32 %v7908_v48, %v7721_v59  ;;  %v8084_v48 = vadd.f32 %v7937_v22, %v7640_v53 }
 0x13b   : > { %v7972_v18 = vpop.f32.mrf.mxu1  ;;  %v8094_v7 = vadd.f32 %v7960_v52, %v7636_v43 }
 0x13c   : > { %v1845_v21 = vpop.f32.mrf.mxu0 }
 0x13d   : > { %v7984_v50 = vpop.f32.mrf.mxu1  ;;  %v8100_v42 = vadd.f32 %v1845_v21, %v7636_v43 }
 0x13e   : > { %v1849_v2 = vpop.f32.mrf.mxu0 }
 0x13f   : > { %v1938_v14 = vpop.f32.mrf.mxu1  ;;  %v1850_v52 = vadd.f32 %v1849_v2, %v7620_v26 }
 0x140   : > { %v1851_v20 = vpop.f32.mrf.mxu0 }
 0x141   : > { %v1940_v54 = vpop.f32.mrf.mxu1  ;;  %v1852_v15 = vadd.f32 %v1851_v20, %v7620_v26 }
 0x142   : > { %v1855_v40 = vpop.f32.mrf.mxu0 }
 0x143   : > { %v1944_v46 = vpop.f32.mrf.mxu1  ;;  %v1856_v47 = vadd.f32 %v1855_v40, %v7721_v59 }
 0x144   : > { %v1857_v55 = vpop.f32.mrf.mxu0  ;;  %v1945_v27 = vadd.f32 %v1944_v46, %v7721_v59  ;;  %v8115_v46 = vadd.f32 %v7984_v50, %v7636_v43 }
 0x145   : > { %v1946_v10 = vpop.f32.mrf.mxu1  ;;  %v1858_v6 = vadd.f32 %v1857_v55, %v7721_v59  ;;  %v1941_v55 = vadd.f32 %v1940_v54, %v7620_v26 }
 0x146   : > { %v1861_v49 = vpop.f32.mrf.mxu0  ;;  %v1947_v29 = vadd.f32 %v1946_v10, %v7721_v59 }
 0x147   : > { %v1862_v9 = vadd.f32 %v1861_v49, %v7640_v53  ;;  %v1950_v41 = vpop.f32.mrf.mxu1  ;;  %v2150_v21 = vmax.f32 %v1858_v6, 0.0  ;;  %v2144_v62 = vmax.f32 %v1941_v55, 0.0 }
 0x148   : > { %v1951_v22 = vadd.f32 %v1950_v41, %v7640_v53  ;;  %v1863_v11 = vpop.f32.mrf.mxu0  ;;  %v1939_v41 = vadd.f32 %v1938_v14, %v7620_v26  ;;  %v2152_v2 = vmax.f32 %v1947_v29, 0.0  ;;  %v2151_v14 = vmax.f32 %v1945_v27, 0.0  ;;  %v9971_v27 = vld [vmem:[#allocation19_spill] sm:$0xff] }
 0x149   : > { %v1864_v32 = vadd.f32 %v1863_v11, %v7640_v53  ;;  %v1952_v1 = vpop.f32.mrf.mxu1  ;;  %v2157_v40 = vmax.f32 %v1862_v9, 0.0  ;;  %v2149_v11 = vmax.f32 %v1856_v47, 0.0  ;;  %v8121_v9 = vadd.f32 %v7972_v18, %v7636_v43  ;;  %v9965_v18 = vld [vmem:[#allocation12_spill] sm:$0xff] }
 0x14a   : > { %v1953_v10 = vadd.f32 %v1952_v1, %v7640_v53  ;;  %v8108_v49 = vpop.f32.mrf.mxu0  ;;  %v2159_v3 = vmax.f32 %v1951_v22, 0.0  ;;  %v2142_v1 = vmax.f32 %v1852_v15, 0.0  ;;  %v2134_v47 = vmax.f32 %v8100_v42, 0.0  ;;  %v9966_v15 = vld [vmem:[#allocation4_spill] sm:$0xff] }
 0x14b   : > { %v2158_v39 = vmax.f32 %v1864_v32, 0.0  ;;  %v8111_v20 = vpop.f32.mrf.mxu1  ;;  %v2141_v32 = vmax.f32 %v1850_v52, 0.0  ;;  %v2189_v24 = vmax.f32 %v1537_v13, %v2157_v40  ;;  %v2143_v29 = vmax.f32 %v1939_v41, 0.0  ;;  %v9973_v40 = vld [vmem:[#allocation22_spill] sm:$0xff] }
 0x14c   : > { %9964 = vst [vmem:[#allocation35_spill] sm:$0xff] %v8111_v20  ;;  %v2160_v37 = vmax.f32 %v1953_v10, 0.0  ;;  %v8117_v54 = vpop.f32.mrf.mxu0  ;;  %v2182_v10 = vmax.f32 %v8028_v16, %v2150_v21  ;;  %v2191_v0 = vmax.f32 %v1539_v58, %v2159_v3  ;;  %vm2866_vm8 = vcmp.eq.s32.totalorder %v9966_v15, %v9965_v18  ;;  %v9968_v58 = vld [vmem:[#allocation14_spill] sm:$0xff]  ;;  %v9969_v3 = vld [vmem:[#allocation16_spill] sm:$0xff] }
 0x14d   : > { %v2190_v6 = vmax.f32 %v1538_v51, %v2158_v39  ;;  %v8123_v22 = vpop.f32.mrf.mxu1  ;;  %v9967_v51 = vld [vmem:[#allocation13_spill] sm:$0xff]  ;;  %v2133_v13 = vmax.f32 %v8094_v7, 0.0  ;;  %v2136_v39 = vmax.f32 %v8115_v46, 0.0  ;;  %vm2868_vm9 = vcmp.eq.s32.totalorder %v9966_v15, %v9968_v58 }
 0x14e   : > { %v2192_v61 = vmax.f32 %v1540_v17, %v2160_v37  ;;  %v8125_v50 = vpop.f32.mrf.mxu0  ;;  %vm2930_vm7 = vcmp.eq.s32.totalorder %v9966_v15, %v9967_v51  ;;  %v2181_v17 = vmax.f32 %v8020_v35, %v2149_v11  ;;  %v2184_v37 = vmax.f32 %v8032_v56, %v2152_v2  ;;  %v8188_v11 = vld [vmem:[%s9828_s1 + $0x40] sm:$0xff] }
 0x14f   : > { %v8129_v20 = vpop.f32.mrf.mxu1  ;;  %3173 = vmatprep.subr.mxu0 %v2190_v6  ;;  %vm2932_vm10 = vcmp.eq.s32.totalorder %v9966_v15, %v9969_v3  ;;  %v8147_v42 = vadd.f32 %v7952_v28, %v7640_v53  ;;  %v2135_v7 = vmax.f32 %v8121_v9, 0.0  ;;  %v2174_v35 = vmax.f32 %v8012_v44, %v2142_v1  ;;  %v9976_v9 = vld [vmem:[#allocation10_spill] sm:$0xff]  ;;  %vm8302_vm4 = vmor %vm2866_vm8, %vm2930_vm7 }
 0x150   : > { %3262 = vmatprep.subr.mxu1 %v2192_v61  ;;  %v8139_v16 = vpop.f32.mrf.mxu0  ;;  %3174 = vmatpush1.msra.mxu0 %v2189_v24  ;;  %v2183_v56 = vmax.f32 %v8024_v63, %v2151_v14  ;;  %v9970_v24 = vld [vmem:[#allocation18_spill] sm:$0xff]  ;;  %vm2929_vm12 = vcmp.eq.s32.totalorder %v9966_v15, %v9971_v27  ;;  %v1503_v52 = vmax.f32 %v8067_v45, 0.0  ;;  %v1502_v28 = vmax.f32 %v8072_v31, 0.0  ;;  %vm8326_vm8 = vmor %vm2868_vm9, %vm2932_vm10 }
 0x151   : > { %v8152_v61 = vpop.f32.mrf.mxu1  ;;  %3263 = vmatpush1.msra.mxu1 %v2191_v0  ;;  %3175 = vmatprep.subr.mxu0 %v2182_v10  ;;  %vm2865_vm11 = vcmp.eq.s32.totalorder %v9966_v15, %v9970_v24  ;;  %v2173_v55 = vmax.f32 %v7996_v30, %v2141_v32  ;;  %v2176_v44 = vmax.f32 %v8016_v23, %v2144_v62  ;;  %v9972_v0 = vld [vmem:[#allocation20_spill] sm:$0xff]  ;;  %v1504_v41 = vmax.f32 %v8076_v25, 0.0  ;;  %v9974_v23 = vld [vmem:[#allocation5_spill] sm:$0xff] }
 0x152   : > { %3264 = vmatprep.subr.mxu1 %v2184_v37  ;;  %v8162_v63 = vpop.f32.mrf.mxu0  ;;  %3176 = vmatpush1.msra.mxu0 %v2181_v17  ;;  %vm2867_vm13 = vcmp.eq.s32.totalorder %v9966_v15, %v9972_v0  ;;  %vm2931_vm15 = vcmp.eq.s32.totalorder %v9966_v15, %v9973_v40  ;;  %v1509_v45 = vmax.f32 %v8080_v8, 0.0  ;;  %v2166_v31 = vmax.f32 %v7980_v38, %v2134_v47  ;;  %v9975_v8 = vld [vmem:[#allocation8_spill] sm:$0xff]  ;;  %v8352_v62 = vld [vmem:[%s9828_s1 + $0x50] sm:$0xff]  ;;  %vm8360_vm9 = vmor %vm2865_vm11, %vm2929_vm12 }
 0x153   : > { %v2175_v30 = vmax.f32 %v8008_v36, %v2143_v29  ;;  %v8172_v21 = vpop.f32.mrf.mxu1  ;;  %3265 = vmatpush1.msra.mxu1 %v2183_v56  ;;  %3177 = vmatprep.subr.mxu0 %v2174_v35  ;;  %vm2858_vm0 = vcmp.eq.s32.totalorder %v9974_v23, %v9965_v18  ;;  %vm2922_vm1 = vcmp.eq.s32.totalorder %v9974_v23, %v9967_v51  ;;  %v1510_v2 = vmax.f32 %v8088_v33, 0.0  ;;  %v9980_v29 = vld [vmem:[#allocation46_spill] sm:$0xff]  ;;  %vm8393_vm11 = vmor %vm2867_vm13, %vm2931_vm15 }
 0x154   : > { %v8181_v25 = vadd.f32 %v7877_v12, %v7620_v26  ;;  %v2165_v38 = vmax.f32 %v9975_v8, %v2133_v13  ;;  %v2168_v36 = vmax.f32 %v7988_v19, %v2136_v39  ;;  %3266 = vmatprep.subr.mxu1 %v2176_v44  ;;  %v2035_v46 = vpop.f32.mrf.mxu0  ;;  %3178 = vmatpush1.msra.mxu0 %v2173_v55  ;;  %v1511_v12 = vmax.f32 %v8084_v48, 0.0  ;;  %v9978_v48 = vld [vmem:[#allocation45_spill] sm:$0xff]  ;;  %v9982_v39 = vld [vmem:[#allocation47_spill] sm:$0xff]  ;;  %vm8415_vm13 = vmor %vm2858_vm0, %vm2922_vm1 }
 0x155   : > { %vm2924_vm3 = vcmp.eq.s32.totalorder %v9974_v23, %v9969_v3  ;;  %v1512_v19 = vmax.f32 %v8147_v42, 0.0  ;;  %v2167_v1 = vmax.f32 %v9976_v9, %v2135_v7  ;;  %v2124_v14 = vpop.f32.mrf.mxu1  ;;  %3267 = vmatpush1.msra.mxu1 %v2175_v30  ;;  %3179 = vmatprep.subr.mxu0 %v2166_v31  ;;  %v9977_v32 = vmax.f32 %v8036_v34, 0.0  ;;  %v9984_v7 = vld [vmem:[#allocation48_spill] sm:$0xff]  ;;  %v9988_v30 = vld [vmem:[#allocation15_spill] sm:$0xff]  ;;  %v9989_v8 = vld [vmem:[#allocation17_spill] sm:$0xff] }
 0x156   : > { %v9979_v47 = vmax.f32 %v9978_v48, 0.0  ;;  %v9981_v10 = vmax.f32 %v9980_v29, 0.0  ;;  %v9983_v17 = vmax.f32 %v9982_v39, 0.0  ;;  %3268 = vmatprep.subr.mxu1 %v2168_v36  ;;  %v2039_v42 = vpop.f32.mrf.mxu0  ;;  %3180 = vmatpush1.msra.mxu0 %v2165_v38  ;;  %v9985_v35 = vmax.f32 %v9984_v7, 0.0  ;;  %v8259_v48 = vld [vmem:[%s9828_s1 + $0x48] sm:$0xff]  ;;  %v9996_v39 = vld [vmem:[#allocation51_spill] sm:$0xff] }
 0x157   : > { %v2128_v31 = vpop.f32.mrf.mxu1  ;;  %3269 = vmatpush1.msra.mxu1 %v2167_v1  ;;  %5549 = vmatmul.mubr.msk.f32.vlgmr.msra.gmra.mxu0 %vm9888_vm14, %v8188_v11  ;;  %v8245_v38 = vadd.f32 %v2035_v46, %v7721_v59  ;;  %v8248_v36 = vadd.f32 %v2124_v14, %v7721_v59  ;;  %v9993_v46 = vld [vmem:[#allocation23_spill] sm:$0xff]  ;;  %v9994_v14 = vld [vmem:[#allocation50_spill] sm:$0xff]  ;;  %v9998_v7 = vld [vmem:[#allocation52_spill] sm:$0xff]  ;;  %vm10018_vm0 = vcmp.eq.s32.totalorder %v9974_v23, %v9968_v58 }
 0x158   : > { %v8207_v33 = vmax.f32 %v9979_v47, %v9977_v32  ;;  %v8211_v13 = vmax.f32 %v9981_v10, %v1503_v52  ;;  %v8215_v37 = vmax.f32 %v9983_v17, %v1502_v28  ;;  %v8224_v56 = vmax.f32 %v9985_v35, %v1504_v41  ;;  %v9986_v52 = vld [vmem:[#allocation49_spill] sm:$0xff]  ;;  %v9990_v41 = vld [vmem:[#allocation6_spill] sm:$0xff]  ;;  %5553 = vmatmul.mubr.msk.f32.vlgmr.msra.gmra.mxu1 %vm9888_vm14, %v8188_v11  ;;  %v2041_v1 = vpop.f32.mrf.mxu0  ;;  %vm8439_vm1 = vmor %vm10018_vm0, %vm2924_vm3 }
 0x159   : > { %v9987_v55 = vmax.f32 %v9986_v52, 0.0  ;;  %v8231_v28 = vadd.f32 %v2039_v42, %v7640_v53  ;;  %v8251_v9 = vadd.f32 %v2128_v31, %v7640_v53  ;;  %v9991_v32 = vmov 0.0   ;;  %v9992_v47 = vld [vmem:[#allocation21_spill] sm:$0xff]  ;;  %v2130_v31 = vpop.f32.mrf.mxu1 }
 0x15a   : > { %3219 = vmatprep.mubr.f32.mxu0 %v9991_v32  ;;  %v9995_v29 = vmax.f32 %v9994_v14, 0.0  ;;  %v9997_v17 = vmax.f32 %v9996_v39, 0.0  ;;  %v9999_v35 = vmax.f32 %v9998_v7, 0.0  ;;  %3308 = vmatprep.mubr.f32.mxu1 %v9991_v32  ;;  %v8294_v14 = vpop.f32.mrf.mxu0  ;;  %vm10022_vm3 = vcmp.eq.s32.totalorder %v9974_v23, %v9971_v27  ;;  %v10046_v7 = vld [vmem:[#allocation54_spill] sm:$0xff] }
 0x15b   : > { %v8228_v44 = vmax.f32 %v9987_v55, %v1509_v45  ;;  %v2042_v55 = vadd.f32 %v2041_v1, %v7640_v53  ;;  %v2131_v1 = vadd.f32 %v2130_v31, %v7640_v53  ;;  %10000 = vst [vmem:[#allocation12_spill] sm:$0xff] %v8294_v14  ;;  %5550 = vmatmul.mubr.msk.f32.gmra.mxu0 %vm9888_vm14, %v8259_v48 }
 0x15c   : > { %v1543_v10 = vmax.f32 %v9995_v29, %v1511_v12  ;;  %v1542_v42 = vmax.f32 %v9997_v17, %v1510_v2  ;;  %v1544_v52 = vmax.f32 %v9999_v35, %v1512_v19  ;;  %v8283_v12 = vadd.f32 %v8108_v49, %v7636_v43  ;;  %v8316_v17 = vpop.f32.mrf.mxu1  ;;  %5554 = vmatmul.mubr.msk.f32.gmra.mxu1 %vm9888_vm14, %v8259_v48  ;;  %v8346_v31 = vpop.f32.mrf.mxu0 }
 0x15d   : > { %v8287_v2 = vadd.f32 %v8162_v63, %v7721_v59  ;;  %v8291_v19 = vadd.f32 %v8172_v21, %v7721_v59  ;;  %v8312_v63 = vadd.f32 %v8139_v16, %v7620_v26  ;;  %v2161_v21 = vmax.f32 %v8231_v28, 0.0  ;;  %10003 = vst [vmem:[#allocation4_spill] sm:$0xff] %v8316_v17  ;;  %v10006_v16 = vld [vmem:[#allocation3_spill] sm:$0xff]  ;;  %10007 = vst [vmem:[#allocation13_spill] sm:$0xff] %v8346_v31 }
 0x15e   : > { %v2163_v29 = vmax.f32 %v8251_v9, 0.0  ;;  %v2162_v39 = vmax.f32 %v2042_v55, 0.0  ;;  %v8340_v28 = vadd.f32 %v8152_v61, %v7620_v26  ;;  %v2154_v9 = vmax.f32 %v8245_v38, 0.0  ;;  %3225 = vmatprep.mubr.f32.mxu0 %v9991_v32  ;;  %v8384_v45 = vpop.f32.mrf.mxu1  ;;  %3314 = vmatprep.mubr.f32.mxu1 %v9991_v32  ;;  %v8407_v34 = vpop.f32.mrf.mxu0 }
 0x15f   : > { %v2156_v35 = vmax.f32 %v8248_v36, 0.0  ;;  %v2164_v55 = vmax.f32 %v2131_v1, 0.0  ;;  %v8374_v38 = vadd.f32 %v8117_v54, %v7636_v43  ;;  %v8378_v36 = vadd.f32 %v8125_v50, %v7620_v26  ;;  %10010 = vst [vmem:[#allocation14_spill] sm:$0xff] %v8384_v45  ;;  %10013 = vst [vmem:[#allocation16_spill] sm:$0xff] %v8407_v34  ;;  %5551 = vmatmul.mubr.msk.f32.gmra.mxu0 %vm9888_vm14, %v8352_v62  ;;  %v10066_v54 = vld [vmem:[#allocation39_spill] sm:$0xff] }
 0x160   : > { %v8382_v1 = vadd.f32 %v8129_v20, %v7620_v26  ;;  %v2194_v6 = vmax.f32 %v1542_v42, %v2162_v39  ;;  %v8403_v20 = vadd.f32 %v8123_v22, %v7636_v43  ;;  %v2153_v50 = vmax.f32 %v8287_v2, 0.0  ;;  %v8429_v14 = vpop.f32.mrf.mxu1  ;;  %5555 = vmatmul.mubr.msk.f32.gmra.mxu1 %vm9888_vm14, %v8352_v62  ;;  %3231 = vmatprep.mubr.f32.mxu0 %v9991_v32 }
 0x161   : > { %v2155_v42 = vmax.f32 %v8291_v19, 0.0  ;;  %v2196_v39 = vmax.f32 %v1544_v52, %v2164_v55  ;;  %v1495_v22 = vmax.f32 %v8059_v5, 0.0  ;;  %v10016_v52 = vld [vmem:[#allocation35_spill] sm:$0xff]  ;;  %v2193_v19 = vmax.f32 %v8228_v44, %v2161_v21  ;;  %10017 = vst [vmem:[#allocation18_spill] sm:$0xff] %v8429_v14  ;;  %v10021_v44 = vld [vmem:[#allocation24_spill] sm:$0xff]  ;;  %3320 = vmatprep.mubr.f32.mxu1 %v9991_v32 }
 0x162   : > { %v8426_v2 = vadd.f32 %v10016_v52, %v7636_v43  ;;  %v2195_v55 = vmax.f32 %v1543_v10, %v2163_v29  ;;  %3351 = vmatprep.subr.mxu0 %v2194_v6  ;;  %v2146_v6 = vmax.f32 %v8312_v63, 0.0  ;;  %v2148_v10 = vmax.f32 %v8340_v28, 0.0  ;;  %v10108_v52 = vld [vmem:[#allocation26_spill] sm:$0xff] }
 0x163   : > { %v2186_v21 = vmax.f32 %v8215_v37, %v2154_v9  ;;  %v2188_v29 = vmax.f32 %v8224_v56, %v2156_v35  ;;  %3440 = vmatprep.subr.mxu1 %v2196_v39  ;;  %vm10023_vm0 = vcmp.eq.s32.totalorder %v9974_v23, %v9970_v24  ;;  %v10026_v37 = vmax.f32 %v8063_v57, 0.0  ;;  %v10027_v56 = vld [vmem:[#allocation43_spill] sm:$0xff]  ;;  %v10030_v35 = vld [vmem:[#allocation44_spill] sm:$0xff]  ;;  %3352 = vmatpush1.msra.mxu0 %v2193_v19  ;;  %v8493_v19 = vpop.f32.mrf.mxu0  ;;  %v10109_v57 = vld [vmem:[#allocation37_spill] sm:$0xff] }
 0x164   : > { %vm8461_vm12 = vmor %vm10023_vm0, %vm10022_vm3  ;;  %v10028_v63 = vmax.f32 %v10027_v56, 0.0  ;;  %v10029_v9 = vmax.f32 %v8181_v25, 0.0  ;;  %v10031_v39 = vmax.f32 %v10030_v35, 0.0  ;;  %v2145_v31 = vmax.f32 %v8378_v36, 0.0  ;;  %3441 = vmatpush1.msra.mxu1 %v2195_v55  ;;  %v8495_v55 = vpop.f32.mrf.mxu1  ;;  %v8500_v56 = vld [vmem:[%s9828_s1 + $0x58] sm:$0xff] }
 0x165   : > { %v2147_v43 = vmax.f32 %v8382_v1, 0.0  ;;  %vm10032_vm3 = vcmp.eq.s32.totalorder %v9974_v23, %v9973_v40  ;;  %vm10033_vm0 = vcmp.eq.s32.totalorder %v9974_v23, %v9972_v0  ;;  %v2138_v25 = vmax.f32 %v8374_v38, 0.0  ;;  %3353 = vmatprep.subr.mxu0 %v2186_v21  ;;  %3442 = vmatprep.subr.mxu1 %v2188_v29  ;;  %v10051_v29 = vld [vmem:[#allocation41_spill] sm:$0xff]  ;;  %v10053_v35 = vld [vmem:[#allocation42_spill] sm:$0xff] }
 0x166   : > { %v1526_v28 = vmax.f32 %v10028_v63, %v10026_v37  ;;  %v1528_v45 = vmax.f32 %v10031_v39, %v10029_v9  ;;  %vm8485_vm15 = vmor %vm10033_vm0, %vm10032_vm3  ;;  %v2140_v37 = vmax.f32 %v8403_v20, 0.0  ;;  %v2185_v36 = vmax.f32 %v8207_v33, %v2153_v50  ;;  %v10048_v20 = vld [vmem:[#allocation34_spill] sm:$0xff] }
 0x167   : > { %v2187_v1 = vmax.f32 %v8211_v13, %v2155_v42  ;;  %vm10036_vm3 = vcmp.eq.s32.totalorder %v9966_v15, %v9988_v30  ;;  %vm10039_vm5 = vcmp.eq.s32.totalorder %v9966_v15, %v9989_v8  ;;  %v10040_v13 = vmov 0 }
 0x168   : > { %vm8507_vm0 = vmor %vm8302_vm4, %vm10036_vm3  ;;  %vm10042_vm2 = vcmp.eq.s32.totalorder %v9990_v41, %v9967_v51  ;;  %vm10043_vm10 = vcmp.eq.s32.totalorder %v9990_v41, %v9965_v18  ;;  %v10047_v38 = vmax.f32 %v10046_v7, 0.0  ;;  %v10049_v50 = vmax.f32 %v10048_v20, 0.0  ;;  %3354 = vmatpush1.msra.mxu0 %v2185_v36 }
 0x169   : > { %vm8516_vm6 = vmor %vm8326_vm8, %vm10039_vm5  ;;  %v10050_v21 = vmax.f32 %v8055_v4, 0.0  ;;  %v10052_v63 = vmax.f32 %v10051_v29, 0.0  ;;  %v10054_v39 = vmax.f32 %v10053_v35, 0.0  ;;  %v2137_v34 = vmax.f32 %v8283_v12, 0.0  ;;  %3443 = vmatpush1.msra.mxu1 %v2187_v1  ;;  %v10074_v35 = vld [vmem:[#allocation32_spill] sm:$0xff] }
 0x16a   : > { %v10041_v13 = vsel %vm8516_vm6, 4294967295, %v10040_v13  ;;  %vm8526_vm7 = vmor %vm10043_vm10, %vm10042_vm2  ;;  %v1518_v42 = vmax.f32 %v10049_v50, %v10047_v38  ;;  %vm10055_vm2 = vcmp.eq.s32.totalorder %v9966_v15, %v9992_v47  ;;  %v10056_v7 = vmov 0  ;;  %v10135_v12 = vld [vmem:[#allocation40_spill] sm:$0xff] }
 0x16b   : > { %v1525_v9 = vmax.f32 %v10052_v63, %v10050_v21  ;;  %v1527_v14 = vmax.f32 %v10054_v39, %v1495_v22  ;;  %vm8552_vm5 = vmor %vm8360_vm9, %vm10055_vm2  ;;  %vm10058_vm8 = vcmp.eq.s32.totalorder %v9966_v15, %v9993_v46  ;;  %v10059_v4 = vmov 0 }
 0x16c   : > { %v10057_v7 = vsel %vm8552_vm5, 4294967295, %v10056_v7  ;;  %vm8561_vm10 = vmor %vm8393_vm11, %vm10058_vm8  ;;  %vm10061_vm3 = vcmp.eq.s32.totalorder %v9990_v41, %v9969_v3  ;;  %vm10062_vm4 = vcmp.eq.s32.totalorder %v9990_v41, %v9968_v58  ;;  %v10065_v61 = vmax.f32 %v8051_v60, 0.0  ;;  %v10072_v60 = vld [vmem:[#allocation11_spill] sm:$0xff] }
 0x16d   : > { %v10060_v4 = vsel %vm8561_vm10, 4294967295, %v10059_v4  ;;  %vm8571_vm14 = vmor %vm10062_vm4, %vm10061_vm3  ;;  %v10067_v22 = vmax.f32 %v10066_v54, 0.0  ;;  %v2139_v20 = vmax.f32 %v8426_v2, 0.0  ;;  %v2178_v50 = vmax.f32 %v1526_v28, %v2146_v6 }
 0x16e   : > { %v2180_v21 = vmax.f32 %v1528_v45, %v2148_v10  ;;  %vm10068_vm11 = vcmp.eq.s32.totalorder %v9990_v41, %v9971_v27  ;;  %vm10069_vm4 = vcmp.eq.s32.totalorder %v9990_v41, %v9970_v24  ;;  %v10073_v63 = vmax.f32 %v10072_v60, 0.0  ;;  %v10082_v10 = vld [vmem:[#allocation30_spill] sm:$0xff]  ;;  %v8619_v60 = vpop.f32.mrf.mxu1 }
 0x16f   : > { %v1520_v38 = vmax.f32 %v10067_v22, %v10065_v61  ;;  %vm8590_vm3 = vmor %vm10069_vm4, %vm10068_vm11  ;;  %v10075_v39 = vmax.f32 %v10074_v35, 0.0  ;;  %v2177_v2 = vmax.f32 %v1525_v9, %v2145_v31  ;;  %v2179_v6 = vmax.f32 %v1527_v14, %v2147_v43  ;;  %v10083_v31 = vld [vmem:[#allocation53_spill] sm:$0xff]  ;;  %v8617_v22 = vpop.f32.mrf.mxu0  ;;  %3355 = vmatprep.subr.mxu0 %v2178_v50  ;;  %v10115_v50 = vld [vmem:[#allocation7_spill] sm:$0xff] }
 0x170   : > { %vm10076_vm8 = vcmask 261120   ;;  %vm10078_vm9 = vcmp.eq.s32.totalorder %v9990_v41, %v9973_v40  ;;  %vm10079_vm11 = vcmp.eq.s32.totalorder %v9990_v41, %v9972_v0  ;;  %v2973_v28 = vadd.s32 16, %v10082_v10  ;;  %v10085_v14 = vld [vmem:[#allocation33_spill] sm:$0xff]  ;;  %3444 = vmatprep.subr.mxu1 %v2180_v21  ;;  %v10134_v10 = vld [vmem:[#allocation38_spill] sm:$0xff] }
 0x171   : > { %v1517_v61 = vmax.f32 %v10075_v39, %v10073_v63  ;;  %5552 = vmatmul.mubr.msk.f32.gmra.mxu0 %vm10076_vm8, %v8500_v56  ;;  %vm10077_vm2 = vmmov %vm10076_vm8  ;;  %v10084_v43 = vmax.f32 %v10083_v31, 0.0  ;;  %v10086_v36 = vmax.f32 %v10085_v14, 0.0  ;;  %v2170_v9 = vmax.f32 %v1518_v42, %v2138_v25  ;;  %3445 = vmatpush1.msra.mxu1 %v2179_v6  ;;  %v10116_v21 = vld [vmem:[#allocation29_spill] sm:$0xff]  ;;  %v10133_v6 = vld [vmem:[#allocation27_spill] sm:$0xff] }
 0x172   : > { %5556 = vmatmul.mubr.msk.f32.gmra.mxu1 %vm10077_vm2, %v8500_v56  ;;  %vm8608_vm4 = vmor %vm10079_vm11, %vm10078_vm9  ;;  %v2172_v54 = vmax.f32 %v1520_v38, %v2140_v37  ;;  %vm10087_vm9 = vcmp.eq.s32.totalorder %v9974_v23, %v9988_v30  ;;  %v10088_v63 = vmov 0  ;;  %vm10090_vm8 = vcmp.eq.s32.totalorder %v9974_v23, %v9989_v8  ;;  %3356 = vmatpush1.msra.mxu0 %v2177_v2  ;;  %v8718_v2 = vpop.f32.mrf.mxu1  ;;  %v9312_v31 = vld [vmem:[%s9828_s1 + $0x38] sm:$0xff] }
 0x173   : > { %v1519_v1 = vmax.f32 %v10086_v36, %v10084_v43  ;;  %vm8626_vm2 = vmor %vm8415_vm13, %vm10087_vm9  ;;  %v10091_v25 = vmov 0  ;;  %vm10093_vm10 = vcmp.eq.s32.totalorder %v10006_v16, %v9967_v51  ;;  %vm10094_vm5 = vcmp.eq.s32.totalorder %v10006_v16, %v9965_v18  ;;  %3357 = vmatprep.subr.mxu0 %v2170_v9  ;;  %3391 = vmatprep.mubr.f32.mxu0 %v9991_v32 }
 0x174   : > { %v10089_v63 = vsel %vm8626_vm2, 4294967295, %v10088_v63  ;;  %vm8635_vm11 = vmor %vm8439_vm1, %vm10090_vm8  ;;  %v2169_v37 = vmax.f32 %v1517_v61, %v2137_v34  ;;  %vm10097_vm13 = vcmp.eq.s32.totalorder %v9974_v23, %v9992_v47  ;;  %v10098_v5 = vmov 0  ;;  %v10107_v34 = vld [vmem:[#allocation25_spill] sm:$0xff]  ;;  %3446 = vmatprep.subr.mxu1 %v2172_v54  ;;  %v8716_v61 = vpop.f32.mrf.mxu0  ;;  %3480 = vmatprep.mubr.f32.mxu1 %v9991_v32 }
 0x175   : > { %v10092_v25 = vsel %vm8635_vm11, 4294967295, %v10091_v25  ;;  %vm8645_vm6 = vmor %vm10094_vm5, %vm10093_vm10  ;;  %vm10100_vm9 = vcmp.eq.s32.totalorder %v9974_v23, %v9993_v46  ;;  %v10101_v18 = vmov 0  ;;  %vm10103_vm10 = vcmp.eq.s32.totalorder %v10006_v16, %v9969_v3  ;;  %v10114_v3 = vld [vmem:[#allocation28_spill] sm:$0xff] }
 0x176   : > { %vm8654_vm1 = vmor %vm8461_vm12, %vm10097_vm13  ;;  %vm10104_vm8 = vcmp.eq.s32.totalorder %v10006_v16, %v9968_v58  ;;  %v2975_v42 = vadd.s32 16, %v10109_v57  ;;  %v2171_v38 = vmax.f32 %v1519_v1, %v2139_v20  ;;  %v8696_v35 = vrot.slane %v10116_v21, %v10115_v50  ;;  %3358 = vmatpush1.msra.mxu0 %v2169_v37  ;;  %v10122_v20 = vld [vmem:[#allocation36_spill] sm:$0xff] }
 0x177   : > { %v10099_v5 = vsel %vm8654_vm1, 4294967295, %v10098_v5  ;;  %vm8663_vm5 = vmor %vm8485_vm15, %vm10100_vm9  ;;  %vm10110_vm15 = vcmp.eq.s32.totalorder %v10006_v16, %v9971_v27  ;;  %vm10111_vm9 = vcmp.eq.s32.totalorder %v10006_v16, %v9970_v24  ;;  %vm10117_vm13 = vcmp.eq.s32.totalorder %v10006_v16, %v9973_v40  ;;  %v10121_v27 = vld [vmem:[#allocation31_spill] sm:$0xff] }
 0x178   : > { %v10102_v18 = vsel %vm8663_vm5, 4294967295, %v10101_v18  ;;  %vm8673_vm11 = vmor %vm10104_vm8, %vm10103_vm10  ;;  %vm10118_vm12 = vcmp.eq.s32.totalorder %v10006_v16, %v9972_v0  ;;  %v8714_v39 = vrot.slane %v2973_v28, %v10115_v50  ;;  %3447 = vmatpush1.msra.mxu1 %v2171_v38  ;;  %v10127_v40 = vmov 0 }
 0x179   : > { %vm8688_vm10 = vmor %vm10111_vm9, %vm10110_vm15  ;;  %vm10126_vm9 = vcmp.eq.s32.totalorder %v9990_v41, %v9989_v8  ;;  %vm10129_vm5 = vcmp.eq.s32.totalorder %v9966_v15, %v10107_v34  ;;  %vm10130_vm1 = vcmp.eq.s32.totalorder %v9966_v15, %v10021_v44  ;;  %v8788_v29 = vrot.slane %v2975_v42, %v10115_v50 }
 0x17a   : > { %vm8705_vm15 = vmor %vm10118_vm12, %vm10117_vm13  ;;  %vm10123_vm12 = vcmp.eq.s32.totalorder %v9990_v41, %v9988_v30  ;;  %v10152_v43 = vmov 1.0   ;;  %v10155_v14 = vmov 0  ;;  %v10158_v33 = vmov 0 }
 0x17b   : > { %vm8726_vm13 = vmor %vm8526_vm7, %vm10123_vm12  ;;  %vm10141_vm7 = vcmp.eq.s32.totalorder %v9990_v41, %v9993_v46  ;;  %5565 = vmatprep.subr.msk.mxu0 %vm8507_vm0, %v10152_v43  ;;  %v10167_v36 = vmov 0  ;;  %v10232_v38 = vmov 0  ;;  %v10250_v24 = vmov 0 }
 0x17c   : > { %vm8735_vm8 = vmor %vm8571_vm14, %vm10126_vm9  ;;  %vm10136_vm9 = vcmask 261120  }
 0x17d   : > { %v10128_v40 = vsel %vm8735_vm8, 4294967295, %v10127_v40  ;;  %vm8745_vm2 = vmor %vm10130_vm1, %vm10129_vm5  ;;  %5557 = vmatmul.mubr.msk.f32.vlgmr.msra.gmra.mxu0 %vm10136_vm9, %v8188_v11  ;;  %vm10138_vm1 = vcmp.eq.s32.totalorder %v9990_v41, %v9992_v47 }
 0x17e   : > { %vm10137_vm8 = vmmov %vm10136_vm9  ;;  %vm10145_vm9 = vcmp.eq.s32.totalorder %v9966_v15, %v10108_v52  ;;  %3397 = vmatprep.mubr.f32.mxu0 %v9991_v32 }
 0x17f   : > { %5561 = vmatmul.mubr.msk.f32.vlgmr.msra.gmra.mxu1 %vm10137_vm8, %v8188_v11  ;;  %vm8764_vm5 = vmor %vm8590_vm3, %vm10138_vm1  ;;  %vm10144_vm8 = vcmp.eq.s32.totalorder %v9966_v15, %v10114_v3  ;;  %vm10148_vm1 = vcmp.eq.s32.totalorder %v9966_v15, %v10122_v20  ;;  %vm10157_vm3 = vcmp.eq.s32.totalorder %v10006_v16, %v9989_v8  ;;  %v8852_v8 = vpop.f32.mrf.mxu0 }
 0x180   : > { %vm8773_vm12 = vmor %vm8608_vm4, %vm10141_vm7  ;;  %3486 = vmatprep.mubr.f32.mxu1 %v9991_v32  ;;  %vm10153_vm7 = vnez %v10041_v13  ;;  %v8854_v13 = vpop.f32.mrf.mxu1  ;;  %v2506_v45 = vadd.f32 %v8852_v8, %v7640_v53  ;;  %v2589_v8 = vadd.f32 %v8619_v60, %v7721_v59 }
 0x181   : > { %vm8783_vm14 = vmor %vm10145_vm9, %vm10144_vm8  ;;  %vm10149_vm8 = vcmp.eq.s32.totalorder %v9966_v15, %v10121_v27  ;;  %5577 = vmatprep.subr.msk.mxu1 %vm10153_vm7, %v10152_v43  ;;  %vm10160_vm7 = vcmp.eq.s32.totalorder %v9966_v15, %v10135_v12  ;;  %v8970_v54 = vpop.f32.mrf.mxu0 }
 0x182   : > { %vm8804_vm9 = vmor %vm10149_vm8, %vm10148_vm1  ;;  %vm10154_vm1 = vcmp.eq.s32.totalorder %v10006_v16, %v9988_v30  ;;  %v2500_v30 = vadd.f32 %v8617_v22, %v7721_v59  ;;  %v10275_v22 = vld [vmem:[#allocation16_spill] sm:$0xff]  ;;  %v2795_v9 = vmax.f32 %v2589_v8, 0.0 }
 0x183   : > { %vm8823_vm8 = vmor %vm8645_vm6, %vm10154_vm1  ;;  %vm10161_vm6 = vcmp.eq.s32.totalorder %v9966_v15, %v10134_v10  ;;  %v9080_v57 = vpop.f32.mrf.mxu0  ;;  %v2494_v60 = vadd.f32 %v10275_v22, %v7620_v26 }
 0x184   : > { %v10156_v14 = vsel %vm8823_vm8, 4294967295, %v10155_v14  ;;  %vm8832_vm4 = vmor %vm8673_vm11, %vm10157_vm3  ;;  %vm10164_vm3 = vnez %v10057_v7  ;;  %vm10169_vm8 = vcmp.eq.s32.totalorder %v10006_v16, %v9993_v46  ;;  %v10170_v7 = vmov 0 }
 0x185   : > { %v10159_v33 = vsel %vm8832_vm4, 4294967295, %v10158_v33  ;;  %vm8844_vm1 = vmor %vm10161_vm6, %vm10160_vm7  ;;  %5566 = vmatpush1.msk.msra.mxu0 %vm10164_vm3, %v10152_v43  ;;  %vm10165_vm7 = vnez %v10060_v4  ;;  %vm10166_vm6 = vcmp.eq.s32.totalorder %v10006_v16, %v9992_v47  ;;  %vm10172_vm3 = vcmp.eq.s32.totalorder %v9974_v23, %v10107_v34  ;;  %v9163_v50 = vpop.f32.mrf.mxu0 }
 0x186   : > { %5578 = vmatpush1.msk.msra.mxu1 %vm10165_vm7, %v10152_v43  ;;  %vm8867_vm0 = vmor %vm8688_vm10, %vm10166_vm6  ;;  %vm10173_vm7 = vcmp.eq.s32.totalorder %v9974_v23, %v10021_v44  ;;  %vm10179_vm10 = vcmp.eq.s32.totalorder %v9974_v23, %v10108_v52  ;;  %v10186_v4 = vmov 0  ;;  %vm10193_vm6 = vnez %v10092_v25 }
 0x187   : > { %v10168_v36 = vsel %vm8867_vm0, 4294967295, %v10167_v36  ;;  %vm8876_vm11 = vmor %vm8705_vm15, %vm10169_vm8  ;;  %vm10176_vm8 = vcmask 261120   ;;  %5579 = vmatprep.subr.msk.mxu1 %vm10193_vm6, %v10152_v43  ;;  %vm10195_vm15 = vcmp.eq.s32.totalorder %v9974_v23, %v10134_v10  ;;  %vm10198_vm6 = vnez %v10099_v5  ;;  %v10280_v5 = vld [vmem:[#allocation12_spill] sm:$0xff] }
 0x188   : > { %v10171_v7 = vsel %vm8876_vm11, 4294967295, %v10170_v7  ;;  %vm8886_vm4 = vmor %vm10173_vm7, %vm10172_vm3  ;;  %5558 = vmatmul.mubr.msk.f32.gmra.mxu0 %vm10176_vm8, %v8259_v48  ;;  %vm10178_vm7 = vcmp.eq.s32.totalorder %v9974_v23, %v10114_v3  ;;  %v10201_v25 = vmov 0  ;;  %v2785_v58 = vmax.f32 %v2494_v60, 0.0 }
 0x189   : > { %vm10177_vm11 = vmmov %vm10176_vm8  ;;  %3403 = vmatprep.mubr.f32.mxu0 %v9991_v32  ;;  %vm10188_vm8 = vcmp.eq.s32.totalorder %v9974_v23, %v10122_v20 }
 0x18a   : > { %5562 = vmatmul.mubr.msk.f32.gmra.mxu1 %vm10177_vm11, %v8259_v48  ;;  %vm8908_vm0 = vmor %vm10179_vm10, %vm10178_vm7  ;;  %vm10182_vm11 = vcmp.eq.s32.totalorder %v9966_v15, %v10133_v6  ;;  %vm10185_vm10 = vcmp.eq.s32.totalorder %v9966_v15, %v8696_v35 }
 0x18b   : > { %3492 = vmatprep.mubr.f32.mxu1 %v9991_v32  ;;  %vm8923_vm3 = vmor %vm8745_vm2, %vm10182_vm11  ;;  %vm10189_vm2 = vcmp.eq.s32.totalorder %v9974_v23, %v10121_v27 }
 0x18c   : > { %vm8932_vm7 = vmor %vm8783_vm14, %vm10185_vm10  ;;  %vm10192_vm10 = vnez %v10089_v63  ;;  %v8972_v63 = vpop.f32.mrf.mxu1 }
 0x18d   : > { %v10187_v4 = vsel %vm8932_vm7, 4294967295, %v10186_v4  ;;  %vm8944_vm11 = vmor %vm10189_vm2, %vm10188_vm8  ;;  %5567 = vmatprep.subr.msk.mxu0 %vm10192_vm10, %v10152_v43  ;;  %vm10194_vm2 = vcmp.eq.s32.totalorder %v9974_v23, %v10135_v12  ;;  %vm10199_vm10 = vnez %v10102_v18  ;;  %vm10200_vm8 = vcmp.eq.s32.totalorder %v9966_v15, %v8714_v39  ;;  %v10281_v18 = vld [vmem:[#allocation4_spill] sm:$0xff] }
 0x18e   : > { %vm8966_vm7 = vmor %vm10195_vm15, %vm10194_vm2  ;;  %5568 = vmatpush1.msk.msra.mxu0 %vm10198_vm6, %v10152_v43  ;;  %5580 = vmatpush1.msk.msra.mxu1 %vm10199_vm10, %v10152_v43  ;;  %vm10203_vm2 = vcmp.eq.s32.totalorder %v9966_v15, %v8788_v29  ;;  %vm10206_vm10 = vcmp.eq.s32.totalorder %v9990_v41, %v10107_v34  ;;  %v10213_v15 = vmov 0  ;;  %v9082_v42 = vpop.f32.mrf.mxu1 }
 0x18f   : > { %vm8985_vm15 = vmor %vm8804_vm9, %vm10200_vm8  ;;  %vm10207_vm9 = vcmp.eq.s32.totalorder %v9990_v41, %v10021_v44  ;;  %5569 = vmatprep.subr.msk.mxu0 %vm8726_vm13, %v10152_v43 }
 0x190   : > { %v10202_v25 = vsel %vm8985_vm15, 4294967295, %v10201_v25  ;;  %vm8994_vm14 = vmor %vm8844_vm1, %vm10203_vm2  ;;  %vm10210_vm15 = vcmask 261120   ;;  %vm10212_vm2 = vcmp.eq.s32.totalorder %v9974_v23, %v10133_v6  ;;  %5570 = vmatpush1.msk.msra.mxu0 %vm8764_vm5, %v10152_v43  ;;  %vm2910_vm5 = vcmp.eq.s32.totalorder %v10006_v16, %v10107_v34  ;;  %v9165_v21 = vpop.f32.mrf.mxu1 }
 0x191   : > { %vm9006_vm8 = vmor %vm10207_vm9, %vm10206_vm10  ;;  %5559 = vmatmul.mubr.msk.f32.gmra.mxu0 %vm10210_vm15, %v8352_v62  ;;  %vm10215_vm10 = vcmp.eq.s32.totalorder %v9974_v23, %v8696_v35 }
 0x192   : > { %vm10211_vm1 = vmmov %vm10210_vm15  ;;  %vm3022_vm15 = vcmp.eq.s32.totalorder %v9990_v41, %v10133_v6  ;;  %3409 = vmatprep.mubr.f32.mxu0 %v9991_v32 }
 0x193   : > { %5563 = vmatmul.mubr.msk.f32.gmra.mxu1 %vm10211_vm1, %v8352_v62  ;;  %vm9019_vm6 = vmor %vm8886_vm4, %vm10212_vm2  ;;  %vm10218_vm1 = vcmp.eq.s32.totalorder %v9990_v41, %v10114_v3  ;;  %vm10219_vm4 = vcmp.eq.s32.totalorder %v9990_v41, %v10108_v52 }
 0x194   : > { %v10214_v15 = vsel %vm9019_vm6, 4294967295, %v10213_v15  ;;  %vm9028_vm9 = vmor %vm8908_vm0, %vm10215_vm10  ;;  %3498 = vmatprep.mubr.f32.mxu1 %v9991_v32  ;;  %vm10222_vm0 = vcmp.eq.s32.totalorder %v9974_v23, %v8714_v39  ;;  %vm10225_vm6 = vnez %v10128_v40 }
 0x195   : > { %vm9040_vm2 = vmor %vm10219_vm4, %vm10218_vm1  ;;  %5581 = vmatprep.subr.msk.mxu1 %vm10225_vm6, %v10152_v43  ;;  %vm3021_vm1 = vcmp.eq.s32.totalorder %v9990_v41, %v8714_v39  ;;  %vm10240_vm4 = vnez %v10156_v14  ;;  %v2502_v14 = vadd.f32 %v8716_v61, %v7721_v59 }
 0x196   : > { %vm9053_vm10 = vmor %vm8944_vm11, %vm10222_vm0  ;;  %vm10226_vm11 = vcmp.eq.s32.totalorder %v9974_v23, %v8788_v29  ;;  %5582 = vmatpush1.msk.msra.mxu1 %vm8773_vm12, %v10152_v43  ;;  %vm2846_vm12 = vcmp.eq.s32.totalorder %v10006_v16, %v10021_v44  ;;  %5571 = vmatprep.subr.msk.mxu0 %vm10240_vm4, %v10152_v43  ;;  %vm10246_vm4 = vnez %v10168_v36  ;;  %v2585_v36 = vadd.f32 %v8495_v55, %v7620_v26  ;;  %v10277_v55 = vld [vmem:[#allocation9_spill] sm:$0xff] }
 0x197   : > { %vm9072_vm0 = vmor %vm8966_vm7, %vm10226_vm11  ;;  %vm10231_vm7 = vcmp.eq.s32.totalorder %v9990_v41, %v8696_v35  ;;  %vm10236_vm11 = vcmp.eq.s32.totalorder %v9990_v41, %v10122_v20  ;;  %5572 = vmatpush1.msk.msra.mxu0 %vm10246_vm4, %v10152_v43  ;;  %v2794_v46 = vmax.f32 %v2502_v14, 0.0  ;;  %v2488_v62 = vadd.f32 %v10280_v5, %v10277_v55 }
 0x198   : > { %vm9095_vm13 = vmor %vm9006_vm8, %vm3022_vm15  ;;  %vm10234_vm8 = vcmask 261120   ;;  %5589 = vmatprep.subr.msk.mxu0 %vm8923_vm3, %v10152_v43  ;;  %vm10255_vm3 = vcmask 261120   ;;  %v2577_v51 = vadd.f32 %v10281_v18, %v10277_v55 }
 0x199   : > { %vm9104_vm6 = vmor %vm9040_vm2, %vm10231_vm7  ;;  %5560 = vmatmul.mubr.msk.f32.gmra.mxu0 %vm10234_vm8, %v8500_v56  ;;  %vm10237_vm2 = vcmp.eq.s32.totalorder %v9990_v41, %v10121_v27 }
 0x19a   : > { %v10233_v38 = vsel %vm9104_vm6, 4294967295, %v10232_v38  ;;  %vm10235_vm15 = vmmov %vm10234_vm8  ;;  %vm10241_vm8 = vnez %v10159_v33  ;;  %vm3023_vm6 = vcmp.eq.s32.totalorder %v9990_v41, %v8788_v29  ;;  %3581 = vmatprep.mubr.f32.mxu0 %v9991_v32  ;;  %v2591_v33 = vadd.f32 %v8718_v2, %v7721_v59 }
 0x19b   : > { %5564 = vmatmul.mubr.msk.f32.gmra.mxu1 %vm10235_vm15, %v8500_v56  ;;  %vm9122_vm7 = vmor %vm10237_vm2, %vm10236_vm11  ;;  %5583 = vmatprep.subr.msk.mxu1 %vm10241_vm8, %v10152_v43  ;;  %vm10242_vm15 = vcmp.eq.s32.totalorder %v9990_v41, %v10135_v12  ;;  %vm10243_vm11 = vcmp.eq.s32.totalorder %v9990_v41, %v10134_v10  ;;  %vm10247_vm8 = vnez %v10171_v7  ;;  %v9155_v56 = vld [vmem:[%s9828_s1 + $0x20] sm:$0xff]  ;;  %v2496_v2 = vadd.f32 %v8493_v19, %v7620_v26 }
 0x19c   : > { %vm9140_vm2 = vmor %vm10243_vm11, %vm10242_vm15  ;;  %5584 = vmatpush1.msk.msra.mxu1 %vm10247_vm8, %v10152_v43  ;;  %3670 = vmatprep.mubr.f32.mxu1 %v9991_v32  ;;  %vm10252_vm8 = vnez %v10187_v4  ;;  %vm2909_vm11 = vcmp.eq.s32.totalorder %v10006_v16, %v10122_v20  ;;  %v9229_v20 = vpop.f32.mrf.mxu1  ;;  %v2801_v7 = vmax.f32 %v2506_v45, 0.0  ;;  %v2796_v48 = vmax.f32 %v2591_v33, 0.0  ;;  %v10276_v4 = vld [vmem:[#allocation18_spill] sm:$0xff] }
 0x19d   : > { %vm9157_vm15 = vmor %vm2846_vm12, %vm2910_vm5  ;;  %vm2848_vm12 = vcmp.eq.s32.totalorder %v10006_v16, %v10108_v52  ;;  %vm2912_vm5 = vcmp.eq.s32.totalorder %v10006_v16, %v10114_v3  ;;  %5601 = vmatprep.subr.msk.mxu1 %vm10252_vm8, %v10152_v43  ;;  %5573 = vmatmul.mubr.msk.f32.vlgmr.msra.gmra.mxu0 %vm10255_vm3, %v9155_v56  ;;  %v9227_v3 = vpop.f32.mrf.mxu0  ;;  %v2583_v1 = vadd.f32 %v10276_v4, %v7620_v26  ;;  %v2793_v19 = vmax.f32 %v2500_v30, 0.0 }
 0x19e   : > { %vm9171_vm4 = vmor %vm9122_vm7, %vm3021_vm1  ;;  %vm2911_vm7 = vcmp.eq.s32.totalorder %v10006_v16, %v10135_v12  ;;  %3587 = vmatprep.mubr.f32.mxu0 %v9991_v32  ;;  %v9274_v40 = vpop.f32.mrf.mxu1  ;;  %v2786_v23 = vmax.f32 %v2496_v2, 0.0  ;;  %v2777_v41 = vmax.f32 %v2488_v62, 0.0  ;;  %v2779_v52 = vmax.f32 %v2577_v51, 0.0 }
 0x19f   : > { %v10251_v24 = vsel %vm9171_vm4, 4294967295, %v10250_v24  ;;  %vm9190_vm1 = vmor %vm9140_vm2, %vm3023_vm6  ;;  %vm10257_vm4 = vcmp.eq.s32.totalorder %v10006_v16, %v10133_v6  ;;  %vm2847_vm2 = vcmp.eq.s32.totalorder %v10006_v16, %v10134_v10  ;;  %v9295_v10 = vld [vmem:[%s9828_s1 + $0x30] sm:$0xff]  ;;  %v2787_v44 = vmax.f32 %v2583_v1, 0.0 }
 0x1a0   : > { %vm10256_vm8 = vmmov %vm10255_vm3  ;;  %vm10260_vm3 = vnez %v10202_v25  ;;  %v9299_v28 = vpop.f32.mrf.mxu1  ;;  %v10279_v25 = vld [vmem:[#allocation14_spill] sm:$0xff] }
 0x1a1   : > { %5585 = vmatmul.mubr.msk.f32.vlgmr.msra.gmra.mxu1 %vm10256_vm8, %v9155_v56  ;;  %vm9207_vm6 = vmor %vm9157_vm15, %vm10257_vm4  ;;  %5590 = vmatpush1.msk.msra.mxu0 %vm10260_vm3, %v10152_v43  ;;  %vm3016_vm15 = vcmp.eq.s32.totalorder %v10006_v16, %v8696_v35  ;;  %vm10263_vm4 = vnez %v10214_v15  ;;  %v9251_v35 = vld [vmem:[%s9828_s1 + $0x28] sm:$0xff]  ;;  %v2579_v17 = vadd.f32 %v10279_v25, %v10277_v55 }
 0x1a2   : > { %5602 = vmatpush1.msk.msra.mxu1 %vm8994_vm14, %v10152_v43  ;;  %vm9221_vm8 = vmor %vm2848_vm12, %vm2912_vm5  ;;  %5591 = vmatprep.subr.msk.mxu0 %vm10263_vm4, %v10152_v43  ;;  %vm10264_vm14 = vcmp.eq.s32.totalorder %v10006_v16, %v10121_v27  ;;  %vm3013_vm5 = vcmp.eq.s32.totalorder %v10006_v16, %v8714_v39  ;;  %v2508_v27 = vadd.f32 %v8970_v54, %v7640_v53  ;;  %v10278_v54 = vld [vmem:[#allocation13_spill] sm:$0xff] }
 0x1a3   : > { %5603 = vmatprep.subr.msk.mxu1 %vm9028_vm9, %v10152_v43  ;;  %vm2941_vm12 = vmor %vm10264_vm14, %vm2909_vm11  ;;  %5592 = vmatpush1.msk.msra.mxu0 %vm9053_vm10, %v10152_v43  ;;  %vm3015_vm11 = vcmp.eq.s32.totalorder %v10006_v16, %v8788_v29  ;;  %v2597_v39 = vadd.f32 %v8972_v63, %v7640_v53  ;;  %v9272_v16 = vpop.f32.mrf.mxu0  ;;  %v9316_v29 = vpop.f32.mrf.mxu1  ;;  %v2490_v63 = vadd.f32 %v10278_v54, %v10277_v55  ;;  %v2780_v0 = vmax.f32 %v2579_v17, 0.0 }
 0x1a4   : > { %5604 = vmatpush1.msk.msra.mxu1 %vm9072_vm0, %v10152_v43  ;;  %vm2943_vm9 = vmor %vm2847_vm2, %vm2911_vm7  ;;  %3676 = vmatprep.mubr.f32.mxu1 %v9991_v32  ;;  %vm10265_vm0 = vnez %v10233_v38  ;;  %vm10266_vm2 = vcmask 261120   ;;  %v2802_v49 = vmax.f32 %v2508_v27, 0.0  ;;  %v2788_v38 = vmax.f32 %v2585_v36, 0.0 }
 0x1a5   : > { %vm3048_vm10 = vmor %vm9221_vm8, %vm3016_vm15  ;;  %5593 = vmatprep.subr.msk.mxu0 %vm9095_vm13, %v10152_v43  ;;  %5605 = vmatprep.subr.msk.mxu1 %vm10265_vm0, %v10152_v43  ;;  %vm10268_vm15 = vnez %v10251_v24  ;;  %v2804_v6 = vmax.f32 %v2597_v39, 0.0  ;;  %v9297_v12 = vpop.f32.mrf.mxu0  ;;  %v2778_v24 = vmax.f32 %v2490_v63, 0.0  ;;  %v2769_v45 = vadd.f32 %v9316_v29, %v7721_v59 }
 0x1a6   : > { %vm3045_vm7 = vmor %vm2941_vm12, %vm3013_vm5  ;;  %5574 = vmatmul.mubr.msk.f32.gmra.mxu0 %vm10266_vm2, %v9251_v35  ;;  %5606 = vmatpush1.msk.msra.mxu1 %vm9190_vm1, %v10152_v43 }
 0x1a7   : > { %vm10267_vm3 = vmmov %vm10266_vm2  ;;  %5594 = vmatpush1.msk.msra.mxu0 %vm10268_vm15, %v10152_v43  ;;  %5607 = vmatprep.subr.msk.mxu1 %vm3048_vm10, %v10152_v43  ;;  %v9314_v11 = vpop.f32.mrf.mxu0  ;;  %v2800_v33 = vmax.f32 %v2769_v45, 0.0 }
 0x1a8   : > { %5586 = vmatmul.mubr.msk.f32.gmra.mxu1 %vm10267_vm3, %v9251_v35  ;;  %vm3047_vm8 = vmor %vm2943_vm9, %vm3015_vm11  ;;  %5595 = vmatprep.subr.msk.mxu0 %vm9207_vm6, %v10152_v43 }
 0x1a9   : > { %5596 = vmatpush1.msk.msra.mxu0 %vm3045_vm7, %v10152_v43  ;;  %5608 = vmatpush1.msk.msra.mxu1 %vm3047_vm8, %v10152_v43  ;;  %vm10269_vm13 = vmmov %vm10266_vm2  ;;  %v2595_v43 = vadd.f32 %v8854_v13, %v7640_v53  ;;  %v2683_v61 = vpop.f32.mrf.mxu0  ;;  %v2772_v13 = vpop.f32.mrf.mxu1 }
 0x1aa   : > { %3593 = vmatprep.mubr.f32.mxu0 %v9991_v32  ;;  %3682 = vmatprep.mubr.f32.mxu1 %v9991_v32  ;;  %vm10270_vm1 = vmmov %vm10266_vm2 }
 0x1ab   : > { %4013 = vmatprep.subr.mxu0 %v2802_v49  ;;  %4102 = vmatprep.subr.mxu1 %v2804_v6  ;;  %vm10271_vm6 = vmmov %vm10270_vm1  ;;  %v2803_v47 = vmax.f32 %v2595_v43, 0.0  ;;  %v2685_v37 = vpop.f32.mrf.mxu0  ;;  %v2774_v15 = vpop.f32.mrf.mxu1  ;;  %v2773_v49 = vadd.f32 %v2772_v13, %v7640_v53  ;;  %v2680_v6 = vadd.f32 %v9314_v11, %v7721_v59  ;;  %v2767_v43 = vadd.f32 %v9299_v28, %v7721_v59 }
 0x1ac   : > { %5575 = vmatmul.mubr.msk.f32.gmra.mxu0 %vm10269_vm13, %v9295_v10  ;;  %5587 = vmatmul.mubr.msk.f32.gmra.mxu1 %vm10270_vm1, %v9295_v10  ;;  %vm10272_vm4 = vmmov %vm10270_vm1  ;;  %v2775_v34 = vadd.f32 %v2774_v15, %v7640_v53  ;;  %v2674_v11 = vadd.f32 %v9272_v16, %v7620_v26  ;;  %v2761_v28 = vadd.f32 %v9229_v20, %v7620_v26  ;;  %v209_v20 = vld [vmem:[%s9828_s1 + $0x68] sm:$0xff] }
 0x1ad   : > { %3599 = vmatprep.mubr.f32.mxu0 %v9991_v32  ;;  %3688 = vmatprep.mubr.f32.mxu1 %v9991_v32  ;;  %vm10273_vm14 = vmmov %vm10270_vm1  ;;  %v2807_v14 = vmax.f32 %v2773_v49, 0.0  ;;  %v2799_v8 = vmax.f32 %v2767_v43, 0.0  ;;  %v2668_v16 = vadd.f32 %v9163_v50, %v10277_v55 }
 0x1ae   : > { %vm10274_vm12 = vmmov %vm10270_vm1  ;;  %v2808_v39 = vmax.f32 %v2775_v34, 0.0  ;;  %v2790_v13 = vmax.f32 %v2674_v11, 0.0 }
 0x1af   : > { %vm10282_vm5 = vmmov %vm10270_vm1 }
 0x1b0   : > { %5576 = vmatmul.mubr.msk.f32.gmra.mxu0 %vm10271_vm6, %v9312_v31  ;;  %5588 = vmatmul.mubr.msk.f32.gmra.mxu1 %vm10272_vm4, %v9312_v31  ;;  %vm10283_vm9 = vmmov %vm10270_vm1 }
 0x1b1   : > { %3759 = vmatprep.mubr.f32.mxu0 %v9991_v32  ;;  %3848 = vmatprep.mubr.f32.mxu1 %v9991_v32  ;;  %vm10284_vm11 = vmmov %vm10270_vm1 }
 0x1b2   : > { %vm10285_vm10 = vmmov %vm10270_vm1 }
 0x1b3   : > { %vm10286_vm0 = vmmov %vm10270_vm1 }
 0x1b4   : > { %5597 = vmatmul.mubr.msk.f32.vlgmr.msra.gmra.mxu0 %vm10273_vm14, %v9155_v56  ;;  %5609 = vmatmul.mubr.msk.f32.vlgmr.msra.gmra.mxu1 %vm10274_vm12, %v9155_v56  ;;  %v2686_v56 = vadd.f32 %v2685_v37, %v7640_v53  ;;  %vm10287_vm7 = vmmov %vm10286_vm0 }
 0x1b5   : > { %4014 = vmatpush1.msra.mxu0 %v2801_v7  ;;  %4103 = vmatpush1.msra.mxu1 %v2803_v47  ;;  %vm10288_vm2 = vmmov %vm10286_vm0  ;;  %v210_v7 = vld [vmem:[%s9828_s1 + $0x70] sm:$0xff]  ;;  %v211_v47 = vld [vmem:[%s9828_s1 + $0x78] sm:$0xff] }
 0x1b6   : > { %4015 = vmatprep.subr.mxu0 %v2794_v46  ;;  %4104 = vmatprep.subr.mxu1 %v2796_v48  ;;  %v2806_v27 = vmax.f32 %v2686_v56, 0.0  ;;  %vm10289_vm3 = vmmov %vm10286_vm0 }
 0x1b7   : > { %4016 = vmatpush1.msra.mxu0 %v2793_v19  ;;  %4105 = vmatpush1.msra.mxu1 %v2795_v9  ;;  %vm10290_vm8 = vmmov %vm10286_vm0 }
 0x1b8   : > { %3765 = vmatprep.mubr.f32.mxu0 %v9991_v32  ;;  %3854 = vmatprep.mubr.f32.mxu1 %v9991_v32  ;;  %vm10291_vm15 = vmmov %vm10286_vm0 }
 0x1b9   : > { %4017 = vmatprep.subr.mxu0 %v2786_v23  ;;  %4106 = vmatprep.subr.mxu1 %v2788_v38  ;;  %vm10292_vm13 = vmmov %vm10286_vm0 }
 0x1ba   : > { %5598 = vmatmul.mubr.msk.f32.gmra.mxu0 %vm10282_vm5, %v9251_v35  ;;  %5610 = vmatmul.mubr.msk.f32.gmra.mxu1 %vm10283_vm9, %v9251_v35  ;;  %v2684_v35 = vadd.f32 %v2683_v61, %v7640_v53  ;;  %v208_v53 = vld [vmem:[%s9828_s1 + $0x60] sm:$0xff]  ;;  %v2666_v61 = vadd.f32 %v9080_v57, %v10277_v55  ;;  %v2782_v57 = vmax.f32 %v2668_v16, 0.0  ;;  %vm10293_vm1 = vmmov %vm10286_vm0 }
 0x1bb   : > { %4018 = vmatpush1.msra.mxu0 %v2785_v58  ;;  %4107 = vmatpush1.msra.mxu1 %v2787_v44  ;;  %vm10294_vm6 = vmmov %vm10286_vm0 }
 0x1bc   : > { %4019 = vmatprep.subr.mxu0 %v2778_v24  ;;  %4108 = vmatprep.subr.mxu1 %v2780_v0  ;;  %v2805_v29 = vmax.f32 %v2684_v35, 0.0  ;;  %vm10295_vm4 = vmmov %vm10286_vm0 }
 0x1bd   : > { %4020 = vmatpush1.msra.mxu0 %v2777_v41  ;;  %4109 = vmatpush1.msra.mxu1 %v2779_v52  ;;  %vm10296_vm14 = vmmov %vm10286_vm0 }
 0x1be   : > { %3771 = vmatprep.mubr.f32.mxu0 %v9991_v32  ;;  %3860 = vmatprep.mubr.f32.mxu1 %v9991_v32  ;;  %vm10297_vm12 = vmmov %vm10286_vm0 }
 0x1bf   : > { %4191 = vmatprep.subr.mxu0 %v2806_v27  ;;  %4280 = vmatprep.subr.mxu1 %v2808_v39  ;;  %vm10298_vm5 = vmmov %vm10286_vm0 }
 0x1c0   : > { %5599 = vmatmul.mubr.msk.f32.gmra.mxu0 %vm10284_vm11, %v9295_v10  ;;  %5611 = vmatmul.mubr.msk.f32.gmra.mxu1 %vm10285_vm10, %v9295_v10  ;;  %v2678_v10 = vadd.f32 %v9297_v12, %v7721_v59  ;;  %v2798_v12 = vmax.f32 %v2680_v6, 0.0  ;;  %v2672_v59 = vadd.f32 %v9227_v3, %v7620_v26  ;;  %v2755_v3 = vadd.f32 %v9082_v42, %v10277_v55  ;;  %vm10299_vm9 = vmmov %vm10286_vm0 }
 0x1c1   : > { %3777 = vmatprep.mubr.f32.mxu0 %v9991_v32  ;;  %3866 = vmatprep.mubr.f32.mxu1 %v9991_v32  ;;  %v2781_v42 = vmax.f32 %v2666_v61, 0.0  ;;  %vm10300_vm11 = vmmov %vm10286_vm0 }
 0x1c2   : > { %v2797_v30 = vmax.f32 %v2678_v10, 0.0  ;;  %v2789_v50 = vmax.f32 %v2672_v59, 0.0  ;;  %v2783_v36 = vmax.f32 %v2755_v3, 0.0  ;;  %vm10301_vm10 = vmmov %vm10286_vm0 }
 0x1c4   : > { %5600 = vmatmul.mubr.msk.f32.gmra.mxu0 %vm10286_vm0, %v9312_v31  ;;  %5612 = vmatmul.mubr.msk.f32.gmra.mxu1 %vm10287_vm7, %v9312_v31  ;;  %v2763_v31 = vadd.f32 %v9274_v40, %v7620_v26  ;;  %v2757_v40 = vadd.f32 %v9165_v21, %v10277_v55  ;;  %v2791_v21 = vmax.f32 %v2761_v28, 0.0  ;;  %vm10302_vm7 = vmmov %vm10286_vm0 }
 0x1c5   : > { %4053 = vmatprep.mubr.f32.mxu0 %v9991_v32  ;;  %4142 = vmatprep.mubr.f32.mxu1 %v9991_v32 }
 0x1c6   : > { %v2792_v26 = vmax.f32 %v2763_v31, 0.0  ;;  %v2784_v2 = vmax.f32 %v2757_v40, 0.0 }
 0x1c8   : > { %5613 = vmatmul.mubr.msk.f32.vlgmr.msra.gmra.mxu0 %vm10288_vm2, %v208_v53  ;;  %5617 = vmatmul.mubr.msk.f32.vlgmr.msra.gmra.mxu1 %vm10289_vm3, %v208_v53  ;;  %vm10324_vm2 = vmmov %vm10286_vm0 }
 0x1c9   : > { %4192 = vmatpush1.msra.mxu0 %v2805_v29  ;;  %4281 = vmatpush1.msra.mxu1 %v2807_v14  ;;  %vm10325_vm3 = vmmov %vm10286_vm0 }
 0x1ca   : > { %4193 = vmatprep.subr.mxu0 %v2798_v12  ;;  %4282 = vmatprep.subr.mxu1 %v2800_v33 }
 0x1cb   : > { %4194 = vmatpush1.msra.mxu0 %v2797_v30  ;;  %4283 = vmatpush1.msra.mxu1 %v2799_v8 }
 0x1cc   : > { %4059 = vmatprep.mubr.f32.mxu0 %v9991_v32  ;;  %4148 = vmatprep.mubr.f32.mxu1 %v9991_v32 }
 0x1cd   : > { %4195 = vmatprep.subr.mxu0 %v2790_v13  ;;  %4284 = vmatprep.subr.mxu1 %v2792_v26 }
 0x1ce   : > { %5614 = vmatmul.mubr.msk.f32.gmra.mxu0 %vm10290_vm8, %v209_v20  ;;  %5618 = vmatmul.mubr.msk.f32.gmra.mxu1 %vm10291_vm15, %v209_v20  ;;  %vm10326_vm8 = vmmov %vm10286_vm0 }
 0x1cf   : > { %4196 = vmatpush1.msra.mxu0 %v2789_v50  ;;  %4285 = vmatpush1.msra.mxu1 %v2791_v21  ;;  %vm10327_vm15 = vmmov %vm10286_vm0 }
 0x1d0   : > { %4197 = vmatprep.subr.mxu0 %v2782_v57  ;;  %4286 = vmatprep.subr.mxu1 %v2784_v2 }
 0x1d1   : > { %4198 = vmatpush1.msra.mxu0 %v2781_v42  ;;  %4287 = vmatpush1.msra.mxu1 %v2783_v36 }
 0x1d2   : > { %4065 = vmatprep.mubr.f32.mxu0 %v9991_v32  ;;  %4154 = vmatprep.mubr.f32.mxu1 %v9991_v32 }
 0x1d3   : > { %5615 = vmatmul.mubr.msk.f32.gmra.mxu0 %vm10292_vm13, %v210_v7  ;;  %5619 = vmatmul.mubr.msk.f32.gmra.mxu1 %vm10293_vm1, %v210_v7  ;;  %vm10345_vm13 = vmmov %vm10286_vm0 }
 0x1d4   : > { %4071 = vmatprep.mubr.f32.mxu0 %v9991_v32  ;;  %4160 = vmatprep.mubr.f32.mxu1 %v9991_v32  ;;  %vm10346_vm1 = vmmov %vm10286_vm0 }
 0x1d7   : > { %5616 = vmatmul.mubr.msk.f32.gmra.mxu0 %vm10294_vm6, %v211_v47  ;;  %5620 = vmatmul.mubr.msk.f32.gmra.mxu1 %vm10295_vm4, %v211_v47  ;;  %vm10351_vm6 = vmmov %vm10286_vm0 }
 0x1d8   : > { %4231 = vmatprep.mubr.f32.mxu0 %v9991_v32  ;;  %4320 = vmatprep.mubr.f32.mxu1 %v9991_v32  ;;  %vm10352_vm4 = vmmov %vm10286_vm0 }
 0x1db   : > { %5621 = vmatmul.mubr.msk.f32.vlgmr.msra.gmra.mxu0 %vm10296_vm14, %v208_v53  ;;  %5625 = vmatmul.mubr.msk.f32.vlgmr.msra.gmra.mxu1 %vm10297_vm12, %v208_v53 }
 0x1dc   : > { %4237 = vmatprep.mubr.f32.mxu0 %v9991_v32  ;;  %4326 = vmatprep.mubr.f32.mxu1 %v9991_v32 }
 0x1df   : > { %5622 = vmatmul.mubr.msk.f32.gmra.mxu0 %vm10298_vm5, %v209_v20  ;;  %5626 = vmatmul.mubr.msk.f32.gmra.mxu1 %vm10299_vm9, %v209_v20 }
 0x1e0   : > { %4243 = vmatprep.mubr.f32.mxu0 %v9991_v32  ;;  %4332 = vmatprep.mubr.f32.mxu1 %v9991_v32 }
 0x1e3   : > { %5623 = vmatmul.mubr.msk.f32.gmra.mxu0 %vm10300_vm11, %v210_v7  ;;  %5627 = vmatmul.mubr.msk.f32.gmra.mxu1 %vm10301_vm10, %v210_v7 }
 0x1e4   : > { %4249 = vmatprep.mubr.f32.mxu0 %v9991_v32  ;;  %4338 = vmatprep.mubr.f32.mxu1 %v9991_v32 }
 0x1e7   : > { %5624 = vmatmul.mubr.msk.f32.gmra.mxu0 %vm10286_vm0, %v211_v47  ;;  %5628 = vmatmul.mubr.msk.f32.gmra.mxu1 %vm10302_vm7, %v211_v47 }
 0x1e8   : > { %4444 = vmatprep.mubr.f32.mxu0 %v9991_v32  ;;  %4515 = vmatprep.mubr.f32.mxu1 %v9991_v32 }
 0x217   : > { %v3215_v46 = vpop.f32.mrf.mxu0 }
 0x218   : > { %v3304_v48 = vpop.f32.mrf.mxu1 }
 0x219   : > { %v3217_v22 = vpop.f32.mrf.mxu0 }
 0x21a   : > { %v3306_v60 = vpop.f32.mrf.mxu1 }
 0x21b   : > { %v3221_v4 = vpop.f32.mrf.mxu0 }
 0x21c   : > { %v3310_v1 = vpop.f32.mrf.mxu1 }
 0x21d   : > { %v3223_v19 = vpop.f32.mrf.mxu0 }
 0x21e   : > { %v3312_v9 = vpop.f32.mrf.mxu1 }
 0x21f   : > { %v3227_v55 = vpop.f32.mrf.mxu0 }
 0x220   : > { %v3316_v54 = vpop.f32.mrf.mxu1 }
 0x221   : > { %v9448_v63 = vpop.f32.mrf.mxu0 }
 0x222   : > { %v9450_v25 = vpop.f32.mrf.mxu1 }
 0x231   : > { %v9452_v17 = vpop.f32.mrf.mxu0 }
 0x232   : > { %v9454_v37 = vpop.f32.mrf.mxu1 }
 0x233   : > { %v9456_v15 = vpop.f32.mrf.mxu0 }
 0x234   : > { %v9458_v5 = vpop.f32.mrf.mxu1 }
 0x23d   : > { %v3393_v62 = vpop.f32.mrf.mxu0 }
 0x23f   : > { %v3482_v18 = vpop.f32.mrf.mxu1  ;;  %v3395_v51 = vpop.f32.mrf.mxu0 }
 0x241   : > { %v3484_v23 = vpop.f32.mrf.mxu1 }
 0x248   : > { %v3399_v38 = vpop.f32.mrf.mxu0 }
 0x24a   : > { %v3488_v58 = vpop.f32.mrf.mxu1  ;;  %v9460_v44 = vpop.f32.mrf.mxu0 }
 0x24b   : > { %10303 = vst [vmem:[#allocation19_spill] sm:$0xff] %v9460_v44 }
 0x24c   : > { %v9462_v56 = vpop.f32.mrf.mxu1 }
 0x24d   : > { %10304 = vst [vmem:[#allocation20_spill] sm:$0xff] %v9462_v56 }
 0x251   : > { %v9464_v34 = vpop.f32.mrf.mxu0 }
 0x252   : > { %10305 = vst [vmem:[#allocation22_spill] sm:$0xff] %v9464_v34 }
 0x253   : > { %v9466_v24 = vpop.f32.mrf.mxu1  ;;  %v9468_v0 = vpop.f32.mrf.mxu0 }
 0x254   : > { %10306 = vst [vmem:[#allocation5_spill] sm:$0xff] %v9466_v24  ;;  %10307 = vst [vmem:[#allocation8_spill] sm:$0xff] %v9468_v0 }
 0x255   : > { %v9470_v41 = vpop.f32.mrf.mxu1 }
 0x256   : > { %10308 = vst [vmem:[#allocation10_spill] sm:$0xff] %v9470_v41 }
 0x259   : > { %v9472_v52 = vpop.f32.mrf.mxu0 }
 0x25b   : > { %v9474_v27 = vpop.f32.mrf.mxu1  ;;  %v9476_v39 = vpop.f32.mrf.mxu0 }
 0x25c   : > { %10309 = vst [vmem:[#allocation45_spill] sm:$0xff] %v9474_v27 }
 0x25d   : > { %v9478_v35 = vpop.f32.mrf.mxu1  ;;  %v3583_v49 = vpop.f32.mrf.mxu0 }
 0x25e   : > { %v9480_v45 = vadd.f32 %v3583_v49, %v3215_v46 }
 0x25f   : > { %v3585_v43 = vpop.f32.mrf.mxu0 }
 0x260   : > { %v9484_v11 = vadd.f32 %v3585_v43, %v3217_v22 }
 0x261   : > { %v3672_v6 = vpop.f32.mrf.mxu1 }
 0x262   : > { %v9482_v10 = vadd.f32 %v3672_v6, %v3304_v48 }
 0x263   : > { %v3674_v53 = vpop.f32.mrf.mxu1 }
 0x264   : > { %v9486_v31 = vadd.f32 %v3674_v53, %v3306_v60 }
 0x266   : > { %v3589_v29 = vpop.f32.mrf.mxu0 }
 0x267   : > { %v9488_v12 = vadd.f32 %v3589_v29, %v3221_v4 }
 0x268   : > { %v3678_v14 = vpop.f32.mrf.mxu1  ;;  %v3591_v59 = vpop.f32.mrf.mxu0 }
 0x269   : > { %v9490_v33 = vadd.f32 %v3678_v14, %v3310_v1  ;;  %v9492_v30 = vadd.f32 %v3591_v59, %v3223_v19 }
 0x26a   : > { %v3680_v28 = vpop.f32.mrf.mxu1 }
 0x26b   : > { %v9494_v8 = vadd.f32 %v3680_v28, %v3312_v9 }
 0x26c   : > { %v3595_v16 = vpop.f32.mrf.mxu0  ;;  %v3684_v40 = vpop.f32.mrf.mxu1 }
 0x26d   : > { %v9496_v61 = vadd.f32 %v3595_v16, %v3227_v55  ;;  %v9498_v3 = vadd.f32 %v3684_v40, %v3316_v54 }
 0x26e   : > { %v9500_v13 = vpop.f32.mrf.mxu0  ;;  %v9502_v26 = vpop.f32.mrf.mxu1 }
 0x270   : > { %v9504_v20 = vpop.f32.mrf.mxu0  ;;  %v9506_v50 = vpop.f32.mrf.mxu1 }
 0x272   : > { %v9508_v21 = vpop.f32.mrf.mxu0  ;;  %v9510_v57 = vpop.f32.mrf.mxu1 }
 0x274   : > { %v3761_v2 = vpop.f32.mrf.mxu0  ;;  %v3850_v42 = vpop.f32.mrf.mxu1 }
 0x275   : > { %v9512_v36 = vadd.f32 %v3761_v2, %v3393_v62  ;;  %v9514_v7 = vadd.f32 %v3850_v42, %v3482_v18  ;;  %v9544_v42 = vpop.permute.xlu0 %3974 }
 0x276   : > { %v3763_v47 = vpop.f32.mrf.mxu0  ;;  %v3852_v46 = vpop.f32.mrf.mxu1 }
 0x277   : > { %10310 = vst [vmem:[#allocation46_spill] sm:$0xff] %v9512_v36  ;;  %10311 = vst [vmem:[#allocation47_spill] sm:$0xff] %v9514_v7  ;;  %v9516_v48 = vadd.f32 %v3763_v47, %v3395_v51  ;;  %v9518_v22 = vadd.f32 %v3852_v46, %v3484_v23  ;;  %v9546_v47 = vpop.permute.xlu1 %3969 }
 0x279   : > { %10312 = vst [vmem:[#allocation48_spill] sm:$0xff] %v9516_v48  ;;  %10313 = vst [vmem:[#allocation49_spill] sm:$0xff] %v9518_v22 }
 0x27a   : > { %v3767_v60 = vpop.f32.mrf.mxu0  ;;  %v3856_v4 = vpop.f32.mrf.mxu1 }
 0x27b   : > { %v9520_v1 = vadd.f32 %v3767_v60, %v3399_v38  ;;  %v9522_v19 = vadd.f32 %v3856_v4, %v3488_v58 }
 0x27c   : > { %v9524_v9 = vpop.f32.mrf.mxu0  ;;  %v9526_v55 = vpop.f32.mrf.mxu1 }
 0x27d   : > { %10314 = vst [vmem:[#allocation15_spill] sm:$0xff] %v9520_v1  ;;  %10315 = vst [vmem:[#allocation17_spill] sm:$0xff] %v9522_v19  ;;  %v9550_v1 = vpop.permute.xlu0 %3964 }
 0x27e   : > { %10316 = vst [vmem:[#allocation6_spill] sm:$0xff] %v9524_v9  ;;  %10317 = vst [vmem:[#allocation21_spill] sm:$0xff] %v9526_v55  ;;  %v9552_v55 = vpop.permute.xlu1 %3959 }
 0x280   : > { %v9528_v54 = vpop.f32.mrf.mxu0  ;;  %v9530_v62 = vpop.f32.mrf.mxu1 }
 0x281   : > { %10318 = vst [vmem:[#allocation23_spill] sm:$0xff] %v9528_v54  ;;  %10319 = vst [vmem:[#allocation50_spill] sm:$0xff] %v9530_v62 }
 0x282   : > { %v9532_v18 = vpop.f32.mrf.mxu0  ;;  %v9534_v51 = vpop.f32.mrf.mxu1 }
 0x283   : > { %10320 = vst [vmem:[#allocation51_spill] sm:$0xff] %v9532_v18  ;;  %10321 = vst [vmem:[#allocation52_spill] sm:$0xff] %v9534_v51 }
 0x284   : > { %v9536_v23 = vpop.f32.mrf.mxu0  ;;  %v9538_v49 = vpop.f32.mrf.mxu1 }
 0x285   : > { %10322 = vst [vmem:[#allocation3_spill] sm:$0xff] %v9536_v23  ;;  %10323 = vst [vmem:[#allocation35_spill] sm:$0xff] %v9538_v49 }
 0x286   : > { %v9540_v38 = vpop.f32.mrf.mxu0  ;;  %v9542_v58 = vpop.f32.mrf.mxu1 }
 0x288   : > { %v4055_v6 = vpop.f32.mrf.mxu0  ;;  %v4144_v43 = vpop.f32.mrf.mxu1 }
 0x28a   : > { %v4057_v53 = vpop.f32.mrf.mxu0  ;;  %v4146_v29 = vpop.f32.mrf.mxu1 }
 0x28b   : > { %v4147_v49 = vadd.f32 %v4146_v29, %v9552_v55 }
 0x28e   : > { %v4061_v14 = vpop.f32.mrf.mxu0  ;;  %v4150_v59 = vpop.f32.mrf.mxu1 }
 0x290   : > { %v4063_v28 = vpop.f32.mrf.mxu0  ;;  %v4152_v16 = vpop.f32.mrf.mxu1 }
 0x291   : > { %v4064_v44 = vadd.f32 %v4063_v28, %v9550_v1  ;;  %v4153_v51 = vadd.f32 %v4152_v16, %v9550_v1  ;;  %v9576_v16 = vpop.permute.xlu1 %3885 }
 0x293   : > { %v4067_v40 = vpop.f32.mrf.mxu0  ;;  %v4156_v2 = vpop.f32.mrf.mxu1  ;;  %v4354_v23 = vmax.f32 %v4064_v44, 0.0  ;;  %v9581_v44 = vld [vmem:[%s9828_s1 + $0x88] sm:$0xff] }
 0x294   : > { %v4068_v34 = vadd.f32 %v4067_v40, %v9546_v47 }
 0x295   : > { %v4069_v46 = vpop.f32.mrf.mxu0  ;;  %v4158_v60 = vpop.f32.mrf.mxu1 }
 0x296   : > { %v4070_v56 = vadd.f32 %v4069_v46, %v9546_v47  ;;  %v4159_v62 = vadd.f32 %v4158_v60, %v9546_v47  ;;  %v4062_v60 = vadd.f32 %v4061_v14, %v9550_v1  ;;  %v4361_v14 = vmax.f32 %v4068_v34, 0.0 }
 0x297   : > { %v4073_v4 = vpop.f32.mrf.mxu0  ;;  %v4162_v7 = vpop.f32.mrf.mxu1 }
 0x298   : > { %v4074_v36 = vadd.f32 %v4073_v4, %v9544_v42  ;;  %v4163_v22 = vadd.f32 %v4162_v7, %v9544_v42  ;;  %v4157_v4 = vadd.f32 %v4156_v2, %v9546_v47  ;;  %v4058_v2 = vadd.f32 %v4057_v53, %v9552_v55 }
 0x299   : > { %v4075_v48 = vpop.f32.mrf.mxu0  ;;  %v4164_v19 = vpop.f32.mrf.mxu1  ;;  %v4362_v27 = vmax.f32 %v4070_v56, 0.0  ;;  %v4364_v28 = vmax.f32 %v4159_v62, 0.0  ;;  %v4356_v53 = vmax.f32 %v4153_v51, 0.0  ;;  %v4353_v56 = vmax.f32 %v4062_v60, 0.0 }
 0x29a   : > { %v4076_v24 = vadd.f32 %v4075_v48, %v9544_v42  ;;  %v4165_v54 = vadd.f32 %v4164_v19, %v9544_v42  ;;  %v4151_v48 = vadd.f32 %v4150_v59, %v9550_v1  ;;  %v4369_v18 = vmax.f32 %v4074_v36, 0.0 }
 0x29b   : > { %v9560_v9 = vpop.f32.mrf.mxu0  ;;  %v9562_v7 = vpop.f32.mrf.mxu1  ;;  %v4371_v19 = vmax.f32 %v4163_v22, 0.0  ;;  %v4363_v59 = vmax.f32 %v4157_v4, 0.0 }
 0x29c   : > { %v4370_v41 = vmax.f32 %v4076_v24, 0.0  ;;  %v4372_v46 = vmax.f32 %v4165_v54, 0.0  ;;  %v4056_v24 = vadd.f32 %v4055_v6, %v9552_v55  ;;  %v4145_v54 = vadd.f32 %v4144_v43, %v9552_v55 }
 0x29d   : > { %v9568_v0 = vpop.f32.mrf.mxu0  ;;  %v9570_v40 = vpop.f32.mrf.mxu1  ;;  %v4355_v62 = vmax.f32 %v4151_v48, 0.0  ;;  %v4346_v6 = vmax.f32 %v4058_v2, 0.0  ;;  %v4348_v43 = vmax.f32 %v4147_v49, 0.0  ;;  %v3598_v2 = vadd.f32 %v9500_v13, %v9448_v63 }
 0x29e   : > { %4404 = vmatprep.subr.mxu0 %v4370_v41  ;;  %4475 = vmatprep.subr.mxu1 %v4372_v46  ;;  %v4345_v34 = vmax.f32 %v4056_v24, 0.0  ;;  %v4347_v4 = vmax.f32 %v4145_v54, 0.0  ;;  %v9583_v49 = vpop.permute.xlu1 %3875  ;;  %v3602_v24 = vadd.f32 %v9504_v20, %v9452_v17  ;;  %v3691_v54 = vadd.f32 %v9506_v50, %v9454_v37 }
 0x29f   : > { %v4239_v36 = vpop.f32.mrf.mxu0  ;;  %v4328_v22 = vpop.f32.mrf.mxu1  ;;  %4405 = vmatpush1.msra.mxu0 %v4369_v18  ;;  %4476 = vmatpush1.msra.mxu1 %v4371_v19  ;;  %v9593_v48 = vadd.f32 %v9583_v49, %v9480_v45  ;;  %v9597_v19 = vadd.f32 %v9583_v49, %v9482_v10  ;;  %v3604_v17 = vadd.f32 %v9508_v21, %v9456_v15 }
 0x2a0   : > { %4406 = vmatprep.subr.mxu0 %v4362_v27  ;;  %4477 = vmatprep.subr.mxu1 %v4364_v28  ;;  %v3687_v28 = vadd.f32 %v9502_v26, %v9450_v25  ;;  %v9609_v10 = vpop.permute.xlu0 %3890  ;;  %v3693_v37 = vadd.f32 %v9510_v57, %v9458_v5  ;;  %v4236_v15 = vadd.f32 %v9568_v0, %v9552_v55 }
 0x2a1   : > { %v4241_v41 = vpop.f32.mrf.mxu0  ;;  %v4330_v29 = vpop.f32.mrf.mxu1  ;;  %4407 = vmatpush1.msra.mxu0 %v4361_v14  ;;  %4478 = vmatpush1.msra.mxu1 %v4363_v59  ;;  %v4325_v5 = vadd.f32 %v9570_v40, %v9552_v55  ;;  %v3918_v0 = vadd.f32 %v9609_v10, %v3604_v17 }
 0x2a2   : > { %4408 = vmatprep.subr.mxu0 %v4354_v23  ;;  %4479 = vmatprep.subr.mxu1 %v4356_v53  ;;  %v4242_v50 = vadd.f32 %v4241_v41, %v9550_v1  ;;  %v3920_v40 = vadd.f32 %v9609_v10, %v3693_v37 }
 0x2a3   : > { %v4245_v18 = vpop.f32.mrf.mxu0  ;;  %v4334_v46 = vpop.f32.mrf.mxu1  ;;  %4409 = vmatpush1.msra.mxu0 %v4353_v56  ;;  %4480 = vmatpush1.msra.mxu1 %v4355_v62  ;;  %v4331_v62 = vadd.f32 %v4330_v29, %v9550_v1 }
 0x2a4   : > { %4410 = vmatprep.subr.mxu0 %v4346_v6  ;;  %4481 = vmatprep.subr.mxu1 %v4348_v43  ;;  %v4246_v26 = vadd.f32 %v4245_v18, %v9546_v47  ;;  %v4335_v20 = vadd.f32 %v4334_v46, %v9546_v47  ;;  %v4358_v29 = vmax.f32 %v4242_v50, 0.0 }
 0x2a5   : > { %v4247_v27 = vpop.f32.mrf.mxu0  ;;  %v4336_v51 = vpop.f32.mrf.mxu1  ;;  %4411 = vmatpush1.msra.mxu0 %v4345_v34  ;;  %4482 = vmatpush1.msra.mxu1 %v4347_v4  ;;  %v4240_v34 = vadd.f32 %v4239_v36, %v9550_v1  ;;  %v4323_v36 = vadd.f32 %v9562_v7, %v9552_v55  ;;  %v4360_v18 = vmax.f32 %v4331_v62, 0.0  ;;  %v10329_v62 = vld [vmem:[#allocation45_spill] sm:$0xff] }
 0x2a6   : > { %5629 = vmatmul.mubr.msk.f32.vlgmr.msra.gmra.mxu0 %vm10324_vm2, %v9581_v44  ;;  %5630 = vmatmul.mubr.msk.f32.vlgmr.msra.gmra.mxu1 %vm10325_vm3, %v9581_v44  ;;  %v4248_v56 = vadd.f32 %v4247_v27, %v9546_v47  ;;  %v4337_v63 = vadd.f32 %v4336_v51, %v9546_v47  ;;  %v4234_v47 = vadd.f32 %v9560_v9, %v9552_v55  ;;  %v4365_v41 = vmax.f32 %v4246_v26, 0.0 }
 0x2a7   : > { %v4251_v23 = vpop.f32.mrf.mxu0  ;;  %v4340_v60 = vpop.f32.mrf.mxu1  ;;  %4586 = vmatprep.mubr.f32.mxu0 %v9991_v32  ;;  %4657 = vmatprep.mubr.f32.mxu1 %v9991_v32  ;;  %v9639_v9 = vadd.f32 %v9583_v49, %v9484_v11  ;;  %v4357_v7 = vmax.f32 %v4240_v34, 0.0  ;;  %v3917_v51 = vadd.f32 %v9609_v10, %v3602_v24  ;;  %v3912_v11 = vadd.f32 %v9576_v16, %v3687_v28  ;;  %v10331_v34 = vld [vmem:[#allocation8_spill] sm:$0xff] }
 0x2a8   : > { %v4252_v14 = vadd.f32 %v4251_v23, %v9544_v42  ;;  %v4341_v45 = vadd.f32 %v4340_v60, %v9544_v42  ;;  %v4366_v21 = vmax.f32 %v4248_v56, 0.0  ;;  %v4368_v57 = vmax.f32 %v4337_v63, 0.0 }
 0x2a9   : > { %v4253_v59 = vpop.f32.mrf.mxu0  ;;  %v4342_v53 = vpop.f32.mrf.mxu1  ;;  %v3919_v23 = vadd.f32 %v9609_v10, %v3691_v54  ;;  %v4350_v60 = vmax.f32 %v4236_v15, 0.0  ;;  %v3911_v24 = vadd.f32 %v9576_v16, %v9498_v3  ;;  %v3950_v56 = vmax.f32 %v3918_v0, 0.0  ;;  %v10335_v15 = vld [vmem:[#allocation19_spill] sm:$0xff] }
 0x2aa   : > { %v4254_v25 = vadd.f32 %v4253_v59, %v9544_v42  ;;  %v4343_v13 = vadd.f32 %v4342_v53, %v9544_v42  ;;  %v4329_v42 = vadd.f32 %v4328_v22, %v9550_v1  ;;  %v4373_v4 = vmax.f32 %v4252_v14, 0.0  ;;  %v9633_v22 = vpop.permute.xlu0 %3880 }
 0x2ab   : > { %v4375_v27 = vmax.f32 %v4341_v45, 0.0  ;;  %v4367_v1 = vmax.f32 %v4335_v20, 0.0  ;;  %v9643_v55 = vadd.f32 %v9633_v22, %v9488_v12  ;;  %v4352_v14 = vmax.f32 %v4325_v5, 0.0  ;;  %v10328_v20 = vld [vmem:[#allocation3_spill] sm:$0xff]  ;;  %v10336_v5 = vld [vmem:[#allocation6_spill] sm:$0xff] }
 0x2ac   : > { %v4374_v6 = vmax.f32 %v4254_v25, 0.0  ;;  %v4376_v43 = vmax.f32 %v4343_v13, 0.0  ;;  %v4359_v46 = vmax.f32 %v4329_v42, 0.0  ;;  %v3910_v45 = vadd.f32 %v9576_v16, %v3598_v2  ;;  %v10333_v42 = vld [vmem:[#allocation10_spill] sm:$0xff] }
 0x2ad   : > { %v4349_v59 = vmax.f32 %v4234_v47, 0.0  ;;  %v4351_v53 = vmax.f32 %v4323_v36, 0.0  ;;  %v3909_v12 = vadd.f32 %v9576_v16, %v9496_v61  ;;  %v3952_v54 = vmax.f32 %v3920_v40, 0.0  ;;  %v10339_v36 = vld [vmem:[#allocation5_spill] sm:$0xff]  ;;  %v10341_v40 = vld [vmem:[#allocation20_spill] sm:$0xff] }
 0x2ae   : > { %4546 = vmatprep.subr.mxu0 %v4374_v6  ;;  %4617 = vmatprep.subr.mxu1 %v4376_v43  ;;  %v3926_v63 = vmax.f32 %v9639_v9, 0.0  ;;  %v3896_v2 = vadd.f32 %v9583_v49, %v9486_v31  ;;  %v3902_v28 = vadd.f32 %v9633_v22, %v9492_v30  ;;  %v3904_v25 = vadd.f32 %v9633_v22, %v9494_v8  ;;  %v10330_v6 = vld [vmem:[#allocation35_spill] sm:$0xff] }
 0x2af   : > { %4547 = vmatpush1.msra.mxu0 %v4373_v4  ;;  %4618 = vmatpush1.msra.mxu1 %v4375_v27  ;;  %v3933_v61 = vmax.f32 %v9643_v55, 0.0  ;;  %v3903_v3 = vadd.f32 %v9633_v22, %v9490_v33  ;;  %v3949_v13 = vmax.f32 %v3917_v51, 0.0  ;;  %v3951_v17 = vmax.f32 %v3919_v23, 0.0  ;;  %v10334_v4 = vld [vmem:[#allocation52_spill] sm:$0xff] }
 0x2b0   : > { %4548 = vmatprep.subr.mxu0 %v4366_v21  ;;  %4619 = vmatprep.subr.mxu1 %v4368_v57  ;;  %v3942_v37 = vmax.f32 %v3910_v45, 0.0  ;;  %v3944_v26 = vmax.f32 %v3912_v11, 0.0  ;;  %v3782_v31 = vadd.f32 %v9540_v38, %v9476_v39  ;;  %v3871_v30 = vadd.f32 %v9542_v58, %v9478_v35  ;;  %v10332_v35 = vld [vmem:[#allocation51_spill] sm:$0xff] }
 0x2b1   : > { %4549 = vmatpush1.msra.mxu0 %v4365_v41  ;;  %4620 = vmatpush1.msra.mxu1 %v4367_v1  ;;  %v3941_v8 = vmax.f32 %v3909_v12, 0.0  ;;  %v3943_v33 = vmax.f32 %v3911_v24, 0.0  ;;  %v3780_v50 = vadd.f32 %v10328_v20, %v9472_v52  ;;  %v3869_v43 = vadd.f32 %v10330_v6, %v10329_v62  ;;  %v10337_v52 = vld [vmem:[#allocation22_spill] sm:$0xff]  ;;  %v10338_v57 = vld [vmem:[#allocation23_spill] sm:$0xff] }
 0x2b2   : > { %4550 = vmatprep.subr.mxu0 %v4358_v29  ;;  %4621 = vmatprep.subr.mxu1 %v4360_v18  ;;  %v3934_v39 = vmax.f32 %v3902_v28, 0.0  ;;  %v3936_v38 = vmax.f32 %v3904_v25, 0.0  ;;  %v3776_v58 = vadd.f32 %v10332_v35, %v10331_v34  ;;  %v3865_v27 = vadd.f32 %v10334_v4, %v10333_v42  ;;  %v10340_v41 = vld [vmem:[#allocation50_spill] sm:$0xff]  ;;  %v10342_v29 = vld [vmem:[#allocation21_spill] sm:$0xff]  ;;  %v212_v45 = vld [vmem:[%s9828_s1 + $0x80] sm:$0xff] }
 0x2b3   : > { %4551 = vmatpush1.msra.mxu0 %v4357_v7  ;;  %4622 = vmatpush1.msra.mxu1 %v4359_v46  ;;  %v3770_v21 = vadd.f32 %v10336_v5, %v10335_v15  ;;  %v3774_v47 = vadd.f32 %v10338_v57, %v10337_v52  ;;  %v3863_v1 = vadd.f32 %v10340_v41, %v10339_v36  ;;  %v3928_v0 = vmax.f32 %v3896_v2, 0.0  ;;  %v10343_v12 = vld [vmem:[#allocation15_spill] sm:$0xff]  ;;  %v10347_v2 = vld [vmem:[#allocation48_spill] sm:$0xff]  ;;  %v10348_v25 = vld [vmem:[#allocation49_spill] sm:$0xff]  ;;  %v4954_v5 = vpop.permute.xlu0 %4953 }
 0x2b4   : > { %4552 = vmatprep.subr.mxu0 %v4350_v60  ;;  %4623 = vmatprep.subr.mxu1 %v4352_v14  ;;  %v3859_v18 = vadd.f32 %v10342_v29, %v10341_v40  ;;  %v3922_v9 = vadd.f32 %v9609_v10, %v3782_v31  ;;  %v3924_v55 = vadd.f32 %v9609_v10, %v3871_v30  ;;  %v3925_v7 = vmax.f32 %v9593_v48, 0.0  ;;  %v10350_v31 = vld [vmem:[#allocation47_spill] sm:$0xff] }
 0x2b5   : > { %4553 = vmatpush1.msra.mxu0 %v4349_v59  ;;  %4624 = vmatpush1.msra.mxu1 %v4351_v53  ;;  %v3921_v46 = vadd.f32 %v9609_v10, %v3780_v50  ;;  %v3923_v51 = vadd.f32 %v9609_v10, %v3869_v43  ;;  %v3927_v23 = vmax.f32 %v9597_v19, 0.0  ;;  %v3914_v60 = vadd.f32 %v9576_v16, %v3776_v58 }
 0x2b6   : > { %4691 = vmatprep.subr.mxu0 %v3950_v56  ;;  %4762 = vmatprep.subr.mxu1 %v3952_v54  ;;  %v3916_v14 = vadd.f32 %v9576_v16, %v3865_v27  ;;  %v3913_v48 = vadd.f32 %v9576_v16, %v3774_v47  ;;  %v3915_v11 = vadd.f32 %v9576_v16, %v3863_v1  ;;  %v3954_v59 = vmax.f32 %v3922_v9, 0.0  ;;  %v10344_v56 = vld [vmem:[#allocation17_spill] sm:$0xff] }
 0x2b7   : > { %5631 = vmatmul.mubr.msk.f32.vlgmr.msra.gmra.mxu0 %vm10326_vm8, %v9581_v44  ;;  %5632 = vmatmul.mubr.msk.f32.vlgmr.msra.gmra.mxu1 %vm10327_vm15, %v9581_v44  ;;  %v3935_v44 = vmax.f32 %v3903_v3, 0.0  ;;  %v3906_v10 = vadd.f32 %v9633_v22, %v3770_v21  ;;  %v3908_v19 = vadd.f32 %v9633_v22, %v3859_v18  ;;  %v3956_v53 = vmax.f32 %v3924_v55, 0.0 }
 0x2b8   : > { %4692 = vmatpush1.msra.mxu0 %v3949_v13  ;;  %4763 = vmatpush1.msra.mxu1 %v3951_v17  ;;  %v3905_v24 = vadd.f32 %v9633_v22, %v10343_v12  ;;  %v3907_v54 = vadd.f32 %v9633_v22, %v10344_v56  ;;  %v3955_v16 = vmax.f32 %v3923_v51, 0.0  ;;  %v3898_v28 = vadd.f32 %v9583_v49, %v10347_v2  ;;  %v10349_v17 = vld [vmem:[#allocation46_spill] sm:$0xff] }
 0x2b9   : > { %4693 = vmatprep.subr.mxu0 %v3942_v37  ;;  %4764 = vmatprep.subr.mxu1 %v3944_v26  ;;  %v3946_v3 = vmax.f32 %v3914_v60, 0.0  ;;  %v3948_v13 = vmax.f32 %v3916_v14, 0.0  ;;  %v3897_v37 = vadd.f32 %v9583_v49, %v10349_v17  ;;  %v3945_v22 = vmax.f32 %v3913_v48, 0.0 }
 0x2ba   : > { %4694 = vmatpush1.msra.mxu0 %v3941_v8  ;;  %4765 = vmatpush1.msra.mxu1 %v3943_v33  ;;  %v3947_v26 = vmax.f32 %v3915_v11, 0.0  ;;  %v3899_v30 = vadd.f32 %v9583_v49, %v10350_v31  ;;  %v3938_v8 = vmax.f32 %v3906_v10, 0.0  ;;  %v3940_v33 = vmax.f32 %v3908_v19, 0.0 }
 0x2bb   : > { %4695 = vmatprep.subr.mxu0 %v3934_v39  ;;  %4766 = vmatprep.subr.mxu1 %v3936_v38  ;;  %v3937_v20 = vmax.f32 %v3905_v24, 0.0  ;;  %v3939_v50 = vmax.f32 %v3907_v54, 0.0  ;;  %v3930_v62 = vmax.f32 %v3898_v28, 0.0  ;;  %v3929_v43 = vmax.f32 %v3897_v37, 0.0 }
 0x2bc   : > { %4696 = vmatpush1.msra.mxu0 %v3933_v61  ;;  %4767 = vmatpush1.msra.mxu1 %v3935_v44  ;;  %v3900_v61 = vadd.f32 %v9583_v49, %v10348_v25  ;;  %v3931_v39 = vmax.f32 %v3899_v30, 0.0 }
 0x2bd   : > { %4697 = vmatprep.subr.mxu0 %v3926_v63  ;;  %4768 = vmatprep.subr.mxu1 %v3928_v0  ;;  %v3953_v63 = vmax.f32 %v3921_v46, 0.0 }
 0x2be   : > { %4698 = vmatpush1.msra.mxu0 %v3925_v7  ;;  %4731 = vmatprep.mubr.f32.mxu0 %v9991_v32  ;;  %v3932_v6 = vmax.f32 %v3900_v61, 0.0 }
 0x2bf   : > { %4769 = vmatpush1.msra.mxu1 %v3927_v23  ;;  %4802 = vmatprep.mubr.f32.mxu1 %v9991_v32 }
 0x2c0   : > { %5633 = vmatmul.mubr.msk.f32.vlgmr.msra.gmra.mxu0 %vm10345_vm13, %v212_v45  ;;  %5634 = vmatmul.mubr.msk.f32.vlgmr.msra.gmra.mxu1 %vm10346_vm1, %v212_v45 }
 0x2c1   : > { %4833 = vmatprep.subr.mxu0 %v3954_v59  ;;  %4904 = vmatprep.subr.mxu1 %v3956_v53 }
 0x2c2   : > { %4834 = vmatpush1.msra.mxu0 %v3953_v63  ;;  %4905 = vmatpush1.msra.mxu1 %v3955_v16 }
 0x2c3   : > { %4835 = vmatprep.subr.mxu0 %v3946_v3  ;;  %4906 = vmatprep.subr.mxu1 %v3948_v13 }
 0x2c4   : > { %4836 = vmatpush1.msra.mxu0 %v3945_v22  ;;  %4907 = vmatpush1.msra.mxu1 %v3947_v26 }
 0x2c5   : > { %4837 = vmatprep.subr.mxu0 %v3938_v8  ;;  %4908 = vmatprep.subr.mxu1 %v3940_v33 }
 0x2c6   : > { %4838 = vmatpush1.msra.mxu0 %v3937_v20  ;;  %4909 = vmatpush1.msra.mxu1 %v3939_v50 }
 0x2c7   : > { %4839 = vmatprep.subr.mxu0 %v3930_v62  ;;  %4910 = vmatprep.subr.mxu1 %v3932_v6 }
 0x2c8   : > { %4840 = vmatpush1.msra.mxu0 %v3929_v43  ;;  %4873 = vmatprep.mubr.f32.mxu0 %v9991_v32 }
 0x2c9   : > { %4911 = vmatpush1.msra.mxu1 %v3931_v39  ;;  %4944 = vmatprep.mubr.f32.mxu1 %v9991_v32 }
 0x2ca   : > { %5635 = vmatmul.mubr.msk.f32.vlgmr.msra.gmra.mxu0 %vm10351_vm6, %v212_v45  ;;  %5636 = vmatmul.mubr.msk.f32.vlgmr.msra.gmra.mxu1 %vm10352_vm4, %v212_v45 }
 0x366   : > { %v4446_v49 = vpop.f32.mrf.mxu0  ;;  %v4517_v38 = vpop.f32.mrf.mxu1 }
 0x368   : > { %v4448_v34 = vpop.f32.mrf.mxu0  ;;  %v4519_v35 = vpop.f32.mrf.mxu1 }
 0x377   : > { %v4588_v58 = vpop.f32.mrf.mxu0  ;;  %v4659_v42 = vpop.f32.mrf.mxu1 }
 0x379   : > { %v4590_v4 = vpop.f32.mrf.mxu0  ;;  %v4661_v27 = vpop.f32.mrf.mxu1 }
 0x380   : > { %v4733_v44 = vpop.f32.mrf.mxu0  ;;  %v4804_v15 = vpop.f32.mrf.mxu1 }
 0x381   : > { %v4734_v21 = vadd.f32 %v4733_v44, %v4446_v49  ;;  %v4805_v52 = vadd.f32 %v4804_v15, %v4517_v38 }
 0x382   : > { %v4735_v57 = vpop.f32.mrf.mxu0  ;;  %v4806_v47 = vpop.f32.mrf.mxu1 }
 0x383   : > { %v9722_v32 = vadd.f32 %v4954_v5, %v4734_v21  ;;  %v9724_v36 = vadd.f32 %v4954_v5, %v4805_v52  ;;  %v4736_v41 = vadd.f32 %v4735_v57, %v4448_v34  ;;  %v4807_v1 = vadd.f32 %v4806_v47, %v4519_v35 }
 0x385   : > { %v4964_v0 = vrot.slane %v9722_v32, 4  ;;  %v4976_v40 = vrot.slane %v9724_v36, 4  ;;  %v9728_v29 = vadd.f32 %v4954_v5, %v4736_v41  ;;  %v9730_v18 = vadd.f32 %v4954_v5, %v4807_v1 }
 0x387   : > { %v4965_v9 = vmax.f32 %v9722_v32, %v4964_v0  ;;  %v4977_v55 = vmax.f32 %v9724_v36, %v4976_v40  ;;  %v4970_v7 = vrot.slane %v9728_v29, 4  ;;  %v4982_v46 = vrot.slane %v9730_v18, 4 }
 0x389   : > { %v4966_v51 = vrot.slane %v4965_v9, 2  ;;  %v4978_v23 = vrot.slane %v4977_v55, 2  ;;  %v4971_v60 = vmax.f32 %v9728_v29, %v4970_v7  ;;  %v4983_v14 = vmax.f32 %v9730_v18, %v4982_v46 }
 0x38a   : > { %v4875_v45 = vpop.f32.mrf.mxu0  ;;  %v4946_v48 = vpop.f32.mrf.mxu1 }
 0x38b   : > { %v4967_v11 = vmax.f32 %v4965_v9, %v4966_v51  ;;  %v4979_v10 = vmax.f32 %v4977_v55, %v4978_v23  ;;  %v4972_v19 = vrot.slane %v4971_v60, 2  ;;  %v4984_v59 = vrot.slane %v4983_v14, 2 }
 0x38c   : > { %v4876_v53 = vadd.f32 %v4875_v45, %v4588_v58  ;;  %v4947_v12 = vadd.f32 %v4946_v48, %v4659_v42  ;;  %v4877_v24 = vpop.f32.mrf.mxu0  ;;  %v4948_v56 = vpop.f32.mrf.mxu1 }
 0x38d   : > { %v4968_v54 = vrot.slane %v4967_v11, 1  ;;  %v4980_v63 = vrot.slane %v4979_v10, 1  ;;  %v4973_v16 = vmax.f32 %v4971_v60, %v4972_v19  ;;  %v4985_v2 = vmax.f32 %v4983_v14, %v4984_v59 }
 0x38e   : > { %v9738_v28 = vadd.f32 %v4954_v5, %v4876_v53  ;;  %v9740_v25 = vadd.f32 %v4954_v5, %v4947_v12  ;;  %v4878_v61 = vadd.f32 %v4877_v24, %v4590_v4  ;;  %v4949_v3 = vadd.f32 %v4948_v56, %v4661_v27 }
 0x38f   : > { %v9742_v13 = vmax.f32 %v4967_v11, %v4968_v54  ;;  %v9744_v17 = vmax.f32 %v4979_v10, %v4980_v63  ;;  %v4974_v37 = vrot.slane %v4973_v16, 1  ;;  %v4986_v22 = vrot.slane %v4985_v2, 1 }
 0x390   : > { %v4988_v26 = vrot.slane %v9738_v28, 4  ;;  %v5000_v31 = vrot.slane %v9740_v25, 4  ;;  %v9748_v30 = vadd.f32 %v4954_v5, %v4878_v61  ;;  %v9750_v8 = vadd.f32 %v4954_v5, %v4949_v3 }
 0x391   : > { %v5012_v33 = vsub.f32 %v9722_v32, %v9742_v13  ;;  %v5014_v20 = vsub.f32 %v9724_v36, %v9744_v17  ;;  %v9756_v50 = vmax.f32 %v4973_v16, %v4974_v37  ;;  %v9758_v62 = vmax.f32 %v4985_v2, %v4986_v22 }
 0x392   : > { %v4989_v6 = vmax.f32 %v9738_v28, %v4988_v26  ;;  %v5001_v43 = vmax.f32 %v9740_v25, %v5000_v31  ;;  %v4994_v39 = vrot.slane %v9748_v30, 4  ;;  %v5006_v49 = vrot.slane %v9750_v8, 4 }
 0x393   : > { %v5020_v38 = vmul.f32 1.442695, %v5012_v33  ;;  %v5024_v34 = vmul.f32 1.442695, %v5014_v20  ;;  %v5013_v35 = vsub.f32 %v9728_v29, %v9756_v50  ;;  %v5015_v58 = vsub.f32 %v9730_v18, %v9758_v62 }
 0x394   : > { %v4990_v42 = vrot.slane %v4989_v6, 2  ;;  %v5002_v4 = vrot.slane %v5001_v43, 2  ;;  %v4995_v27 = vmax.f32 %v9748_v30, %v4994_v39  ;;  %v5007_v44 = vmax.f32 %v9750_v8, %v5006_v49 }
 0x395   : > { %5669 = vpow2.f32 %v5020_v38  ;;  %v5022_v15 = vmul.f32 1.442695, %v5013_v35  ;;  %v5026_v5 = vmul.f32 1.442695, %v5015_v58 }
 0x396   : > { %5671 = vpow2.f32 %v5024_v34  ;;  %v4991_v21 = vmax.f32 %v4989_v6, %v4990_v42  ;;  %v5003_v52 = vmax.f32 %v5001_v43, %v5002_v4  ;;  %v4996_v57 = vrot.slane %v4995_v27, 2 }
 0x397   : > { %5673 = vpow2.f32 %v5022_v15  ;;  %v5008_v47 = vrot.slane %v5007_v44, 2 }
 0x398   : > { %5675 = vpow2.f32 %v5026_v5  ;;  %v4992_v41 = vrot.slane %v4991_v21, 1  ;;  %v5004_v1 = vrot.slane %v5003_v52, 1  ;;  %v4997_v0 = vmax.f32 %v4995_v27, %v4996_v57 }
 0x399   : > { %v5009_v40 = vmax.f32 %v5007_v44, %v5008_v47 }
 0x39a   : > { %v9770_v9 = vmax.f32 %v4991_v21, %v4992_v41  ;;  %v9772_v55 = vmax.f32 %v5003_v52, %v5004_v1  ;;  %v4998_v7 = vrot.slane %v4997_v0, 1 }
 0x39b   : > { %v5010_v46 = vrot.slane %v5009_v40, 1 }
 0x39c   : > { %v5016_v51 = vsub.f32 %v9738_v28, %v9770_v9  ;;  %v5018_v23 = vsub.f32 %v9740_v25, %v9772_v55  ;;  %v9778_v60 = vmax.f32 %v4997_v0, %v4998_v7 }
 0x39d   : > { %v9780_v14 = vmax.f32 %v5009_v40, %v5010_v46 }
 0x39e   : > { %v5028_v45 = vmul.f32 1.442695, %v5016_v51  ;;  %v5032_v48 = vmul.f32 1.442695, %v5018_v23  ;;  %v5017_v11 = vsub.f32 %v9748_v30, %v9778_v60 }
 0x39f   : > { %v5019_v10 = vsub.f32 %v9750_v8, %v9780_v14 }
 0x3a0   : > { %5677 = vpow2.f32 %v5028_v45  ;;  %v5030_v19 = vmul.f32 1.442695, %v5017_v11 }
 0x3a1   : > { %5679 = vpow2.f32 %v5032_v48  ;;  %v5034_v59 = vmul.f32 1.442695, %v5019_v10 }
 0x3a2   : > { %v5670_v53 = vpop.eup %5669  ;;  %5681 = vpow2.f32 %v5030_v19 }
 0x3a3   : > { %v5672_v12 = vpop.eup %5671  ;;  %v5036_v24 = vrot.slane %v5670_v53, 4  ;;  %5683 = vpow2.f32 %v5034_v59 }
 0x3a4   : > { %v5674_v56 = vpop.eup %5673  ;;  %v5048_v54 = vrot.slane %v5672_v12, 4 }
 0x3a5   : > { %v5676_v63 = vpop.eup %5675  ;;  %v5037_v16 = vadd.f32 %v5670_v53, %v5036_v24  ;;  %v5042_v2 = vrot.slane %v5674_v56, 4 }
 0x3a6   : > { %v5049_v61 = vadd.f32 %v5672_v12, %v5048_v54  ;;  %v5054_v3 = vrot.slane %v5676_v63, 4 }
 0x3a7   : > { %v5038_v37 = vrot.slane %v5037_v16, 2  ;;  %v5043_v22 = vadd.f32 %v5674_v56, %v5042_v2 }
 0x3a8   : > { %v5050_v26 = vrot.slane %v5049_v61, 2  ;;  %v5055_v31 = vadd.f32 %v5676_v63, %v5054_v3 }
 0x3a9   : > { %v5039_v33 = vadd.f32 %v5038_v37, %v5037_v16  ;;  %v5044_v20 = vrot.slane %v5043_v22, 2 }
 0x3aa   : > { %v5051_v6 = vadd.f32 %v5050_v26, %v5049_v61  ;;  %v5056_v43 = vrot.slane %v5055_v31, 2 }
 0x3ab   : > { %v5040_v39 = vrot.slane %v5039_v33, 1  ;;  %v5045_v49 = vadd.f32 %v5044_v20, %v5043_v22 }
 0x3ac   : > { %v5052_v38 = vrot.slane %v5051_v6, 1  ;;  %v5057_v34 = vadd.f32 %v5056_v43, %v5055_v31 }
 0x3ad   : > { %v5678_v35 = vpop.eup %5677  ;;  %v5041_v58 = vadd.f32 %v5040_v39, %v5039_v33  ;;  %v5046_v42 = vrot.slane %v5045_v49, 1 }
 0x3ae   : > { %v5680_v4 = vpop.eup %5679  ;;  %v5053_v27 = vadd.f32 %v5052_v38, %v5051_v6  ;;  %v5058_v44 = vrot.slane %v5057_v34, 1  ;;  %v5060_v15 = vrot.slane %v5678_v35, 4 }
 0x3af   : > { %v5682_v5 = vpop.eup %5681  ;;  %5685 = vlog2.f32 %v5041_v58  ;;  %v5047_v21 = vadd.f32 %v5046_v42, %v5045_v49  ;;  %v5072_v52 = vrot.slane %v5680_v4, 4 }
 0x3b0   : > { %v5684_v57 = vpop.eup %5683  ;;  %5687 = vlog2.f32 %v5053_v27  ;;  %v5059_v47 = vadd.f32 %v5058_v44, %v5057_v34  ;;  %v5061_v41 = vadd.f32 %v5678_v35, %v5060_v15  ;;  %v5066_v1 = vrot.slane %v5682_v5, 4 }
 0x3b1   : > { %5689 = vlog2.f32 %v5047_v21  ;;  %v5073_v0 = vadd.f32 %v5680_v4, %v5072_v52  ;;  %v5078_v40 = vrot.slane %v5684_v57, 4 }
 0x3b2   : > { %5691 = vlog2.f32 %v5059_v47  ;;  %v5062_v7 = vrot.slane %v5061_v41, 2  ;;  %v5067_v46 = vadd.f32 %v5682_v5, %v5066_v1 }
 0x3b3   : > { %v5074_v51 = vrot.slane %v5073_v0, 2  ;;  %v5079_v23 = vadd.f32 %v5684_v57, %v5078_v40 }
 0x3b4   : > { %v5063_v45 = vadd.f32 %v5062_v7, %v5061_v41  ;;  %v5068_v48 = vrot.slane %v5067_v46, 2 }
 0x3b5   : > { %v5075_v11 = vadd.f32 %v5074_v51, %v5073_v0  ;;  %v5080_v10 = vrot.slane %v5079_v23, 2 }
 0x3b6   : > { %v5064_v19 = vrot.slane %v5063_v45, 1  ;;  %v5069_v59 = vadd.f32 %v5068_v48, %v5067_v46 }
 0x3b7   : > { %v5076_v53 = vrot.slane %v5075_v11, 1  ;;  %v5081_v12 = vadd.f32 %v5080_v10, %v5079_v23 }
 0x3b8   : > { %v5065_v24 = vadd.f32 %v5064_v19, %v5063_v45  ;;  %v5070_v56 = vrot.slane %v5069_v59, 1 }
 0x3b9   : > { %v5077_v54 = vadd.f32 %v5076_v53, %v5075_v11  ;;  %v5082_v63 = vrot.slane %v5081_v12, 1 }
 0x3ba   : > { %5693 = vlog2.f32 %v5065_v24  ;;  %v5071_v16 = vadd.f32 %v5070_v56, %v5069_v59 }
 0x3bb   : > { %5695 = vlog2.f32 %v5077_v54  ;;  %v5083_v2 = vadd.f32 %v5082_v63, %v5081_v12 }
 0x3bc   : > { %v5686_v61 = vpop.eup %5685  ;;  %5697 = vlog2.f32 %v5071_v16 }
 0x3bd   : > { %v5688_v3 = vpop.eup %5687  ;;  %v5085_v37 = vmul.f32 0.6931472, %v5686_v61  ;;  %5699 = vlog2.f32 %v5083_v2 }
 0x3be   : > { %v5690_v22 = vpop.eup %5689  ;;  %v5089_v26 = vmul.f32 0.6931472, %v5688_v3 }
 0x3bf   : > { %v5692_v31 = vpop.eup %5691  ;;  %v5100_v33 = vadd.f32 %v5085_v37, %v9742_v13  ;;  %v5087_v20 = vmul.f32 0.6931472, %v5690_v22 }
 0x3c0   : > { %v5102_v6 = vadd.f32 %v5089_v26, %v9744_v17  ;;  %v5091_v43 = vmul.f32 0.6931472, %v5692_v31 }
 0x3c1   : > { %v5108_v39 = vsub.f32 %v9722_v32, %v5100_v33  ;;  %v5101_v49 = vadd.f32 %v5087_v20, %v9756_v50 }
 0x3c2   : > { %v5110_v38 = vsub.f32 %v9724_v36, %v5102_v6  ;;  %v5103_v13 = vadd.f32 %v5091_v43, %v9758_v62 }
 0x3c3   : > { %5116 = vst [vmem:[%s9792_s3] sm:$0xff] %v5108_v39  ;;  %v5109_v34 = vsub.f32 %v9728_v29, %v5101_v49 }
 0x3c4   : > { %5118 = vst [vmem:[%s9792_s3 + $0x10] sm:$0xff] %v5110_v38  ;;  %v5111_v35 = vsub.f32 %v9730_v18, %v5103_v13 }
 0x3c5   : > { %5117 = vst [vmem:[%s9792_s3 + $0x8] sm:$0xff] %v5109_v34 }
 0x3c6   : > { %5119 = vst [vmem:[%s9792_s3 + $0x18] sm:$0xff] %v5111_v35 }
 0x3c7   : > { %v5694_v58 = vpop.eup %5693 }
 0x3c8   : > { %v5696_v17 = vpop.eup %5695  ;;  %v5093_v42 = vmul.f32 0.6931472, %v5694_v58 }
 0x3c9   : > { %v5698_v32 = vpop.eup %5697  ;;  %v5097_v50 = vmul.f32 0.6931472, %v5696_v17 }
 0x3ca   : > { %v5700_v36 = vpop.eup %5699  ;;  %v5104_v62 = vadd.f32 %v5093_v42, %v9770_v9  ;;  %v5095_v4 = vmul.f32 0.6931472, %v5698_v32 }
 0x3cb   : > { %v5106_v29 = vadd.f32 %v5097_v50, %v9772_v55  ;;  %v5099_v27 = vmul.f32 0.6931472, %v5700_v36 }
 0x3cc   : > { %v5112_v18 = vsub.f32 %v9738_v28, %v5104_v62  ;;  %v5105_v44 = vadd.f32 %v5095_v4, %v9778_v60 }
 0x3cd   : > { %v5114_v15 = vsub.f32 %v9740_v25, %v5106_v29  ;;  %v5107_v5 = vadd.f32 %v5099_v27, %v9780_v14 }
 0x3ce   : > { %5120 = vst [vmem:[%s9792_s3 + $0x20] sm:$0xff] %v5112_v18  ;;  %v5113_v21 = vsub.f32 %v9748_v30, %v5105_v44 }
 0x3cf   : > { %5122 = vst [vmem:[%s9792_s3 + $0x30] sm:$0xff] %v5114_v15  ;;  %v5115_v52 = vsub.f32 %v9750_v8, %v5107_v5 }
 0x3d0   : > { %5121 = vst [vmem:[%s9792_s3 + $0x28] sm:$0xff] %v5113_v21 }
 0x3d1   : > { %5123 = vst [vmem:[%s9792_s3 + $0x38] sm:$0xff] %v5115_v52 }
 0x3d2 PF: > { %p9_p9 = scmp.ge.s32.totalorder %s5772_s13, 5   ;;  %s10353_s9 = smov %s5731_s10 }
 0x3d3   : > { %s10354_s10 = smov %s5781_s16  ;;  %s10355_s11 = smov %s5772_s13 }
 0x3d4   :  { %11 = sbr.rel (!%p9_p9) target bundleno = 2 (0x2), region = 86 }

</bundles_post_ra>
